<compile_context>
chip_gen: v5e
topology: v5e:2x2
jax: 0.10.0
libtpu: 0.0.40
codegen_flags: <defaults>
</compile_context>

<pallas_src>
import functools

import jax
import jax.numpy as jnp
from jax.experimental import pallas as pl
from jax.experimental.pallas import tpu as pltpu


# ---------------- fused Pallas kernel (B_blk images per grid step) ----------------

def _bottleneck_kernel(x_ref, s1_ref, b1_ref, w1_ref, b2_ref, w2_ref, b3_ref,
                       w3_ref, o_ref, hp_ref, *, bb, h, w, cin, pp, cout, co):
    bm = bb * h * w

    # ---- stage 1: relu(bn1(x)) -> conv1 1x1 (bn2 scale pre-folded) -> relu(+b2)
    x2d = x_ref[...].reshape(bm, cin).astype(jnp.float32)          # bf16 DMA -> f32 math
    a0 = jnp.maximum(x2d * s1_ref[...] + b1_ref[...], 0.0).astype(jnp.bfloat16)
    y1 = jnp.dot(a0, w1_ref[...], preferred_element_type=jnp.float32)
    h1 = jnp.maximum(y1 + b2_ref[...], 0.0).astype(jnp.bfloat16)

    # ---- haloed scratch for the 3x3 conv input. Interior lives at rows [1:h+1]
    #      and width offset `co` (multiple of the bf16 sublane pack -> aligned
    #      store). Only the halo strips that are read are zeroed; the interior is
    #      fully overwritten each step (megacore-safe). Columns [0, co-1) are
    #      never touched.
    zrow = jnp.zeros((bb, 1, w + 2, pp), jnp.bfloat16)
    zcol = jnp.zeros((bb, h, 1, pp), jnp.bfloat16)
    hp_ref[:, 0:1, co - 1:co + w + 1, :] = zrow                    # top halo row
    hp_ref[:, h + 1:h + 2, co - 1:co + w + 1, :] = zrow            # bottom halo row
    hp_ref[:, 1:h + 1, co - 1:co, :] = zcol                        # left halo column
    hp_ref[:, 1:h + 1, co + w:co + w + 1, :] = zcol                # right halo column
    hp_ref[:, 1:h + 1, co:co + w, :] = h1.reshape(bb, h, w, pp)    # interior (aligned)

    # ---- stage 2: 3x3 conv (stride 1, pad 1) as 9 per-tap matmuls, accumulating
    #      directly from the haloed scratch (no concat materialization). bn3 scale
    #      is pre-folded into w2; the accumulator starts at the bn3 bias so no
    #      separate bias-add pass is needed.
    acc = jnp.broadcast_to(b3_ref[...], (bm, pp)).astype(jnp.float32)
    for kh in range(3):
        for kw in range(3):
            tap = hp_ref[:, kh:kh + h, co - 1 + kw:co - 1 + kw + w, :]
            acc = acc + jnp.dot(tap.reshape(bm, pp), w2_ref[kh * 3 + kw],
                                preferred_element_type=jnp.float32)
    h2 = jnp.maximum(acc, 0.0).astype(jnp.bfloat16)

    # ---- stage 3: conv3 1x1 expansion + residual add (x already in VMEM)
    y3 = jnp.dot(h2, w3_ref[...], preferred_element_type=jnp.float32)
    o_ref[...] = (y3 + x2d).reshape(bb, h, w, cout)


# ---------------- glue: BN folding, lane padding (weights only), batch blocking ----

def _round_up(v, m):
    return (v + m - 1) // m * m


def _fold_bn(gamma, beta, mean, var, eps=1e-5):
    scale = gamma / jnp.sqrt(var + eps)
    bias = beta - mean * scale
    return scale, bias


def _pad_to(a, shape):
    return jnp.pad(a, [(0, t - s) for s, t in zip(a.shape, shape)])


def _vmem_limit_bytes():
    """Generation-aware VMEM budget (~75% of physical: 96 MiB v5e/v6e, 48 MiB v7x)."""
    cap = 128 * 1024 * 1024
    try:
        info = pltpu.get_tpu_info()
        cap = int(getattr(info, "vmem_capacity_bytes", cap) or cap)
    except Exception:
        pass
    return min(cap * 3 // 4, 112 * 1024 * 1024)


def _pick_batch_block(n, per_image_bytes, fixed_bytes, budget):
    """Largest divisor of n that fits the budget while keeping >= 2 grid steps."""
    best = 1
    for b in range(1, n + 1):
        if n % b:
            continue
        if n >= 2 and n // b < 2:      # keep both v7x TCs busy + pipeline depth
            continue
        if fixed_bytes + b * per_image_bytes <= budget:
            best = b
    return best


def bottleneck_forward(x_nchw, params):
    # NCHW -> NHWC + downcast to bf16 in one boundary pass (halves kernel input bytes).
    x = jnp.transpose(x_nchw, (0, 2, 3, 1)).astype(jnp.bfloat16)
    n, hh, ww, cin = x.shape
    p = params["w1"].shape[1]
    cout = params["w3"].shape[1]
    if cin != cout:
        raise ValueError("downsample=None requires inplanes == planes*expansion")

    pp = _round_up(p, 128)    # lane-dense intermediate channel dim (weights only)
    co = 16                   # interior width offset in the haloed scratch (bf16 pack)

    s1, b1 = _fold_bn(*params["bn1"])
    s2, b2 = _fold_bn(*params["bn2"])
    s3, b3 = _fold_bn(*params["bn3"])

    # Fold bn2 scale into conv1 output channels and bn3 scale into conv2 output
    # channels -> the kernel only applies a bias + relu after each conv.
    w1f = params["w1"] * s2[None, :]                               # (cin, p)
    w2f = params["w2"] * s3[None, None, None, :]                   # (3,3,p,p) HWIO

    s1_p = s1.reshape(1, cin).astype(jnp.float32)
    b1_p = b1.reshape(1, cin).astype(jnp.float32)
    b2_p = _pad_to(b2, (pp,)).reshape(1, pp).astype(jnp.float32)
    b3_p = _pad_to(b3, (pp,)).reshape(1, pp).astype(jnp.float32)
    w1_p = _pad_to(w1f, (cin, pp)).astype(jnp.bfloat16)            # (cin, pp)
    w2_p = _pad_to(w2f, (3, 3, pp, pp)).reshape(9, pp, pp).astype(jnp.bfloat16)
    w3_p = _pad_to(params["w3"], (pp, cout)).astype(jnp.bfloat16)  # (pp, cout)

    # ---- batch-block size from a VMEM estimate (generation-aware) ----
    vmem_limit = _vmem_limit_bytes()
    per_img = (hh * ww * cin * 2 * 2                # x tile, bf16, double-buffered
               + hh * ww * cout * 4 * 2             # out tile, f32, double-buffered
               + (hh + 2) * (co + ww + 1) * pp * 2  # haloed scratch (bf16)
               + hh * ww * pp * 16                  # transient values (heuristic)
               + hh * ww * cin * 4)                 # x upcast to f32
    fixed = (cin * pp + 9 * pp * pp + pp * cout) * 2 * 2 + (cin + pp) * 4 * 8
    bb = _pick_batch_block(n, per_img, fixed, int(vmem_limit * 0.7))

    kernel = functools.partial(_bottleneck_kernel, bb=bb, h=hh, w=ww,
                               cin=cin, pp=pp, cout=cout, co=co)
    out = pl.pallas_call(
        kernel,
        out_shape=jax.ShapeDtypeStruct((n, hh, ww, cout), jnp.float32),
        grid_spec=pltpu.PrefetchScalarGridSpec(
            num_scalar_prefetch=0,
            grid=(n // bb,),
            in_specs=[
                pl.BlockSpec((bb, hh, ww, cin), lambda i: (i, 0, 0, 0)),  # x (bf16)
                pl.BlockSpec((1, cin), lambda i: (0, 0)),                 # s1
                pl.BlockSpec((1, cin), lambda i: (0, 0)),                 # b1
                pl.BlockSpec((cin, pp), lambda i: (0, 0)),                # w1 (bf16)
                pl.BlockSpec((1, pp), lambda i: (0, 0)),                  # b2
                pl.BlockSpec((9, pp, pp), lambda i: (0, 0, 0)),           # w2 (bf16)
                pl.BlockSpec((1, pp), lambda i: (0, 0)),                  # b3
                pl.BlockSpec((pp, cout), lambda i: (0, 0)),               # w3 (bf16)
            ],
            out_specs=pl.BlockSpec((bb, hh, ww, cout), lambda i: (i, 0, 0, 0)),
            scratch_shapes=[
                pltpu.VMEM((bb, hh + 2, co + ww + 1, pp), jnp.bfloat16),  # haloed h1
            ],
        ),
        compiler_params=pltpu.CompilerParams(
            dimension_semantics=("parallel",),
            vmem_limit_bytes=int(vmem_limit),
        ),
    )(x, s1_p, b1_p, w1_p, b2_p, w2_p, b3_p, w3_p)

    return jnp.transpose(out, (0, 3, 1, 2))        # NHWC -> NCHW


# ---------------- pure-JAX reference for correctness check ----------------

def reference_forward(x_nchw, params, eps=1e-5):
    x = jnp.transpose(x_nchw, (0, 2, 3, 1))

    def bn(v, prm):
        g, b, mu, var = prm
        return (v - mu) / jnp.sqrt(var + eps) * g + b

    residual = x
    h = jax.nn.relu(bn(x, params["bn1"]))
    h = jnp.einsum("nhwc,cp->nhwp", h, params["w1"], precision="highest")
    h = jax.nn.relu(bn(h, params["bn2"]))
    h = jax.lax.conv_general_dilated(
        h, params["w2"], (1, 1), ((1, 1), (1, 1)),
        dimension_numbers=("NHWC", "HWIO", "NHWC"), precision="highest")
    h = jax.nn.relu(bn(h, params["bn3"]))
    h = jnp.einsum("nhwc,cp->nhwp", h, params["w3"], precision="highest")
    out = h + residual
    return jnp.transpose(out, (0, 3, 1, 2))


if __name__ == "__main__":
    key = jax.random.PRNGKey(0)
    n, inplanes, planes, hw = 2, 16, 4, 16
    expansion = 4
    cout = planes * expansion      # == inplanes so the residual add is valid

    keys = jax.random.split(key, 16)
    x = jax.random.normal(keys[0], (n, inplanes, hw, hw), jnp.float32)

    def bn_params(kg, kb, km, kv, c):
        gamma = 1.0 + 0.1 * jax.random.normal(kg, (c,), jnp.float32)
        beta = 0.1 * jax.random.normal(kb, (c,), jnp.float32)
        mean = 0.1 * jax.random.normal(km, (c,), jnp.float32)
        var = jnp.abs(jax.random.normal(kv, (c,), jnp.float32)) + 0.5
        return (gamma, beta, mean, var)

    params = {
        "bn1": bn_params(keys[1], keys[2], keys[3], keys[4], inplanes),
        "w1": 0.1 * jax.random.normal(keys[5], (inplanes, planes), jnp.float32),
        "bn2": bn_params(keys[6], keys[7], keys[8], keys[9], planes),
        "w2": 0.1 * jax.random.normal(keys[10], (3, 3, planes, planes), jnp.float32),
        "bn3": bn_params(keys[11], keys[12], keys[13], keys[14], planes),
        "w3": 0.1 * jax.random.normal(keys[15], (planes, cout), jnp.float32),
    }

    fwd = jax.jit(bottleneck_forward)
    out = jax.block_until_ready(fwd(x, params))
    ref = reference_forward(x, params)

    assert out.shape == (n, cout, hw, hw), out.shape
    max_err = float(jnp.max(jnp.abs(out - ref)))
    # bf16 activation DMA + bf16 MXU operands (f32 accumulation) vs. an f32 reference.
    assert jnp.allclose(out, ref, atol=2e-2, rtol=2e-2), max_err
    print("KERNEL_OK")
</pallas_src>

<mosaic_0001>
module attributes {stable_mosaic.version = 11 : i64} {
  func.func @_bottleneck_kernel(%arg0: i32, %arg1: memref<1x16x16x16xbf16, #tpu.memory_space<vmem>>, %arg2: memref<1x16xf32, #tpu.memory_space<vmem>>, %arg3: memref<1x16xf32, #tpu.memory_space<vmem>>, %arg4: memref<16x128xbf16, #tpu.memory_space<vmem>>, %arg5: memref<1x128xf32, #tpu.memory_space<vmem>>, %arg6: memref<9x128x128xbf16, #tpu.memory_space<vmem>>, %arg7: memref<1x128xf32, #tpu.memory_space<vmem>>, %arg8: memref<128x16xbf16, #tpu.memory_space<vmem>>, %arg9: memref<1x16x16x16xf32, #tpu.memory_space<vmem>>, %arg10: memref<1x18x33x128xbf16, #tpu.memory_space<vmem>>) attributes {dimension_semantics = [#tpu.dimension_semantics<parallel>], iteration_bounds = array<i64: 2>, scalar_prefetch = 0 : i64, scratch_operands = 1 : i64, tpu.core_type = #tpu.core_type<tc>, window_params = [{transform_indices = @transform_0, window_bounds = array<i64: 1, 16, 16, 16>}, {pipeline_mode = #tpu.pipeline_mode<synchronous>, transform_indices = @transform_1, window_bounds = array<i64: 1, 16>}, {pipeline_mode = #tpu.pipeline_mode<synchronous>, transform_indices = @transform_2, window_bounds = array<i64: 1, 16>}, {pipeline_mode = #tpu.pipeline_mode<synchronous>, transform_indices = @transform_3, window_bounds = array<i64: 16, 128>}, {pipeline_mode = #tpu.pipeline_mode<synchronous>, transform_indices = @transform_4, window_bounds = array<i64: 1, 128>}, {pipeline_mode = #tpu.pipeline_mode<synchronous>, transform_indices = @transform_5, window_bounds = array<i64: 9, 128, 128>}, {pipeline_mode = #tpu.pipeline_mode<synchronous>, transform_indices = @transform_6, window_bounds = array<i64: 1, 128>}, {pipeline_mode = #tpu.pipeline_mode<synchronous>, transform_indices = @transform_7, window_bounds = array<i64: 128, 16>}, {transform_indices = @transform_8, window_bounds = array<i64: 1, 16, 16, 16>}]} {
    %c0 = arith.constant 0 : index
    %c0_0 = arith.constant 0 : index
    %c0_1 = arith.constant 0 : index
    %c0_2 = arith.constant 0 : index
    %0 = vector.load %arg1[%c0, %c0_0, %c0_1, %c0_2] : memref<1x16x16x16xbf16, #tpu.memory_space<vmem>>, vector<1x16x16x16xbf16>
    %1 = vector.shape_cast %0 : vector<1x16x16x16xbf16> to vector<256x16xbf16>
    %2 = arith.extf %1 : vector<256x16xbf16> to vector<256x16xf32>
    %c0_3 = arith.constant 0 : index
    %c0_4 = arith.constant 0 : index
    %3 = vector.load %arg2[%c0_3, %c0_4] : memref<1x16xf32, #tpu.memory_space<vmem>>, vector<1x16xf32>
    %4 = vector.broadcast %3 : vector<1x16xf32> to vector<256x16xf32>
    %5 = arith.mulf %2, %4 : vector<256x16xf32>
    %c0_5 = arith.constant 0 : index
    %c0_6 = arith.constant 0 : index
    %6 = vector.load %arg3[%c0_5, %c0_6] : memref<1x16xf32, #tpu.memory_space<vmem>>, vector<1x16xf32>
    %7 = vector.broadcast %6 : vector<1x16xf32> to vector<256x16xf32>
    %8 = arith.addf %5, %7 : vector<256x16xf32>
    %cst = arith.constant 0.000000e+00 : f32
    %9 = vector.broadcast %cst : f32 to vector<256x16xf32>
    %10 = arith.maximumf %8, %9 : vector<256x16xf32>
    %11 = arith.truncf %10 : vector<256x16xf32> to vector<256x16xbf16>
    %c0_7 = arith.constant 0 : index
    %c0_8 = arith.constant 0 : index
    %12 = vector.load %arg4[%c0_7, %c0_8] : memref<16x128xbf16, #tpu.memory_space<vmem>>, vector<16x128xbf16>
    %cst_9 = arith.constant dense<0.000000e+00> : vector<256x128xf32>
    %13 = tpu.matmul %11, %12, %cst_9 {dimension_numbers = #tpu.dot_dimension_numbers<[1], [0], [0], [1], [0, 0, 1, 1], [], []>} : vector<256x16xbf16>, vector<16x128xbf16>, vector<256x128xf32> -> vector<256x128xf32>
    %c0_10 = arith.constant 0 : index
    %c0_11 = arith.constant 0 : index
    %14 = vector.load %arg5[%c0_10, %c0_11] : memref<1x128xf32, #tpu.memory_space<vmem>>, vector<1x128xf32>
    %15 = vector.broadcast %14 : vector<1x128xf32> to vector<256x128xf32>
    %16 = arith.addf %13, %15 : vector<256x128xf32>
    %cst_12 = arith.constant 0.000000e+00 : f32
    %17 = vector.broadcast %cst_12 : f32 to vector<256x128xf32>
    %18 = arith.maximumf %16, %17 : vector<256x128xf32>
    %19 = arith.truncf %18 : vector<256x128xf32> to vector<256x128xbf16>
    %cst_13 = arith.constant 0.000000e+00 : bf16
    %20 = vector.broadcast %cst_13 : bf16 to vector<1x1x18x128xbf16>
    %cst_14 = arith.constant 0.000000e+00 : bf16
    %21 = vector.broadcast %cst_14 : bf16 to vector<1x16x1x128xbf16>
    %c0_15 = arith.constant 0 : index
    %c0_16 = arith.constant 0 : index
    %c15 = arith.constant 15 : index
    %c0_17 = arith.constant 0 : index
    %22 = vector.load %arg10[%c0_15, %c0_16, %c15, %c0_17] : memref<1x18x33x128xbf16, #tpu.memory_space<vmem>>, vector<1x1x18x128xbf16>
    tpu.vector_store %arg10[%c0_15, %c0_16, %c15, %c0_17], %20 {strides = array<i32>} : memref<1x18x33x128xbf16, #tpu.memory_space<vmem>>, vector<1x1x18x128xbf16>,
    %c0_18 = arith.constant 0 : index
    %c17 = arith.constant 17 : index
    %c15_19 = arith.constant 15 : index
    %c0_20 = arith.constant 0 : index
    %23 = vector.load %arg10[%c0_18, %c17, %c15_19, %c0_20] : memref<1x18x33x128xbf16, #tpu.memory_space<vmem>>, vector<1x1x18x128xbf16>
    tpu.vector_store %arg10[%c0_18, %c17, %c15_19, %c0_20], %20 {strides = array<i32>} : memref<1x18x33x128xbf16, #tpu.memory_space<vmem>>, vector<1x1x18x128xbf16>,
    %c0_21 = arith.constant 0 : index
    %c1 = arith.constant 1 : index
    %c15_22 = arith.constant 15 : index
    %c0_23 = arith.constant 0 : index
    %24 = vector.load %arg10[%c0_21, %c1, %c15_22, %c0_23] : memref<1x18x33x128xbf16, #tpu.memory_space<vmem>>, vector<1x16x1x128xbf16>
    tpu.vector_store %arg10[%c0_21, %c1, %c15_22, %c0_23], %21 {strides = array<i32>} : memref<1x18x33x128xbf16, #tpu.memory_space<vmem>>, vector<1x16x1x128xbf16>,
    %c0_24 = arith.constant 0 : index
    %c1_25 = arith.constant 1 : index
    %c32 = arith.constant 32 : index
    %c0_26 = arith.constant 0 : index
    %25 = vector.load %arg10[%c0_24, %c1_25, %c32, %c0_26] : memref<1x18x33x128xbf16, #tpu.memory_space<vmem>>, vector<1x16x1x128xbf16>
    tpu.vector_store %arg10[%c0_24, %c1_25, %c32, %c0_26], %21 {strides = array<i32>} : memref<1x18x33x128xbf16, #tpu.memory_space<vmem>>, vector<1x16x1x128xbf16>,
    %26 = vector.shape_cast %19 : vector<256x128xbf16> to vector<1x16x16x128xbf16>
    %c0_27 = arith.constant 0 : index
    %c1_28 = arith.constant 1 : index
    %c16 = arith.constant 16 : index
    %c0_29 = arith.constant 0 : index
    %27 = vector.load %arg10[%c0_27, %c1_28, %c16, %c0_29] : memref<1x18x33x128xbf16, #tpu.memory_space<vmem>>, vector<1x16x16x128xbf16>
    tpu.vector_store %arg10[%c0_27, %c1_28, %c16, %c0_29], %26 {strides = array<i32>} : memref<1x18x33x128xbf16, #tpu.memory_space<vmem>>, vector<1x16x16x128xbf16>,
    %c0_30 = arith.constant 0 : index
    %c0_31 = arith.constant 0 : index
    %28 = vector.load %arg7[%c0_30, %c0_31] : memref<1x128xf32, #tpu.memory_space<vmem>>, vector<1x128xf32>
    %29 = vector.shape_cast %28 : vector<1x128xf32> to vector<1x128xf32>
    %30 = vector.broadcast %29 : vector<1x128xf32> to vector<256x128xf32>
    %c0_32 = arith.constant 0 : index
    %c0_33 = arith.constant 0 : index
    %c15_34 = arith.constant 15 : index
    %c0_35 = arith.constant 0 : index
    %31 = vector.load %arg10[%c0_32, %c0_33, %c15_34, %c0_35] : memref<1x18x33x128xbf16, #tpu.memory_space<vmem>>, vector<1x16x16x128xbf16>
    %32 = vector.shape_cast %31 : vector<1x16x16x128xbf16> to vector<256x128xbf16>
    %c0_36 = arith.constant 0 : index
    %c0_37 = arith.constant 0 : index
    %c0_38 = arith.constant 0 : index
    %33 = vector.load %arg6[%c0_36, %c0_37, %c0_38] : memref<9x128x128xbf16, #tpu.memory_space<vmem>>, vector<1x128x128xbf16>
    %34 = vector.shape_cast %33 : vector<1x128x128xbf16> to vector<128x128xbf16>
    %cst_39 = arith.constant dense<0.000000e+00> : vector<256x128xf32>
    %35 = tpu.matmul %32, %34, %cst_39 {dimension_numbers = #tpu.dot_dimension_numbers<[1], [0], [0], [1], [0, 0, 1, 1], [], []>} : vector<256x128xbf16>, vector<128x128xbf16>, vector<256x128xf32> -> vector<256x128xf32>
    %36 = arith.addf %30, %35 : vector<256x128xf32>
    %c0_40 = arith.constant 0 : index
    %c0_41 = arith.constant 0 : index
    %c16_42 = arith.constant 16 : index
    %c0_43 = arith.constant 0 : index
    %37 = vector.load %arg10[%c0_40, %c0_41, %c16_42, %c0_43] : memref<1x18x33x128xbf16, #tpu.memory_space<vmem>>, vector<1x16x16x128xbf16>
    %38 = vector.shape_cast %37 : vector<1x16x16x128xbf16> to vector<256x128xbf16>
    %c1_44 = arith.constant 1 : index
    %c0_45 = arith.constant 0 : index
    %c0_46 = arith.constant 0 : index
    %39 = vector.load %arg6[%c1_44, %c0_45, %c0_46] : memref<9x128x128xbf16, #tpu.memory_space<vmem>>, vector<1x128x128xbf16>
    %40 = vector.shape_cast %39 : vector<1x128x128xbf16> to vector<128x128xbf16>
    %cst_47 = arith.constant dense<0.000000e+00> : vector<256x128xf32>
    %41 = tpu.matmul %38, %40, %cst_47 {dimension_numbers = #tpu.dot_dimension_numbers<[1], [0], [0], [1], [0, 0, 1, 1], [], []>} : vector<256x128xbf16>, vector<128x128xbf16>, vector<256x128xf32> -> vector<256x128xf32>
    %42 = arith.addf %36, %41 : vector<256x128xf32>
    %c0_48 = arith.constant 0 : index
    %c0_49 = arith.constant 0 : index
    %c17_50 = arith.constant 17 : index
    %c0_51 = arith.constant 0 : index
    %43 = vector.load %arg10[%c0_48, %c0_49, %c17_50, %c0_51] : memref<1x18x33x128xbf16, #tpu.memory_space<vmem>>, vector<1x16x16x128xbf16>
    %44 = vector.shape_cast %43 : vector<1x16x16x128xbf16> to vector<256x128xbf16>
    %c2 = arith.constant 2 : index
    %c0_52 = arith.constant 0 : index
    %c0_53 = arith.constant 0 : index
    %45 = vector.load %arg6[%c2, %c0_52, %c0_53] : memref<9x128x128xbf16, #tpu.memory_space<vmem>>, vector<1x128x128xbf16>
    %46 = vector.shape_cast %45 : vector<1x128x128xbf16> to vector<128x128xbf16>
    %cst_54 = arith.constant dense<0.000000e+00> : vector<256x128xf32>
    %47 = tpu.matmul %44, %46, %cst_54 {dimension_numbers = #tpu.dot_dimension_numbers<[1], [0], [0], [1], [0, 0, 1, 1], [], []>} : vector<256x128xbf16>, vector<128x128xbf16>, vector<256x128xf32> -> vector<256x128xf32>
    %48 = arith.addf %42, %47 : vector<256x128xf32>
    %c0_55 = arith.constant 0 : index
    %c1_56 = arith.constant 1 : index
    %c15_57 = arith.constant 15 : index
    %c0_58 = arith.constant 0 : index
    %49 = vector.load %arg10[%c0_55, %c1_56, %c15_57, %c0_58] : memref<1x18x33x128xbf16, #tpu.memory_space<vmem>>, vector<1x16x16x128xbf16>
    %50 = vector.shape_cast %49 : vector<1x16x16x128xbf16> to vector<256x128xbf16>
    %c3 = arith.constant 3 : index
    %c0_59 = arith.constant 0 : index
    %c0_60 = arith.constant 0 : index
    %51 = vector.load %arg6[%c3, %c0_59, %c0_60] : memref<9x128x128xbf16, #tpu.memory_space<vmem>>, vector<1x128x128xbf16>
    %52 = vector.shape_cast %51 : vector<1x128x128xbf16> to vector<128x128xbf16>
    %cst_61 = arith.constant dense<0.000000e+00> : vector<256x128xf32>
    %53 = tpu.matmul %50, %52, %cst_61 {dimension_numbers = #tpu.dot_dimension_numbers<[1], [0], [0], [1], [0, 0, 1, 1], [], []>} : vector<256x128xbf16>, vector<128x128xbf16>, vector<256x128xf32> -> vector<256x128xf32>
    %54 = arith.addf %48, %53 : vector<256x128xf32>
    %c0_62 = arith.constant 0 : index
    %c1_63 = arith.constant 1 : index
    %c16_64 = arith.constant 16 : index
    %c0_65 = arith.constant 0 : index
    %55 = vector.load %arg10[%c0_62, %c1_63, %c16_64, %c0_65] : memref<1x18x33x128xbf16, #tpu.memory_space<vmem>>, vector<1x16x16x128xbf16>
    %56 = vector.shape_cast %55 : vector<1x16x16x128xbf16> to vector<256x128xbf16>
    %c4 = arith.constant 4 : index
    %c0_66 = arith.constant 0 : index
    %c0_67 = arith.constant 0 : index
    %57 = vector.load %arg6[%c4, %c0_66, %c0_67] : memref<9x128x128xbf16, #tpu.memory_space<vmem>>, vector<1x128x128xbf16>
    %58 = vector.shape_cast %57 : vector<1x128x128xbf16> to vector<128x128xbf16>
    %cst_68 = arith.constant dense<0.000000e+00> : vector<256x128xf32>
    %59 = tpu.matmul %56, %58, %cst_68 {dimension_numbers = #tpu.dot_dimension_numbers<[1], [0], [0], [1], [0, 0, 1, 1], [], []>} : vector<256x128xbf16>, vector<128x128xbf16>, vector<256x128xf32> -> vector<256x128xf32>
    %60 = arith.addf %54, %59 : vector<256x128xf32>
    %c0_69 = arith.constant 0 : index
    %c1_70 = arith.constant 1 : index
    %c17_71 = arith.constant 17 : index
    %c0_72 = arith.constant 0 : index
    %61 = vector.load %arg10[%c0_69, %c1_70, %c17_71, %c0_72] : memref<1x18x33x128xbf16, #tpu.memory_space<vmem>>, vector<1x16x16x128xbf16>
    %62 = vector.shape_cast %61 : vector<1x16x16x128xbf16> to vector<256x128xbf16>
    %c5 = arith.constant 5 : index
    %c0_73 = arith.constant 0 : index
    %c0_74 = arith.constant 0 : index
    %63 = vector.load %arg6[%c5, %c0_73, %c0_74] : memref<9x128x128xbf16, #tpu.memory_space<vmem>>, vector<1x128x128xbf16>
    %64 = vector.shape_cast %63 : vector<1x128x128xbf16> to vector<128x128xbf16>
    %cst_75 = arith.constant dense<0.000000e+00> : vector<256x128xf32>
    %65 = tpu.matmul %62, %64, %cst_75 {dimension_numbers = #tpu.dot_dimension_numbers<[1], [0], [0], [1], [0, 0, 1, 1], [], []>} : vector<256x128xbf16>, vector<128x128xbf16>, vector<256x128xf32> -> vector<256x128xf32>
    %66 = arith.addf %60, %65 : vector<256x128xf32>
    %c0_76 = arith.constant 0 : index
    %c2_77 = arith.constant 2 : index
    %c15_78 = arith.constant 15 : index
    %c0_79 = arith.constant 0 : index
    %67 = vector.load %arg10[%c0_76, %c2_77, %c15_78, %c0_79] : memref<1x18x33x128xbf16, #tpu.memory_space<vmem>>, vector<1x16x16x128xbf16>
    %68 = vector.shape_cast %67 : vector<1x16x16x128xbf16> to vector<256x128xbf16>
    %c6 = arith.constant 6 : index
    %c0_80 = arith.constant 0 : index
    %c0_81 = arith.constant 0 : index
    %69 = vector.load %arg6[%c6, %c0_80, %c0_81] : memref<9x128x128xbf16, #tpu.memory_space<vmem>>, vector<1x128x128xbf16>
    %70 = vector.shape_cast %69 : vector<1x128x128xbf16> to vector<128x128xbf16>
    %cst_82 = arith.constant dense<0.000000e+00> : vector<256x128xf32>
    %71 = tpu.matmul %68, %70, %cst_82 {dimension_numbers = #tpu.dot_dimension_numbers<[1], [0], [0], [1], [0, 0, 1, 1], [], []>} : vector<256x128xbf16>, vector<128x128xbf16>, vector<256x128xf32> -> vector<256x128xf32>
    %72 = arith.addf %66, %71 : vector<256x128xf32>
    %c0_83 = arith.constant 0 : index
    %c2_84 = arith.constant 2 : index
    %c16_85 = arith.constant 16 : index
    %c0_86 = arith.constant 0 : index
    %73 = vector.load %arg10[%c0_83, %c2_84, %c16_85, %c0_86] : memref<1x18x33x128xbf16, #tpu.memory_space<vmem>>, vector<1x16x16x128xbf16>
    %74 = vector.shape_cast %73 : vector<1x16x16x128xbf16> to vector<256x128xbf16>
    %c7 = arith.constant 7 : index
    %c0_87 = arith.constant 0 : index
    %c0_88 = arith.constant 0 : index
    %75 = vector.load %arg6[%c7, %c0_87, %c0_88] : memref<9x128x128xbf16, #tpu.memory_space<vmem>>, vector<1x128x128xbf16>
    %76 = vector.shape_cast %75 : vector<1x128x128xbf16> to vector<128x128xbf16>
    %cst_89 = arith.constant dense<0.000000e+00> : vector<256x128xf32>
    %77 = tpu.matmul %74, %76, %cst_89 {dimension_numbers = #tpu.dot_dimension_numbers<[1], [0], [0], [1], [0, 0, 1, 1], [], []>} : vector<256x128xbf16>, vector<128x128xbf16>, vector<256x128xf32> -> vector<256x128xf32>
    %78 = arith.addf %72, %77 : vector<256x128xf32>
    %c0_90 = arith.constant 0 : index
    %c2_91 = arith.constant 2 : index
    %c17_92 = arith.constant 17 : index
    %c0_93 = arith.constant 0 : index
    %79 = vector.load %arg10[%c0_90, %c2_91, %c17_92, %c0_93] : memref<1x18x33x128xbf16, #tpu.memory_space<vmem>>, vector<1x16x16x128xbf16>
    %80 = vector.shape_cast %79 : vector<1x16x16x128xbf16> to vector<256x128xbf16>
    %c8 = arith.constant 8 : index
    %c0_94 = arith.constant 0 : index
    %c0_95 = arith.constant 0 : index
    %81 = vector.load %arg6[%c8, %c0_94, %c0_95] : memref<9x128x128xbf16, #tpu.memory_space<vmem>>, vector<1x128x128xbf16>
    %82 = vector.shape_cast %81 : vector<1x128x128xbf16> to vector<128x128xbf16>
    %cst_96 = arith.constant dense<0.000000e+00> : vector<256x128xf32>
    %83 = tpu.matmul %80, %82, %cst_96 {dimension_numbers = #tpu.dot_dimension_numbers<[1], [0], [0], [1], [0, 0, 1, 1], [], []>} : vector<256x128xbf16>, vector<128x128xbf16>, vector<256x128xf32> -> vector<256x128xf32>
    %84 = arith.addf %78, %83 : vector<256x128xf32>
    %cst_97 = arith.constant 0.000000e+00 : f32
    %85 = vector.broadcast %cst_97 : f32 to vector<256x128xf32>
    %86 = arith.maximumf %84, %85 : vector<256x128xf32>
    %87 = arith.truncf %86 : vector<256x128xf32> to vector<256x128xbf16>
    %c0_98 = arith.constant 0 : index
    %c0_99 = arith.constant 0 : index
    %88 = vector.load %arg8[%c0_98, %c0_99] : memref<128x16xbf16, #tpu.memory_space<vmem>>, vector<128x16xbf16>
    %cst_100 = arith.constant dense<0.000000e+00> : vector<256x16xf32>
    %89 = tpu.matmul %87, %88, %cst_100 {dimension_numbers = #tpu.dot_dimension_numbers<[1], [0], [0], [1], [0, 0, 1, 1], [], []>} : vector<256x128xbf16>, vector<128x16xbf16>, vector<256x16xf32> -> vector<256x16xf32>
    %90 = arith.addf %89, %2 : vector<256x16xf32>
    %91 = vector.shape_cast %90 : vector<256x16xf32> to vector<1x16x16x16xf32>
    %c0_101 = arith.constant 0 : index
    %c0_102 = arith.constant 0 : index
    %c0_103 = arith.constant 0 : index
    %c0_104 = arith.constant 0 : index
    %92 = vector.load %arg9[%c0_101, %c0_102, %c0_103, %c0_104] : memref<1x16x16x16xf32, #tpu.memory_space<vmem>>, vector<1x16x16x16xf32>
    tpu.vector_store %arg9[%c0_101, %c0_102, %c0_103, %c0_104], %91 {strides = array<i32>} : memref<1x16x16x16xf32, #tpu.memory_space<vmem>>, vector<1x16x16x16xf32>,
    return
  }
  func.func @transform_0(%arg0: i32) -> (i32, i32, i32, i32) {
    %c0_i32 = arith.constant 0 : i32
    %c0_i32_0 = arith.constant 0 : i32
    %c0_i32_1 = arith.constant 0 : i32
    %c0_i32_2 = arith.constant 0 : i32
    return %arg0, %c0_i32, %c0_i32_0, %c0_i32_1 : i32, i32, i32, i32
  }
  func.func @transform_1(%arg0: i32) -> (i32, i32) {
    %c0_i32 = arith.constant 0 : i32
    %c0_i32_0 = arith.constant 0 : i32
    %c0_i32_1 = arith.constant 0 : i32
    return %c0_i32, %c0_i32_0 : i32, i32
  }
  func.func @transform_2(%arg0: i32) -> (i32, i32) {
    %c0_i32 = arith.constant 0 : i32
    %c0_i32_0 = arith.constant 0 : i32
    %c0_i32_1 = arith.constant 0 : i32
    return %c0_i32, %c0_i32_0 : i32, i32
  }
  func.func @transform_3(%arg0: i32) -> (i32, i32) {
    %c0_i32 = arith.constant 0 : i32
    %c0_i32_0 = arith.constant 0 : i32
    %c0_i32_1 = arith.constant 0 : i32
    return %c0_i32, %c0_i32_0 : i32, i32
  }
  func.func @transform_4(%arg0: i32) -> (i32, i32) {
    %c0_i32 = arith.constant 0 : i32
    %c0_i32_0 = arith.constant 0 : i32
    %c0_i32_1 = arith.constant 0 : i32
    return %c0_i32, %c0_i32_0 : i32, i32
  }
  func.func @transform_5(%arg0: i32) -> (i32, i32, i32) {
    %c0_i32 = arith.constant 0 : i32
    %c0_i32_0 = arith.constant 0 : i32
    %c0_i32_1 = arith.constant 0 : i32
    %c0_i32_2 = arith.constant 0 : i32
    return %c0_i32, %c0_i32_0, %c0_i32_1 : i32, i32, i32
  }
  func.func @transform_6(%arg0: i32) -> (i32, i32) {
    %c0_i32 = arith.constant 0 : i32
    %c0_i32_0 = arith.constant 0 : i32
    %c0_i32_1 = arith.constant 0 : i32
    return %c0_i32, %c0_i32_0 : i32, i32
  }
  func.func @transform_7(%arg0: i32) -> (i32, i32) {
    %c0_i32 = arith.constant 0 : i32
    %c0_i32_0 = arith.constant 0 : i32
    %c0_i32_1 = arith.constant 0 : i32
    return %c0_i32, %c0_i32_0 : i32, i32
  }
  func.func @transform_8(%arg0: i32) -> (i32, i32, i32, i32) {
    %c0_i32 = arith.constant 0 : i32
    %c0_i32_0 = arith.constant 0 : i32
    %c0_i32_1 = arith.constant 0 : i32
    %c0_i32_2 = arith.constant 0 : i32
    return %arg0, %c0_i32, %c0_i32_0, %c0_i32_1 : i32, i32, i32, i32
  }
}

</mosaic_0001>

<bundles_post_ra>
// kernel: bottleneck_forward.1
= control target key start
LH: loop header
LB: loop body
LE: loop exit
PB: predicated region body
PF: predicated region fallthrough
CT: control target
= control target key end

     0   :  { %s7063_s27 = smov 0   ;;  %s9076_s0 = inlined_call_operand.vmem [shape: bf16[2,16,16,16], index: 0, kind: input, shape index: {}]   ;;  %s9077_s1 = inlined_call_operand.vmem [shape: f32[1,16], index: 1, kind: input, shape index: {}]   ;;  %s9078_s2 = inlined_call_operand.vmem [shape: f32[1,16], index: 2, kind: input, shape index: {}]   ;;  %s9079_s3 = inlined_call_operand.vmem [shape: bf16[16,128], index: 3, kind: input, shape index: {}]   ;;  %s9080_s4 = inlined_call_operand.vmem [shape: f32[1,128], index: 4, kind: input, shape index: {}]   ;;  %s9081_s5 = inlined_call_operand.vmem [shape: bf16[9,128,128], index: 5, kind: input, shape index: {}]   ;;  %s9082_s6 = inlined_call_operand.vmem [shape: f32[1,128], index: 6, kind: input, shape index: {}]   ;;  %s9083_s7 = inlined_call_operand.vmem [shape: bf16[128,16], index: 7, kind: input, shape index: {}]   ;;  %s9084_s8 = inlined_call_operand.vmem [shape: f32[2,16,16,16], index: 8, kind: output, shape index: {}]  }
   0x1 LB: > { %s5996_s28 = sadd.s32 4294967295, %s7015_s27   ;;  %p6000_p0 = scmp.ge.s32.totalorder %s7015_s27, 1  ;;  %s7015_s27 = sphi %s7063_s27, %s18_s27  }
   0x2   : > { %p262_p1 = scmp.lt.s32.totalorder %s7015_s27, 3 }
   0x4   : > { %p263_p2 = pnand %p6000_p0, %p262_p1 }
   0x6   : > { %266 = sbr.rel (%p263_p2) target bundleno = 1279 (0x4ff), region = 52 }
   0xb   : > { %v6717_v0 = vld [vmem:[%s9079_s3] sm:$0xff]  ;;  %p296_p3 = scmp.lt.s32.totalorder %s5996_s28, 1  ;;  %vm503_vm0 = vcmask 130048   ;;  %v7176_v58 = vld [vmem:[%s9081_s5 + $0x78] sm:$0xff]  ;;  %v7182_v59 = vld [vmem:[%s9081_s5 + $0x70] sm:$0xff]  ;;  %vm705_vm1 = vcmask 1043459  }
   0xc   : > { %559 = vmatpush.bf16.msra.mxu0 %v6717_v0  ;;  %6973 = vmatpush.bf16.msra.mxu3 %v6717_v0  ;;  %v7085_v1 = vld [vmem:[%s9077_s1] ss:$0 sm:$0xff]  ;;  %v7190_v62 = vld [vmem:[%s9081_s5 + $0x68] sm:$0xff]  ;;  %vm706_vm2 = vsmask.f32 7950  ;;  %vm713_vm7 = vcmask 1040384  }
   0xd   : > { %s9456_s28 = smov (!%p296_p3, %s5996_s28), 1  ;;  %v7095_v5 = vld [vmem:[%s9078_s2] ss:$0 sm:$0xff]  ;;  %1673 = vmatpush.bf16.msra.mxu2 %v7176_v58  ;;  %vm7247_vm3 = vmand %vm705_vm1, %vm706_vm2  ;;  %vm714_vm4 = vsmask.f32 256 }
   0xe   : > { %s6715_s9 = sshll.u32 %s9456_s28, 7  ;;  %vm909_vm5 = vsmask.f32 4368  ;;  %vm7307_vm8 = vmand %vm713_vm7, %vm714_vm4  ;;  %vm1842_vm9 = vsmask.f32 3328  ;;  %s6716_s15 = sshll.u32 %s9456_s28, 8 }
   0xf   : > { %s7080_s12 = scalar_lea.vmem %s9076_s0, %s6715_s9  ;;  %vm7284_vm6 = vmor %vm714_vm4, %vm909_vm5  ;;  %vm1843_vm10 = vsmask.f32 7440  ;;  %s8894_s18 = scalar_lea.vmem %s9084_s8, %s6716_s15 }
  0x10   : > { %v7088_v2 = vld [vmem:[%s7080_s12] sm:$0xff]   ;;  %v7104_v8 = vld [vmem:[%s7080_s12 + $0x8] sm:$0xff]   ;;  %v7120_v22 = vld [vmem:[%s7080_s12 + $0x10] sm:$0xff]  }
  0x11   : > { %9153 = vst [vmem:[#allocation3_spill] sm:$0xff] %v7088_v2  ;;  %v9116_v3 = vunpack.c.l.bf16 %v7088_v2  ;;  %v9115_v4 = vunpack.c.h.bf16 %v7088_v2  ;;  %v9114_v13 = vunpack.c.l.bf16 %v7104_v8  ;;  %v9113_v14 = vunpack.c.h.bf16 %v7104_v8  ;;  %v7134_v32 = vld [vmem:[%s7080_s12 + $0x18] sm:$0xff]   ;;  %v7148_v42 = vld [vmem:[%s7080_s12 + $0x20] sm:$0xff]   ;;  %v7162_v52 = vld [vmem:[%s7080_s12 + $0x28] sm:$0xff]   ;;  %1674 = vmatpush.bf16.msra.mxu2 %v7182_v59 }
  0x12   : > { %9154 = vst [vmem:[#allocation4_spill] sm:$0xff] %v7104_v8  ;;  %v9112_v24 = vunpack.c.l.bf16 %v7120_v22  ;;  %v9111_v25 = vunpack.c.h.bf16 %v7120_v22  ;;  %v9110_v34 = vunpack.c.l.bf16 %v7134_v32  ;;  %v9109_v35 = vunpack.c.h.bf16 %v7134_v32  ;;  %vm7678_vm11 = vmor %vm1842_vm9, %vm1843_vm10 }
  0x13   : > { %v375_v6 = vmul.f32 %v7085_v1, %v9116_v3  ;;  %v376_v7 = vmul.f32 %v7085_v1, %v9115_v4  ;;  %v377_v16 = vmul.f32 %v7085_v1, %v9114_v13  ;;  %v378_v17 = vmul.f32 %v7085_v1, %v9113_v14  ;;  %9155 = vst [vmem:[#allocation5_spill] sm:$0xff] %v7120_v22 }
  0x14   : > { %v379_v26 = vmul.f32 %v7085_v1, %v9112_v24  ;;  %v380_v27 = vmul.f32 %v7085_v1, %v9111_v25  ;;  %9156 = vst [vmem:[#allocation6_spill] sm:$0xff] %v7134_v32  ;;  %v381_v36 = vmul.f32 %v7085_v1, %v9110_v34  ;;  %v382_v37 = vmul.f32 %v7085_v1, %v9109_v35 }
  0x15   : > { %v411_v9 = vadd.f32 %v7095_v5, %v375_v6  ;;  %v412_v10 = vadd.f32 %v7095_v5, %v376_v7  ;;  %v413_v18 = vadd.f32 %v7095_v5, %v377_v16  ;;  %v414_v19 = vadd.f32 %v7095_v5, %v378_v17  ;;  %9157 = vst [vmem:[#allocation7_spill] sm:$0xff] %v7148_v42  ;;  %v7193_v6 = vld [vmem:[%s7080_s12 + $0x30] sm:$0xff]   ;;  %v7211_v16 = vld [vmem:[%s9081_s5 + $0x60] sm:$0xff] }
  0x16   : > { %v415_v28 = vadd.f32 %v7095_v5, %v379_v26  ;;  %v416_v29 = vadd.f32 %v7095_v5, %v380_v27  ;;  %v417_v38 = vadd.f32 %v7095_v5, %v381_v36  ;;  %v418_v39 = vadd.f32 %v7095_v5, %v382_v37  ;;  %9158 = vst [vmem:[#allocation8_spill] sm:$0xff] %v7162_v52  ;;  %v6740_v17 = vld [vmem:[%s9081_s5 + $0x30] sm:$0xff]  ;;  %v7234_v26 = vld [vmem:[%s7080_s12 + $0x38] sm:$0xff]   ;;  %v7245_v36 = vld [vmem:[%s9081_s5 + $0x48] sm:$0xff] }
  0x17   : > { %v443_v11 = vmax.f32 %v411_v9, 0.0  ;;  %v444_v12 = vmax.f32 %v412_v10, 0.0  ;;  %v445_v20 = vmax.f32 %v413_v18, 0.0  ;;  %v446_v21 = vmax.f32 %v414_v19, 0.0  ;;  %9159 = vst [vmem:[#allocation9_spill] sm:$0xff] %v7193_v6  ;;  %1675 = vmatpush.bf16.msra.mxu2 %v7190_v62  ;;  %v7220_v18 = vld [vmem:[%s9081_s5 + $0x58] sm:$0xff] }
  0x18   : > { %v447_v30 = vmax.f32 %v415_v28, 0.0  ;;  %v448_v31 = vmax.f32 %v416_v29, 0.0  ;;  %v449_v40 = vmax.f32 %v417_v38, 0.0  ;;  %v450_v41 = vmax.f32 %v418_v39, 0.0  ;;  %9160 = vst [vmem:[#allocation10_spill] sm:$0xff] %v7234_v26  ;;  %v6738_v29 = vld [vmem:[%s9081_s5 + $0x20] sm:$0xff] }
  0x19   : > { %v475_v15 = vpack.c.bf16 %v444_v12, %v443_v11  ;;  %v476_v23 = vpack.c.bf16 %v446_v21, %v445_v20  ;;  %v9108_v44 = vunpack.c.l.bf16 %v7148_v42  ;;  %v9107_v45 = vunpack.c.h.bf16 %v7148_v42  ;;  %v6741_v11 = vld [vmem:[%s9081_s5 + $0x38] sm:$0xff]  ;;  %v6739_v21 = vld [vmem:[%s9081_s5 + $0x28] sm:$0xff]  ;;  %v708_v39 = vld [vmem:[#allocation2 + $0x4] sm:$0x8] }
  0x1a   : > { %v477_v33 = vpack.c.bf16 %v448_v31, %v447_v30  ;;  %v478_v43 = vpack.c.bf16 %v450_v41, %v449_v40  ;;  %v9106_v54 = vunpack.c.l.bf16 %v7162_v52  ;;  %v9105_v55 = vunpack.c.h.bf16 %v7162_v52  ;;  %1391 = vmatpush.bf16.msra.mxu1 %v6741_v11  ;;  %6974 = vmatpush.bf16.msrb.mxu3 %v6741_v11  ;;  %v6737_v40 = vld [vmem:[%s9081_s5 + $0x18] sm:$0xff] }
  0x1b   : > { %6009 = vmatmul.msk.bf16.vlgmr.msra.gmra.mxu0 %vm503_vm0, %v475_v15  ;;  %v383_v46 = vmul.f32 %v7085_v1, %v9108_v44  ;;  %v384_v47 = vmul.f32 %v7085_v1, %v9107_v45  ;;  %v9104_v9 = vunpack.c.l.bf16 %v7193_v6  ;;  %v9103_v10 = vunpack.c.h.bf16 %v7193_v6  ;;  %1676 = vmatpush.bf16.msra.mxu2 %v7211_v16 }
  0x1c   : > { %v385_v56 = vmul.f32 %v7085_v1, %v9106_v54  ;;  %v386_v57 = vmul.f32 %v7085_v1, %v9105_v55  ;;  %v9093_v30 = vunpack.c.l.bf16 %v7234_v26  ;;  %v9091_v31 = vunpack.c.h.bf16 %v7234_v26 }
  0x1d   : > { %v419_v48 = vadd.f32 %v7095_v5, %v383_v46  ;;  %v420_v49 = vadd.f32 %v7095_v5, %v384_v47  ;;  %v387_v12 = vmul.f32 %v7085_v1, %v9104_v9  ;;  %v388_v15 = vmul.f32 %v7085_v1, %v9103_v10  ;;  %v7267_v47 = vld [vmem:[%s9081_s5 + $0x40] sm:$0xff] }
  0x1e   : > { %v421_v60 = vadd.f32 %v7095_v5, %v385_v56  ;;  %v422_v61 = vadd.f32 %v7095_v5, %v386_v57  ;;  %1392 = vmatpush.bf16.msra.mxu1 %v6740_v17  ;;  %6975 = vmatpush.bf16.msrb.mxu3 %v6740_v17  ;;  %v7017_v37 = vmov 0   ;;  %v9161_v38 = vmov 0 }
  0x1f   : > { %v451_v50 = vmax.f32 %v419_v48, 0.0  ;;  %v452_v51 = vmax.f32 %v420_v49, 0.0  ;;  %v423_v19 = vadd.f32 %v7095_v5, %v387_v12  ;;  %v424_v20 = vadd.f32 %v7095_v5, %v388_v15  ;;  %1677 = vmatpush.bf16.msra.mxu2 %v7220_v18  ;;  %711 = vst [vmem:[#allocation2 + $0x8] sm:$0xf] %v7017_v37  ;;  %v6736_v48 = vld [vmem:[%s9081_s5 + $0x10] sm:$0xff] }
  0x20   : > { %v453_v63 = vmax.f32 %v421_v60, 0.0  ;;  %v454_v0 = vmax.f32 %v422_v61, 0.0  ;;  %v9162_v38 = vsel %vm7247_vm3, 4294967295, %v9161_v38  ;;  %712 = vst [vmem:[#allocation2 + $0xc] sm:$0xf] %v7017_v37  ;;  %v709_v41 = vsel %vm7247_vm3, 0, %v708_v39 }
  0x21   : > { %v479_v53 = vpack.c.bf16 %v452_v51, %v451_v50  ;;  %v455_v27 = vmax.f32 %v423_v19, 0.0  ;;  %v456_v28 = vmax.f32 %v424_v20, 0.0  ;;  %9163 = vst [vmem:[#allocation11_spill] sm:$0xff] %v9162_v38  ;;  %v390_v46 = vmul.f32 %v7085_v1, %v9091_v31  ;;  %v729_v60 = vld [vmem:[#allocation2 + $0x18] sm:$0x8]  ;;  %v6734_v39 = vld [vmem:[%s9081_s5] sm:$0xff] }
  0x22   : > { %v480_v7 = vpack.c.bf16 %v454_v0, %v453_v63  ;;  %1393 = vmatpush.bf16.msra.mxu1 %v6739_v21  ;;  %6976 = vmatpush.bf16.msrb.mxu3 %v6739_v21  ;;  %723 = vst [vmem:[#allocation2 + $0x15c] sm:$0xf] %v7017_v37  ;;  %v730_v63 = vsel %vm7247_vm3, 0, %v729_v60  ;;  %v6735_v0 = vld [vmem:[%s9081_s5 + $0x8] sm:$0xff] }
  0x23   : > { %724 = vst [vmem:[#allocation2 + $0x160] sm:$0xf] %v7017_v37  ;;  %v426_v50 = vadd.f32 %v7095_v5, %v390_v46 }
  0x24   : > { %710 = vst [vmem:[#allocation2 + $0x4] sm:$0x8] %v709_v41 }
  0x25   : > { %731 = vst [vmem:[#allocation2 + $0x18] sm:$0x8] %v730_v63  ;;  %v458_v17 = vmax.f32 %v426_v50, 0.0 }
  0x26   : > { %1394 = vmatpush.bf16.msra.mxu1 %v6738_v29  ;;  %6977 = vmatpush.bf16.msrb.mxu3 %v6738_v29  ;;  %v862_v51 = vld [vmem:[#allocation2 + $0x8] sm:$0xf]  ;;  %v9165_v29 = vmov 0 }
  0x27   : > { %v863_v56 = vld [vmem:[#allocation2 + $0xc] sm:$0xf]  ;;  %v917_v57 = vshrl.u32 %v862_v51, 16  ;;  %v920_v11 = vshll.u32 %v862_v51, 16  ;;  %v9166_v29 = vsel %vm7284_vm6, 4294967295, %v9165_v29 }
  0x28   : > { %v926_v61 = vshrl.u32 %v863_v56, 16  ;;  %v929_v12 = vshll.u32 %v863_v56, 16  ;;  %9167 = vst [vmem:[#allocation13_spill] sm:$0xff] %v9166_v29 }
  0x2a   : > { %1395 = vmatpush.bf16.msra.mxu1 %v6737_v40  ;;  %6978 = vmatpush.bf16.msrb.mxu3 %v6737_v40  ;;  %v928_v20 = vrot.slane %v926_v61, 7 }
  0x2b   : > { %6010 = vmatmul.msk.bf16.gmra.mxu0 %vm503_vm0, %v476_v23  ;;  %v7231_v23 = vld [vmem:[%s9081_s5 + $0x50] sm:$0xff]  ;;  %v861_v19 = vld [vmem:[#allocation2 + $0x4] sm:$0x8] }
  0x2c   : > { %1678 = vmatpush.bf16.msra.mxu2 %v7231_v23  ;;  %v912_v21 = vshrl.u32 %v861_v19, 16  ;;  %v931_v37 = vor.u32 %v929_v12, %v928_v20  ;;  %v7312_v12 = vld [vmem:[%s7080_s12 + $0x48] sm:$0xff]  }
  0x2d   : > { %9171 = vst [vmem:[#allocation15_spill] sm:$0xff] %v7312_v12  ;;  %v9088_v20 = vunpack.c.l.bf16 %v7312_v12 }
  0x2e   : > { %1396 = vmatpush.bf16.msra.mxu1 %v6736_v48  ;;  %6979 = vmatpush.bf16.msrb.mxu3 %v6736_v48  ;;  %v6025_v40 = vrot.slane %v912_v21, 11  ;;  %v9087_v21 = vunpack.c.h.bf16 %v7312_v12 }
  0x30   : > { %1679 = vmatpush.bf16.msra.mxu2 %v7245_v36 }
  0x32   : > { %1397 = vmatpush.bf16.msra.mxu1 %v6735_v0  ;;  %6980 = vmatpush.bf16.msrb.mxu3 %v6735_v0 }
  0x34   : > { %1680 = vmatpush.bf16.msra.mxu2 %v7267_v47 }
  0x36   : > { %1398 = vmatpush.bf16.msra.mxu1 %v6734_v39  ;;  %6981 = vmatpush.bf16.msrb.mxu3 %v6734_v39 }
  0x3b   : > { %6011 = vmatmul.msk.bf16.gmra.mxu0 %vm503_vm0, %v477_v33  ;;  %v481_v33 = vpack.c.bf16 %v456_v28, %v455_v27  ;;  %v7281_v28 = vld [vmem:[%s7080_s12 + $0x40] sm:$0xff]  }
  0x3c   : > { %9164 = vst [vmem:[#allocation12_spill] sm:$0xff] %v7281_v28  ;;  %v9090_v46 = vunpack.c.l.bf16 %v7281_v28  ;;  %v9089_v48 = vunpack.c.h.bf16 %v7281_v28 }
  0x3e   : > { %v391_v56 = vmul.f32 %v7085_v1, %v9090_v46  ;;  %v7366_v46 = vld [vmem:[%s7080_s12 + $0x58] sm:$0xff]  }
  0x3f   : > { %9174 = vst [vmem:[#allocation18_spill] sm:$0xff] %v7366_v46 }
  0x40   : > { %v427_v60 = vadd.f32 %v7095_v5, %v391_v56 }
  0x42   : > { %v459_v63 = vmax.f32 %v427_v60, 0.0 }
  0x4b   : > { %6012 = vmatmul.msk.bf16.gmra.mxu0 %vm503_vm0, %v478_v43  ;;  %v389_v43 = vmul.f32 %v7085_v1, %v9093_v30  ;;  %v9101_v30 = vunpack.c.h.bf16 %v7366_v46 }
  0x4d   : > { %v425_v49 = vadd.f32 %v7095_v5, %v389_v43 }
  0x4f   : > { %v457_v15 = vmax.f32 %v425_v49, 0.0 }
  0x51   : > { %v482_v41 = vpack.c.bf16 %v458_v17, %v457_v15  ;;  %v7319_v17 = vld [vmem:[%s9080_s4] ss:$0 sm:$0xff] }
  0x5b   : > { %6013 = vmatmul.msk.bf16.gmra.mxu0 %vm503_vm0, %v479_v53  ;;  %v6718_v53 = vld [vmem:[#allocation2 + $0x8] sm:$0xff] }
  0x5c   : > { %1681 = vmatmul.bf16.vlgmr.msra.gmra.mxu2 %v6718_v53 }
  0x6b   : > { %6014 = vmatmul.msk.bf16.gmra.mxu0 %vm503_vm0, %v480_v7  ;;  %v919_v7 = vrot.slane %v917_v57, 7  ;;  %v392_v57 = vmul.f32 %v7085_v1, %v9089_v48 }
  0x6d   : > { %v922_v27 = vor.u32 %v920_v11, %v919_v7  ;;  %v428_v61 = vadd.f32 %v7095_v5, %v392_v57  ;;  %v777_v11 = vld [vmem:[#allocation2 + $0x24] sm:$0x1] }
  0x6e   : > { %v778_v15 = vsel %vm7307_vm8, 0, %v777_v11 }
  0x6f   : > { %v923_v49 = vsel %vm7284_vm6, %v6025_v40, %v922_v27  ;;  %v460_v0 = vmax.f32 %v428_v61, 0.0  ;;  %779 = vst [vmem:[#allocation2 + $0x24] sm:$0x1] %v778_v15  ;;  %v732_v27 = vld [vmem:[#allocation2 + $0x2c] sm:$0x8]  ;;  %v7339_v61 = vld [vmem:[%s7080_s12 + $0x50] sm:$0xff]  }
  0x70   : > { %v1279_v51 = vunpack.c.l.b16 %v923_v49  ;;  %9172 = vst [vmem:[#allocation16_spill] sm:$0xff] %v7339_v61 }
  0x71   : > { %v483_v19 = vpack.c.bf16 %v460_v0, %v459_v63 }
  0x7b   : > { %6015 = vmatmul.msk.bf16.gmra.mxu0 %vm503_vm0, %v481_v33  ;;  %v924_v33 = vrot.slane %v919_v7, 4  ;;  %v9168_v7 = vmov 0 }
  0x7c   : > { %v9169_v7 = vsel %vm7307_vm8, 4294967295, %v9168_v7 }
  0x7d   : > { %v932_v43 = vsel %vm7284_vm6, %v924_v33, %v931_v37  ;;  %9170 = vst [vmem:[#allocation14_spill] sm:$0xff] %v9169_v7  ;;  %v733_v37 = vsel %vm7247_vm3, 0, %v732_v27 }
  0x7e   : > { %v1280_v50 = vunpack.c.l.b16 %v932_v43  ;;  %734 = vst [vmem:[#allocation2 + $0x2c] sm:$0x8] %v733_v37  ;;  %v394_v43 = vmul.f32 %v7085_v1, %v9087_v21 }
  0x80   : > { %v1311_v53 = vpack.c.b16 %v1280_v50, %v1279_v51  ;;  %v430_v51 = vadd.f32 %v7095_v5, %v394_v43 }
  0x82   : > { %1399 = vmatmul.bf16.vlgmr.msra.gmra.mxu1 %v1311_v53  ;;  %v735_v53 = vld [vmem:[#allocation2 + $0x40] sm:$0x8]  ;;  %v462_v11 = vmax.f32 %v430_v51, 0.0 }
  0x83   : > { %v736_v57 = vsel %vm7247_vm3, 0, %v735_v53 }
  0x84   : > { %737 = vst [vmem:[#allocation2 + $0x40] sm:$0x8] %v736_v57 }
  0x8b   : > { %6016 = vmatmul.msk.bf16.gmra.mxu0 %vm503_vm0, %v482_v41  ;;  %v393_v41 = vmul.f32 %v7085_v1, %v9088_v20 }
  0x8d   : > { %v429_v50 = vadd.f32 %v7095_v5, %v393_v41  ;;  %v864_v41 = vld [vmem:[#allocation2 + $0x18] sm:$0x8] }
  0x8e   : > { %v934_v51 = vshrl.u32 %v864_v41, 16  ;;  %v7360_v41 = vld [vmem:[%s7080_s12 + $0x68] sm:$0xff]  }
  0x8f   : > { %v461_v0 = vmax.f32 %v429_v50, 0.0  ;;  %v6781_v50 = vld [vmem:[%s9081_s5 + $0xf8] sm:$0xff]  ;;  %9173 = vst [vmem:[#allocation17_spill] sm:$0xff] %v7360_v41 }
  0x90   : > { %3008 = vmatpush.bf16.msrb.mxu0 %v6781_v50 }
  0x91   : > { %v484_v37 = vpack.c.bf16 %v462_v11, %v461_v0 }
  0x98   : > { %v561_v33 = vpop.f32.mrf.mxu0 }
  0x99   : > { %v562_v39 = vadd.f32 %v7319_v17, %v561_v33  ;;  %v9085_v33 = vunpack.c.h.bf16 %v7339_v61 }
  0x9b   : > { %v641_v40 = vmax.f32 %v562_v39, 0.0  ;;  %6017 = vmatmul.msk.bf16.gmra.mxu0 %vm503_vm0, %v483_v19  ;;  %v9086_v19 = vunpack.c.l.bf16 %v7339_v61 }
  0x9d   : > { %v673_v49 = vpack.c.bf16 %v641_v40, %v641_v40  ;;  %v395_v43 = vmul.f32 %v7085_v1, %v9086_v19 }
  0x9f   : > { %825 = vst [vmem:[#allocation2 + $0x1c] sm:$0xf] %v673_v49  ;;  %v396_v49 = vmul.f32 %v7085_v1, %v9085_v33  ;;  %v431_v57 = vadd.f32 %v7095_v5, %v395_v43  ;;  %v6026_v33 = vrot.slane %v934_v51, 11  ;;  %v6779_v51 = vld [vmem:[%s9081_s5 + $0xe8] sm:$0xff] }
  0xa0   : > { %v563_v56 = vpop.f32.mrf.mxu0 }
  0xa1   : > { %v564_v60 = vadd.f32 %v7319_v17, %v563_v56  ;;  %v432_v11 = vadd.f32 %v7095_v5, %v396_v49  ;;  %v463_v21 = vmax.f32 %v431_v57, 0.0 }
  0xa3   : > { %v642_v63 = vmax.f32 %v564_v60, 0.0  ;;  %v464_v48 = vmax.f32 %v432_v11, 0.0 }
  0xa5   : > { %v674_v15 = vpack.c.bf16 %v642_v63, %v642_v63 }
  0xa6   : > { %v865_v27 = vld [vmem:[#allocation2 + $0x1c] sm:$0xf] }
  0xa7   : > { %826 = vst [vmem:[#allocation2 + $0x20] sm:$0xf] %v674_v15  ;;  %v939_v39 = vshrl.u32 %v865_v27, 16  ;;  %v942_v56 = vshll.u32 %v865_v27, 16  ;;  %v6780_v15 = vld [vmem:[%s9081_s5 + $0xf0] sm:$0xff]  ;;  %v9092_v27 = vunpack.c.l.bf16 %v7360_v41 }
  0xa8   : > { %v566_v40 = vpop.f32.mrf.mxu0  ;;  %3009 = vmatpush.bf16.msrb.mxu0 %v6780_v15 }
  0xa9   : > { %v941_v53 = vrot.slane %v939_v39, 7  ;;  %v567_v60 = vadd.f32 %v7319_v17, %v566_v40  ;;  %v9094_v40 = vunpack.c.h.bf16 %v7360_v41 }
  0xab   : > { %6018 = vmatmul.msk.bf16.gmra.mxu0 %vm503_vm0, %v484_v37  ;;  %v944_v19 = vor.u32 %v942_v56, %v941_v53  ;;  %v643_v20 = vmax.f32 %v567_v60, 0.0  ;;  %v401_v56 = vmul.f32 %v7085_v1, %v9092_v27  ;;  %v946_v60 = vrot.slane %v941_v53, 4 }
  0xac   : > { %3010 = vmatpush.bf16.msrb.mxu0 %v6779_v51  ;;  %v9102_v27 = vunpack.c.l.bf16 %v7366_v46  ;;  %v780_v51 = vld [vmem:[#allocation2 + $0x38] sm:$0x1] }
  0xad   : > { %v945_v57 = vsel %vm7284_vm6, %v6026_v33, %v944_v19  ;;  %v437_v11 = vadd.f32 %v7095_v5, %v401_v56  ;;  %v6778_v19 = vld [vmem:[%s9081_s5 + $0xe0] sm:$0xff] }
  0xae   : > { %v6719_v63 = vld [vmem:[#allocation2 + $0x1c] sm:$0xff] }
  0xaf   : > { %v866_v0 = vld [vmem:[#allocation2 + $0x20] sm:$0xf]  ;;  %1686 = vmatmul.bf16.gmra.mxu2 %v6719_v63  ;;  %v402_v63 = vmul.f32 %v7085_v1, %v9094_v40  ;;  %v1281_v40 = vunpack.c.l.b16 %v945_v57  ;;  %v469_v33 = vmax.f32 %v437_v11, 0.0 }
  0xb0   : > { %v948_v37 = vshrl.u32 %v866_v0, 16  ;;  %v568_v39 = vpop.f32.mrf.mxu0  ;;  %v951_v50 = vshll.u32 %v866_v0, 16  ;;  %3011 = vmatpush.bf16.msrb.mxu0 %v6778_v19 }
  0xb1   : > { %v569_v43 = vadd.f32 %v7319_v17, %v568_v39 }
  0xb2   : > { %v950_v49 = vrot.slane %v948_v37, 7  ;;  %v438_v37 = vadd.f32 %v7095_v5, %v402_v63 }
  0xb3   : > { %v644_v15 = vmax.f32 %v569_v43, 0.0 }
  0xb4   : > { %v953_v0 = vor.u32 %v951_v50, %v950_v49  ;;  %v470_v53 = vmax.f32 %v438_v37, 0.0  ;;  %v485_v49 = vpack.c.bf16 %v464_v48, %v463_v21  ;;  %v738_v50 = vld [vmem:[#allocation2 + $0x54] sm:$0x8]  ;;  %v398_v48 = vmul.f32 %v7085_v1, %v9101_v30  ;;  %v6777_v21 = vld [vmem:[%s9081_s5 + $0xd8] sm:$0xff] }
  0xb5   : > { %v6913_v39 = vpack.c.bf16 %v644_v15, %v643_v20  ;;  %v739_v15 = vsel %vm7247_vm3, 0, %v738_v50  ;;  %3012 = vmatpush.bf16.msrb.mxu0 %v6777_v21 }
  0xb6   : > { %v954_v31 = vsel %vm7284_vm6, %v946_v60, %v953_v0  ;;  %v488_v63 = vpack.c.bf16 %v470_v53, %v469_v33  ;;  %740 = vst [vmem:[#allocation2 + $0x54] sm:$0x8] %v739_v15  ;;  %v397_v60 = vmul.f32 %v7085_v1, %v9102_v27  ;;  %v434_v53 = vadd.f32 %v7095_v5, %v398_v48  ;;  %v7412_v15 = vld [vmem:[%s7080_s12 + $0x70] sm:$0xff]   ;;  %v7416_v48 = vld [vmem:[%s7080_s12 + $0x60] sm:$0xff]  }
  0xb7   : > { %v1282_v43 = vunpack.c.l.b16 %v954_v31  ;;  %6965 = vst [vmem:[#allocation2 + $0x30] sm:$0xff] %v6913_v39   ;;  %v867_v31 = vld [vmem:[#allocation2 + $0x2c] sm:$0x8]  ;;  %v9096_v21 = vunpack.c.l.bf16 %v7412_v15 }
  0xb8   : > { %v571_v20 = vpop.f32.mrf.mxu0  ;;  %6022 = vmatmul.msk.bf16.vlgmr.msra.gmra.mxu3 %vm503_vm0, %v488_v63  ;;  %v956_v11 = vshrl.u32 %v867_v31, 16  ;;  %v433_v33 = vadd.f32 %v7095_v5, %v397_v60  ;;  %v6776_v63 = vld [vmem:[%s9081_s5 + $0xd0] sm:$0xff]  ;;  %9175 = vst [vmem:[#allocation19_spill] sm:$0xff] %v7412_v15 }
  0xb9   : > { %v1312_v56 = vpack.c.b16 %v1282_v43, %v1281_v40  ;;  %v572_v57 = vadd.f32 %v7319_v17, %v571_v20  ;;  %v781_v40 = vsel %vm7307_vm8, 0, %v780_v51  ;;  %6982 = vmatpush.bf16.msra.mxu3 %v7176_v58  ;;  %9176 = vst [vmem:[#allocation20_spill] sm:$0xff] %v7416_v48  ;;  %3013 = vmatpush.bf16.msrb.mxu0 %v6776_v63 }
  0xba   : > { %782 = vst [vmem:[#allocation2 + $0x38] sm:$0x1] %v781_v40  ;;  %v6027_v58 = vrot.slane %v956_v11, 11  ;;  %v465_v40 = vmax.f32 %v433_v33, 0.0  ;;  %v6775_v11 = vld [vmem:[%s9081_s5 + $0xc8] sm:$0xff]  ;;  %v9100_v33 = vunpack.c.l.bf16 %v7416_v48 }
  0xbb   : > { %1404 = vmatmul.bf16.gmra.mxu1 %v1312_v56  ;;  %v645_v0 = vmax.f32 %v572_v57, 0.0  ;;  %6019 = vmatmul.msk.bf16.gmra.mxu0 %vm503_vm0, %v485_v49 }
  0xbd   : > { %v677_v37 = vpack.c.bf16 %v645_v0, %v645_v0  ;;  %6983 = vmatpush.bf16.msra.mxu3 %v7182_v59  ;;  %v741_v59 = vld [vmem:[#allocation2 + $0x68] sm:$0x8]  ;;  %v466_v0 = vmax.f32 %v434_v53, 0.0  ;;  %v403_v53 = vmul.f32 %v7085_v1, %v9096_v21  ;;  %3014 = vmatpush.bf16.msrb.mxu0 %v6775_v11  ;;  %v399_v11 = vmul.f32 %v7085_v1, %v9100_v33 }
  0xbe   : > { %v6720_v39 = vld [vmem:[#allocation2 + $0x30] sm:$0xff] }
  0xbf   : > { %v868_v43 = vld [vmem:[#allocation2 + $0x30] sm:$0xf]  ;;  %v869_v19 = vld [vmem:[#allocation2 + $0x34] sm:$0xf]  ;;  %829 = vst [vmem:[#allocation2 + $0x44] sm:$0xf] %v677_v37  ;;  %1691 = vmatmul.bf16.gmra.mxu2 %v6720_v39  ;;  %v9095_v37 = vunpack.c.h.bf16 %v7412_v15 }
  0xc0   : > { %v961_v50 = vshrl.u32 %v868_v43, 16  ;;  %v970_v51 = vshrl.u32 %v869_v19, 16  ;;  %v573_v49 = vpop.f32.mrf.mxu0  ;;  %v964_v20 = vshll.u32 %v868_v43, 16  ;;  %v973_v56 = vshll.u32 %v869_v19, 16 }
  0xc1   : > { %v574_v57 = vadd.f32 %v7319_v17, %v573_v49  ;;  %v742_v39 = vsel %vm7247_vm3, 0, %v741_v59  ;;  %6984 = vmatpush.bf16.msra.mxu3 %v7190_v62  ;;  %v404_v49 = vmul.f32 %v7085_v1, %v9095_v37  ;;  %v6774_v59 = vld [vmem:[%s9081_s5 + $0xc0] sm:$0xff]  ;;  %v486_v37 = vpack.c.bf16 %v466_v0, %v465_v40 }
  0xc2   : > { %v963_v31 = vrot.slane %v961_v50, 7  ;;  %v972_v60 = vrot.slane %v970_v51, 7  ;;  %743 = vst [vmem:[#allocation2 + $0x68] sm:$0x8] %v742_v39  ;;  %v439_v39 = vadd.f32 %v7095_v5, %v403_v53  ;;  %3015 = vmatpush.bf16.msrb.mxu0 %v6774_v59 }
  0xc3   : > { %v646_v43 = vmax.f32 %v574_v57, 0.0 }
  0xc4   : > { %v966_v19 = vor.u32 %v964_v20, %v963_v31  ;;  %v968_v50 = vrot.slane %v963_v31, 4  ;;  %v975_v51 = vor.u32 %v973_v56, %v972_v60  ;;  %v9097_v56 = vunpack.c.h.bf16 %v7416_v48 }
  0xc5   : > { %v678_v63 = vpack.c.bf16 %v646_v43, %v646_v43  ;;  %v440_v43 = vadd.f32 %v7095_v5, %v404_v49  ;;  %6985 = vmatpush.bf16.msra.mxu3 %v7211_v16 }
  0xc6   : > { %v967_v57 = vsel %vm7284_vm6, %v6027_v58, %v966_v19  ;;  %v976_v20 = vsel %vm7284_vm6, %v968_v50, %v975_v51  ;;  %v871_v60 = vld [vmem:[#allocation2 + $0x44] sm:$0xf]  ;;  %v870_v51 = vld [vmem:[#allocation2 + $0x40] sm:$0x8]  ;;  %v400_v53 = vmul.f32 %v7085_v1, %v9097_v56 }
  0xc7   : > { %v1283_v62 = vunpack.c.l.b16 %v967_v57  ;;  %v1284_v31 = vunpack.c.l.b16 %v976_v20  ;;  %830 = vst [vmem:[#allocation2 + $0x48] sm:$0xf] %v678_v63  ;;  %v983_v58 = vshrl.u32 %v871_v60, 16  ;;  %v471_v57 = vmax.f32 %v439_v39, 0.0 }
  0xc8   : > { %v576_v19 = vpop.f32.mrf.mxu0  ;;  %v472_v20 = vmax.f32 %v440_v43, 0.0  ;;  %v978_v40 = vshrl.u32 %v870_v51, 16  ;;  %v986_v0 = vshll.u32 %v871_v60, 16  ;;  %v435_v39 = vadd.f32 %v7095_v5, %v399_v11 }
  0xc9   : > { %v1313_v50 = vpack.c.b16 %v1284_v31, %v1283_v62  ;;  %v985_v16 = vrot.slane %v983_v58, 7  ;;  %6986 = vmatpush.bf16.msra.mxu3 %v7220_v18  ;;  %v577_v63 = vadd.f32 %v7319_v17, %v576_v19  ;;  %v436_v43 = vadd.f32 %v7095_v5, %v400_v53  ;;  %v2481_v53 = vld [vmem:[#allocation2 + $0x20] sm:$0xf] }
  0xca   : > { %v489_v49 = vpack.c.bf16 %v472_v20, %v471_v57  ;;  %v6028_v1 = vrot.slane %v978_v40, 11  ;;  %v467_v57 = vmax.f32 %v435_v39, 0.0  ;;  %v783_v40 = vld [vmem:[#allocation2 + $0x4c] sm:$0x1] }
  0xcb   : > { %1409 = vmatmul.bf16.gmra.mxu1 %v1313_v50  ;;  %6020 = vmatmul.msk.bf16.gmra.mxu0 %vm503_vm0, %v486_v37  ;;  %v988_v59 = vor.u32 %v986_v0, %v985_v16  ;;  %v647_v60 = vmax.f32 %v577_v63, 0.0  ;;  %v468_v19 = vmax.f32 %v436_v43, 0.0  ;;  %v2542_v63 = vshrl.u32 %v2481_v53, 16 }
  0xcc   : > { %6023 = vmatmul.msk.bf16.gmra.mxu3 %vm503_vm0, %v489_v49  ;;  %v990_v49 = vrot.slane %v985_v16, 4  ;;  %v784_v43 = vsel %vm7307_vm8, 0, %v783_v40 }
  0xcd   : > { %6987 = vmatpush.bf16.msra.mxu3 %v7231_v23  ;;  %v989_v11 = vsel %vm7284_vm6, %v6028_v1, %v988_v59  ;;  %v487_v39 = vpack.c.bf16 %v468_v19, %v467_v57  ;;  %v786_v1 = vld [vmem:[#allocation2 + $0x60] sm:$0x1]  ;;  %785 = vst [vmem:[#allocation2 + $0x4c] sm:$0x1] %v784_v43 }
  0xce   : > { %v6721_v62 = vld [vmem:[#allocation2 + $0x44] sm:$0xff] }
  0xcf   : > { %v872_v31 = vld [vmem:[#allocation2 + $0x48] sm:$0xf]  ;;  %1696 = vmatmul.bf16.gmra.mxu2 %v6721_v62  ;;  %v2480_v62 = vld [vmem:[#allocation2 + $0x1c] sm:$0xf] }
  0xd0   : > { %v992_v50 = vshrl.u32 %v872_v31, 16  ;;  %v578_v37 = vpop.f32.mrf.mxu0  ;;  %v995_v51 = vshll.u32 %v872_v31, 16 }
  0xd1   : > { %v579_v18 = vadd.f32 %v7319_v17, %v578_v37  ;;  %6988 = vmatpush.bf16.msra.mxu3 %v7245_v36  ;;  %v2479_v36 = vld [vmem:[#allocation2 + $0x18] sm:$0x8]  ;;  %v2533_v37 = vshrl.u32 %v2480_v62, 16 }
  0xd2   : > { %v994_v58 = vrot.slane %v992_v50, 7  ;;  %v1285_v50 = vunpack.c.l.b16 %v989_v11  ;;  %v2528_v19 = vshrl.u32 %v2479_v36, 16  ;;  %v2545_v11 = vshll.u32 %v2481_v53, 16 }
  0xd3   : > { %v648_v20 = vmax.f32 %v579_v18, 0.0 }
  0xd4   : > { %v997_v5 = vor.u32 %v995_v51, %v994_v58  ;;  %v873_v58 = vld [vmem:[#allocation2 + $0x54] sm:$0x8]  ;;  %v2544_v51 = vrot.slane %v2542_v63, 7  ;;  %v6233_v43 = vrot.slane %v2528_v19, 11  ;;  %v3419_v46 = vld [vmem:[#allocation2 + $0x4c] sm:$0x1] }
  0xd5   : > { %v6918_v23 = vpack.c.bf16 %v648_v20, %v647_v60  ;;  %6989 = vmatpush.bf16.msra.mxu3 %v7267_v47  ;;  %v787_v60 = vsel %vm7307_vm8, 0, %v786_v1  ;;  %v1000_v20 = vshrl.u32 %v873_v58, 16  ;;  %v2535_v47 = vrot.slane %v2533_v37, 7 }
  0xd6   : > { %v998_v0 = vsel %vm7284_vm6, %v990_v49, %v997_v5  ;;  %788 = vst [vmem:[#allocation2 + $0x60] sm:$0x1] %v787_v60  ;;  %v744_v60 = vld [vmem:[#allocation2 + $0x7c] sm:$0x8] }
  0xd7   : > { %v1286_v31 = vunpack.c.l.b16 %v998_v0  ;;  %6966 = vst [vmem:[#allocation2 + $0x58] sm:$0xff] %v6918_v23   ;;  %v2536_v0 = vshll.u32 %v2480_v62, 16  ;;  %v6029_v1 = vrot.slane %v1000_v20, 11  ;;  %v2540_v36 = vrot.slane %v2535_v47, 4 }
  0xd8   : > { %v581_v16 = vpop.f32.mrf.mxu0 }
  0xd9   : > { %v1314_v59 = vpack.c.b16 %v1286_v31, %v1285_v50  ;;  %v582_v18 = vadd.f32 %v7319_v17, %v581_v16  ;;  %v2547_v50 = vor.u32 %v2545_v11, %v2544_v51  ;;  %v2483_v51 = vld [vmem:[#allocation2 + $0x30] sm:$0xf] }
  0xdb   : > { %1414 = vmatmul.bf16.gmra.mxu1 %v1314_v59  ;;  %v649_v57 = vmax.f32 %v582_v18, 0.0  ;;  %6021 = vmatmul.msk.bf16.gmra.mxu0 %vm503_vm0, %v487_v39  ;;  %v2538_v39 = vor.u32 %v2536_v0, %v2535_v47  ;;  %v2548_v62 = vsel %vm7284_vm6, %v2540_v36, %v2547_v50  ;;  %v2482_v36 = vld [vmem:[#allocation2 + $0x2c] sm:$0x8] }
  0xdc   : > { %v2897_v50 = vunpack.c.l.b16 %v2548_v62 }
  0xdd   : > { %v681_v49 = vpack.c.bf16 %v649_v57, %v649_v57  ;;  %v745_v57 = vsel %vm7247_vm3, 0, %v744_v60  ;;  %v2539_v47 = vsel %vm7284_vm6, %v6233_v43, %v2538_v39  ;;  %v876_v43 = vld [vmem:[#allocation2 + $0x68] sm:$0x8]  ;;  %v3422_v8 = vld [vmem:[#allocation2 + $0x60] sm:$0x1] }
  0xde   : > { %v6722_v5 = vld [vmem:[#allocation2 + $0x58] sm:$0xff]  ;;  %746 = vst [vmem:[#allocation2 + $0x7c] sm:$0x8] %v745_v57  ;;  %v2550_v57 = vshrl.u32 %v2482_v36, 16 }
  0xdf   : > { %v874_v40 = vld [vmem:[#allocation2 + $0x58] sm:$0xf]  ;;  %v875_v23 = vld [vmem:[#allocation2 + $0x5c] sm:$0xf]  ;;  %833 = vst [vmem:[#allocation2 + $0x6c] sm:$0xf] %v681_v49  ;;  %1701 = vmatmul.bf16.gmra.mxu2 %v6722_v5  ;;  %v7542_v30 = vpop.f32.mrf.mxu2 }
  0xe0   : > { %v1005_v31 = vshrl.u32 %v874_v40, 16  ;;  %v1014_v63 = vshrl.u32 %v875_v23, 16  ;;  %v583_v16 = vpop.f32.mrf.mxu0  ;;  %v1008_v59 = vshll.u32 %v874_v40, 16  ;;  %v1017_v58 = vshll.u32 %v875_v23, 16  ;;  %v2484_v5 = vld [vmem:[#allocation2 + $0x34] sm:$0xf] }
  0xe1   : > { %v584_v18 = vadd.f32 %v7319_v17, %v583_v16 }
  0xe2   : > { %v1007_v37 = vrot.slane %v1005_v31, 7  ;;  %v1016_v53 = vrot.slane %v1014_v63, 7 }
  0xe3   : > { %v650_v19 = vmax.f32 %v584_v18, 0.0  ;;  %v2564_v18 = vshrl.u32 %v2484_v5, 16 }
  0xe4   : > { %v1010_v11 = vor.u32 %v1008_v59, %v1007_v37  ;;  %v1012_v49 = vrot.slane %v1007_v37, 4  ;;  %v1019_v20 = vor.u32 %v1017_v58, %v1016_v53  ;;  %v2555_v59 = vshrl.u32 %v2483_v51, 16 }
  0xe5   : > { %v682_v40 = vpack.c.bf16 %v650_v19, %v650_v19  ;;  %v2896_v37 = vunpack.c.l.b16 %v2539_v47  ;;  %v747_v19 = vld [vmem:[#allocation2 + $0x90] sm:$0x8] }
  0xe6   : > { %v1011_v23 = vsel %vm7284_vm6, %v6029_v1, %v1010_v11  ;;  %v1020_v0 = vsel %vm7284_vm6, %v1012_v49, %v1019_v20  ;;  %v877_v16 = vld [vmem:[#allocation2 + $0x6c] sm:$0xf]  ;;  %v2557_v1 = vrot.slane %v2555_v59, 7  ;;  %v2566_v11 = vrot.slane %v2564_v18, 7 }
  0xe7   : > { %v1287_v31 = vunpack.c.l.b16 %v1011_v23  ;;  %v1288_v63 = vunpack.c.l.b16 %v1020_v0  ;;  %834 = vst [vmem:[#allocation2 + $0x70] sm:$0xf] %v682_v40  ;;  %v1027_v53 = vshrl.u32 %v877_v16, 16  ;;  %v2928_v39 = vpack.c.b16 %v2897_v50, %v2896_v37 }
  0xe8   : > { %v586_v58 = vpop.f32.mrf.mxu0  ;;  %v748_v62 = vsel %vm7247_vm3, 0, %v747_v19  ;;  %v1022_v49 = vshrl.u32 %v876_v43, 16  ;;  %v2558_v23 = vshll.u32 %v2483_v51, 16  ;;  %v2567_v40 = vshll.u32 %v2484_v5, 16  ;;  %v2487_v51 = vld [vmem:[#allocation2 + $0x48] sm:$0xf] }
  0xe9   : > { %v1315_v60 = vpack.c.b16 %v1288_v63, %v1287_v31  ;;  %v1029_v20 = vrot.slane %v1027_v53, 7  ;;  %749 = vst [vmem:[#allocation2 + $0x90] sm:$0x8] %v748_v62  ;;  %v1030_v47 = vshll.u32 %v877_v16, 16  ;;  %v6234_v0 = vrot.slane %v2550_v57, 11 }
  0xea   : > { %v587_v31 = vadd.f32 %v7319_v17, %v586_v58  ;;  %v2560_v36 = vor.u32 %v2558_v23, %v2557_v1  ;;  %v2562_v37 = vrot.slane %v2557_v1, 4  ;;  %v6030_v59 = vrot.slane %v1022_v49, 11  ;;  %v2486_v62 = vld [vmem:[#allocation2 + $0x44] sm:$0xf]  ;;  %v789_v23 = vld [vmem:[#allocation2 + $0x74] sm:$0x1] }
  0xeb   : > { %1419 = vmatmul.bf16.gmra.mxu1 %v1315_v60  ;;  %3016 = vmatmul.bf16.vlgmr.msrb.gmra.mxu0 %v2928_v39  ;;  %v2569_v60 = vor.u32 %v2567_v40, %v2566_v11  ;;  %v1032_v18 = vor.u32 %v1030_v47, %v1029_v20  ;;  %v1034_v1 = vrot.slane %v1029_v20, 4  ;;  %v2586_v49 = vshrl.u32 %v2487_v51, 16 }
  0xec   : > { %v651_v5 = vmax.f32 %v587_v31, 0.0  ;;  %v2561_v16 = vsel %vm7284_vm6, %v6234_v0, %v2560_v36  ;;  %v790_v36 = vsel %vm7307_vm8, 0, %v789_v23 }
  0xed   : > { %v2570_v58 = vsel %vm7284_vm6, %v2562_v37, %v2569_v60  ;;  %v1033_v19 = vsel %vm7284_vm6, %v6030_v59, %v1032_v18  ;;  %v2898_v40 = vunpack.c.l.b16 %v2561_v16  ;;  %v2588_v60 = vrot.slane %v2586_v49, 7  ;;  %791 = vst [vmem:[#allocation2 + $0x74] sm:$0x1] %v790_v36  ;;  %v792_v59 = vld [vmem:[#allocation2 + $0x88] sm:$0x1] }
  0xee   : > { %v6723_v63 = vld [vmem:[#allocation2 + $0x6c] sm:$0xff]  ;;  %v2899_v47 = vunpack.c.l.b16 %v2570_v58  ;;  %v1289_v31 = vunpack.c.l.b16 %v1033_v19  ;;  %v2580_v49 = vshll.u32 %v2486_v62, 16 }
  0xef   : > { %v878_v50 = vld [vmem:[#allocation2 + $0x70] sm:$0xf]  ;;  %1706 = vmatmul.bf16.gmra.mxu2 %v6723_v63  ;;  %v2577_v63 = vshrl.u32 %v2486_v62, 16 }
  0xf0   : > { %v1036_v21 = vshrl.u32 %v878_v50, 16  ;;  %v588_v56 = vpop.f32.mrf.mxu0  ;;  %v1039_v39 = vshll.u32 %v878_v50, 16  ;;  %v2485_v50 = vld [vmem:[#allocation2 + $0x40] sm:$0x8] }
  0xf1   : > { %v589_v43 = vadd.f32 %v7319_v17, %v588_v56  ;;  %v2572_v58 = vshrl.u32 %v2485_v50, 16 }
  0xf2   : > { %v1038_v53 = vrot.slane %v1036_v21, 7 }
  0xf3   : > { %v652_v57 = vmax.f32 %v589_v43, 0.0  ;;  %v2929_v43 = vpack.c.b16 %v2899_v47, %v2898_v40 }
  0xf4   : > { %v1041_v11 = vor.u32 %v1039_v39, %v1038_v53  ;;  %v879_v53 = vld [vmem:[#allocation2 + $0x7c] sm:$0x8]  ;;  %v2579_v39 = vrot.slane %v2577_v63, 7 }
  0xf5   : > { %v6923_v56 = vpack.c.bf16 %v652_v57, %v651_v5  ;;  %v2589_v5 = vshll.u32 %v2487_v51, 16  ;;  %v793_v57 = vsel %vm7307_vm8, 0, %v792_v59  ;;  %v1044_v19 = vshrl.u32 %v879_v53, 16 }
  0xf6   : > { %v1042_v21 = vsel %vm7284_vm6, %v1034_v1, %v1041_v11  ;;  %794 = vst [vmem:[#allocation2 + $0x88] sm:$0x1] %v793_v57  ;;  %v2582_v36 = vor.u32 %v2580_v49, %v2579_v39 }
  0xf7   : > { %v1290_v0 = vunpack.c.l.b16 %v1042_v21  ;;  %6967 = vst [vmem:[#allocation2 + $0x80] sm:$0xff] %v6923_v56   ;;  %v2591_v1 = vor.u32 %v2589_v5, %v2588_v60  ;;  %v6031_v63 = vrot.slane %v1044_v19, 11  ;;  %v2490_v19 = vld [vmem:[#allocation2 + $0x5c] sm:$0xf] }
  0xf8   : > { %v591_v37 = vpop.f32.mrf.mxu0 }
  0xf9   : > { %v1316_v20 = vpack.c.b16 %v1290_v0, %v1289_v31  ;;  %v592_v18 = vadd.f32 %v7319_v17, %v591_v37  ;;  %v2584_v31 = vrot.slane %v2579_v39, 4  ;;  %v6235_v0 = vrot.slane %v2572_v58, 11 }
  0xfb   : > { %1424 = vmatmul.bf16.gmra.mxu1 %v1316_v20  ;;  %v653_v16 = vmax.f32 %v592_v18, 0.0  ;;  %3021 = vmatmul.bf16.gmra.mxu0 %v2929_v43  ;;  %v2592_v37 = vsel %vm7284_vm6, %v2584_v31, %v2591_v1  ;;  %v750_v18 = vld [vmem:[#allocation2 + $0xa4] sm:$0x8]  ;;  %v2489_v43 = vld [vmem:[#allocation2 + $0x58] sm:$0xf]  ;;  %v2583_v39 = vsel %vm7284_vm6, %v6235_v0, %v2582_v36 }
  0xfc   : > { %v751_v53 = vsel %vm7247_vm3, 0, %v750_v18  ;;  %v2901_v1 = vunpack.c.l.b16 %v2592_v37  ;;  %v882_v0 = vld [vmem:[#allocation2 + $0x90] sm:$0x8]  ;;  %v753_v18 = vld [vmem:[#allocation2 + $0xb8] sm:$0x8] }
  0xfd   : > { %v685_v11 = vpack.c.bf16 %v653_v16, %v653_v16  ;;  %752 = vst [vmem:[#allocation2 + $0xa4] sm:$0x8] %v751_v53  ;;  %v754_v53 = vsel %vm7247_vm3, 0, %v753_v18 }
  0xfe   : > { %v6724_v23 = vld [vmem:[#allocation2 + $0x80] sm:$0xff]  ;;  %755 = vst [vmem:[#allocation2 + $0xb8] sm:$0x8] %v754_v53 }
  0xff   : > { %v880_v56 = vld [vmem:[#allocation2 + $0x80] sm:$0xf]  ;;  %v881_v21 = vld [vmem:[#allocation2 + $0x84] sm:$0xf]  ;;  %837 = vst [vmem:[#allocation2 + $0x94] sm:$0xf] %v685_v11  ;;  %1711 = vmatmul.bf16.gmra.mxu2 %v6724_v23 }
 0x100   : > { %v1049_v40 = vshrl.u32 %v880_v56, 16  ;;  %v1058_v47 = vshrl.u32 %v881_v21, 16  ;;  %v593_v51 = vpop.f32.mrf.mxu0  ;;  %v1052_v50 = vshll.u32 %v880_v56, 16  ;;  %v1061_v59 = vshll.u32 %v881_v21, 16 }
 0x101   : > { %v594_v20 = vadd.f32 %v7319_v17, %v593_v51  ;;  %v2599_v56 = vshrl.u32 %v2489_v43, 16  ;;  %v2608_v51 = vshrl.u32 %v2490_v19, 16 }
 0x102   : > { %v1051_v60 = vrot.slane %v1049_v40, 7  ;;  %v1060_v62 = vrot.slane %v1058_v47, 7  ;;  %v2488_v47 = vld [vmem:[#allocation2 + $0x54] sm:$0x8] }
 0x103   : > { %v654_v5 = vmax.f32 %v594_v20, 0.0  ;;  %v2594_v37 = vshrl.u32 %v2488_v47, 16 }
 0x104   : > { %v1054_v16 = vor.u32 %v1052_v50, %v1051_v60  ;;  %v1056_v58 = vrot.slane %v1051_v60, 4  ;;  %v1063_v57 = vor.u32 %v1061_v59, %v1060_v62  ;;  %v2900_v50 = vunpack.c.l.b16 %v2583_v39  ;;  %v2500_v25 = vld [vmem:[#allocation2 + $0xa4] sm:$0x8] }
 0x105   : > { %v686_v11 = vpack.c.bf16 %v654_v5, %v654_v5  ;;  %v2601_v59 = vrot.slane %v2599_v56, 7  ;;  %v1066_v5 = vshrl.u32 %v882_v0, 16  ;;  %v2682_v14 = vshrl.u32 %v2500_v25, 16  ;;  %v6782_v25 = vld [vmem:[%s9081_s5 + $0x100] sm:$0xff] }
 0x106   : > { %v1055_v49 = vsel %vm7284_vm6, %v6031_v63, %v1054_v16  ;;  %v1064_v23 = vsel %vm7284_vm6, %v1056_v58, %v1063_v57  ;;  %v883_v40 = vld [vmem:[#allocation2 + $0x94] sm:$0xf]  ;;  %v2930_v36 = vpack.c.b16 %v2901_v1, %v2900_v50  ;;  %v2610_v63 = vrot.slane %v2608_v51, 7 }
 0x107   : > { %v1291_v21 = vunpack.c.l.b16 %v1055_v49  ;;  %v1292_v31 = vunpack.c.l.b16 %v1064_v23  ;;  %838 = vst [vmem:[#allocation2 + $0x98] sm:$0xf] %v686_v11  ;;  %v1071_v20 = vshrl.u32 %v883_v40, 16  ;;  %v2602_v58 = vshll.u32 %v2489_v43, 16 }
 0x108   : > { %v596_v60 = vpop.f32.mrf.mxu0  ;;  %v2611_v57 = vshll.u32 %v2490_v19, 16  ;;  %v1074_v39 = vshll.u32 %v883_v40, 16  ;;  %v6236_v11 = vrot.slane %v2594_v37, 11  ;;  %v2606_v56 = vrot.slane %v2601_v59, 4 }
 0x109   : > { %v1317_v62 = vpack.c.b16 %v1292_v31, %v1291_v21  ;;  %v1073_v16 = vrot.slane %v1071_v20, 7  ;;  %v2604_v49 = vor.u32 %v2602_v58, %v2601_v59  ;;  %v597_v23 = vadd.f32 %v7319_v17, %v596_v60  ;;  %v795_v58 = vld [vmem:[#allocation2 + $0x9c] sm:$0x1] }
 0x10a   : > { %v2613_v31 = vor.u32 %v2611_v57, %v2610_v63  ;;  %v6032_v47 = vrot.slane %v1066_v5, 11  ;;  %v2492_v5 = vld [vmem:[#allocation2 + $0x6c] sm:$0xf] }
 0x10b   : > { %1429 = vmatmul.bf16.gmra.mxu1 %v1317_v62  ;;  %3026 = vmatmul.bf16.gmra.mxu0 %v2930_v36  ;;  %v1076_v51 = vor.u32 %v1074_v39, %v1073_v16  ;;  %v2605_v19 = vsel %vm7284_vm6, %v6236_v11, %v2604_v49  ;;  %v655_v40 = vmax.f32 %v597_v23, 0.0  ;;  %v2493_v36 = vld [vmem:[#allocation2 + $0x70] sm:$0xf]  ;;  %v1078_v18 = vrot.slane %v1073_v16, 4  ;;  %v7522_v49 = vld [vmem:[%s7080_s12 + $0x78] sm:$0xff]  }
 0x10c   : > { %v2614_v60 = vsel %vm7284_vm6, %v2606_v56, %v2613_v31  ;;  %v2902_v53 = vunpack.c.l.b16 %v2605_v19  ;;  %v2630_v11 = vshrl.u32 %v2493_v36, 16  ;;  %9177 = vst [vmem:[#allocation21_spill] sm:$0xff] %v7522_v49  ;;  %v9099_v56 = vunpack.c.l.bf16 %v7522_v49 }
 0x10d   : > { %v1077_v59 = vsel %vm7284_vm6, %v6032_v47, %v1076_v51  ;;  %v9098_v31 = vunpack.c.h.bf16 %v7522_v49  ;;  %v2621_v16 = vshrl.u32 %v2492_v5, 16  ;;  %v6789_v47 = vld [vmem:[%s9081_s5 + $0x138] sm:$0xff]  ;;  %v796_v51 = vsel %vm7307_vm8, 0, %v795_v58 }
 0x10e   : > { %v6725_v1 = vld [vmem:[#allocation2 + $0x94] sm:$0xff]  ;;  %v1293_v23 = vunpack.c.l.b16 %v1077_v59  ;;  %797 = vst [vmem:[#allocation2 + $0x9c] sm:$0x1] %v796_v51  ;;  %3290 = vmatpush.bf16.msrb.mxu1 %v6789_v47  ;;  %v2632_v59 = vrot.slane %v2630_v11, 7 }
 0x10f   : > { %v884_v21 = vld [vmem:[#allocation2 + $0x98] sm:$0xf]  ;;  %1716 = vmatmul.bf16.gmra.mxu2 %v6725_v1  ;;  %v2903_v1 = vunpack.c.l.b16 %v2614_v60 }
 0x110   : > { %v1080_v50 = vshrl.u32 %v884_v21, 16  ;;  %v598_v62 = vpop.f32.mrf.mxu0  ;;  %v1083_v43 = vshll.u32 %v884_v21, 16 }
 0x111   : > { %v599_v0 = vadd.f32 %v7319_v17, %v598_v62  ;;  %v2931_v60 = vpack.c.b16 %v2903_v1, %v2902_v53  ;;  %v2624_v53 = vshll.u32 %v2492_v5, 16  ;;  %v798_v1 = vld [vmem:[#allocation2 + $0xb0] sm:$0x1] }
 0x112   : > { %v1082_v20 = vrot.slane %v1080_v50, 7  ;;  %v799_v5 = vsel %vm7307_vm8, 0, %v798_v1 }
 0x113   : > { %v656_v37 = vmax.f32 %v599_v0, 0.0  ;;  %v2491_v0 = vld [vmem:[#allocation2 + $0x68] sm:$0x8]  ;;  %800 = vst [vmem:[#allocation2 + $0xb0] sm:$0x1] %v799_v5 }
 0x114   : > { %v1085_v63 = vor.u32 %v1083_v43, %v1082_v20  ;;  %v7003_v20 = vld [vmem:[%s9077_s1] ss:$0 sm:$0xff] }
 0x115   : > { %v6928_v57 = vpack.c.bf16 %v656_v37, %v655_v40  ;;  %v405_v43 = vmul.f32 %v7003_v20, %v9099_v56  ;;  %v406_v19 = vmul.f32 %v7003_v20, %v9098_v31  ;;  %v885_v37 = vld [vmem:[#allocation2 + $0xa4] sm:$0x8]  ;;  %v2633_v20 = vshll.u32 %v2493_v36, 16 }
 0x116   : > { %v1086_v39 = vsel %vm7284_vm6, %v1078_v18, %v1085_v63  ;;  %v7004_v18 = vld [vmem:[%s9078_s2] ss:$0 sm:$0xff] }
 0x117   : > { %v1294_v21 = vunpack.c.l.b16 %v1086_v39  ;;  %6968 = vst [vmem:[#allocation2 + $0xa8] sm:$0xff] %v6928_v57   ;;  %v441_v63 = vadd.f32 %v7004_v18, %v405_v43  ;;  %v442_v58 = vadd.f32 %v7004_v18, %v406_v19  ;;  %v2616_v39 = vshrl.u32 %v2491_v0, 16 }
 0x118   : > { %v601_v50 = vpop.f32.mrf.mxu0  ;;  %v2635_v56 = vor.u32 %v2633_v20, %v2632_v59 }
 0x119   : > { %v1318_v62 = vpack.c.b16 %v1294_v21, %v1293_v23  ;;  %v602_v40 = vadd.f32 %v7319_v17, %v601_v50  ;;  %v2623_v23 = vrot.slane %v2621_v16, 7  ;;  %v1088_v21 = vshrl.u32 %v885_v37, 16 }
 0x11a   : > { %v473_v51 = vmax.f32 %v441_v63, 0.0  ;;  %v474_v31 = vmax.f32 %v442_v58, 0.0  ;;  %v756_v58 = vld [vmem:[#allocation2 + $0xcc] sm:$0x8] }
 0x11b   : > { %1434 = vmatmul.bf16.gmra.mxu1 %v1318_v62  ;;  %v657_v57 = vmax.f32 %v602_v40, 0.0  ;;  %3031 = vmatmul.bf16.gmra.mxu0 %v2931_v60  ;;  %v6237_v40 = vrot.slane %v2616_v39, 11  ;;  %v2626_v0 = vor.u32 %v2624_v53, %v2623_v23  ;;  %v6033_v36 = vrot.slane %v1088_v21, 11  ;;  %v2495_v39 = vld [vmem:[#allocation2 + $0x80] sm:$0xf] }
 0x11c   : > { %v490_v33 = vpack.c.bf16 %v474_v31, %v473_v51  ;;  %v2628_v37 = vrot.slane %v2623_v23, 4  ;;  %v757_v21 = vsel %vm7247_vm3, 0, %v756_v58  ;;  %v7552_v23 = vpop.f32.mrf.mxu1  ;;  %v2496_v53 = vld [vmem:[#allocation2 + $0x84] sm:$0xf] }
 0x11d   : > { %v689_v50 = vpack.c.bf16 %v657_v57, %v657_v57  ;;  %758 = vst [vmem:[#allocation2 + $0xcc] sm:$0x8] %v757_v21  ;;  %v759_v21 = vld [vmem:[#allocation2 + $0xe0] sm:$0x8] }
 0x11e   : > { %v6726_v47 = vld [vmem:[#allocation2 + $0xa8] sm:$0xff]  ;;  %6024 = vmatmul.msk.bf16.gmra.mxu3 %vm503_vm0, %v490_v33  ;;  %v2636_v57 = vsel %vm7284_vm6, %v2628_v37, %v2635_v56  ;;  %v2652_v37 = vshrl.u32 %v2496_v53, 16 }
 0x11f   : > { %v886_v62 = vld [vmem:[#allocation2 + $0xa8] sm:$0xf]  ;;  %v887_v11 = vld [vmem:[#allocation2 + $0xac] sm:$0xf]  ;;  %841 = vst [vmem:[#allocation2 + $0xbc] sm:$0xf] %v689_v50  ;;  %1721 = vmatmul.bf16.gmra.mxu2 %v6726_v47 }
 0x120   : > { %v1093_v43 = vshrl.u32 %v886_v62, 16  ;;  %v1102_v19 = vshrl.u32 %v887_v11, 16  ;;  %v603_v16 = vpop.f32.mrf.mxu0  ;;  %v1096_v60 = vshll.u32 %v886_v62, 16  ;;  %v1105_v63 = vshll.u32 %v887_v11, 16 }
 0x121   : > { %v604_v59 = vadd.f32 %v7319_v17, %v603_v16  ;;  %v2627_v17 = vsel %vm7284_vm6, %v6237_v40, %v2626_v0  ;;  %v2905_v62 = vunpack.c.l.b16 %v2636_v57  ;;  %v2494_v16 = vld [vmem:[#allocation2 + $0x7c] sm:$0x8]  ;;  %v6796_v57 = vld [vmem:[%s9081_s5 + $0x170] sm:$0xff] }
 0x122   : > { %v1095_v31 = vrot.slane %v1093_v43, 7  ;;  %v1104_v18 = vrot.slane %v1102_v19, 7  ;;  %v6797_v40 = vld [vmem:[%s9081_s5 + $0x178] sm:$0xff]  ;;  %v2638_v58 = vshrl.u32 %v2494_v16, 16  ;;  %v6795_v16 = vld [vmem:[%s9081_s5 + $0x168] sm:$0xff] }
 0x123   : > { %v658_v20 = vmax.f32 %v604_v59, 0.0  ;;  %v2904_v59 = vunpack.c.l.b16 %v2627_v17  ;;  %3972 = vmatpush.bf16.msrb.mxu2 %v6797_v40 }
 0x124   : > { %v1098_v33 = vor.u32 %v1096_v60, %v1095_v31  ;;  %v1100_v51 = vrot.slane %v1095_v31, 4  ;;  %v1107_v50 = vor.u32 %v1105_v63, %v1104_v18  ;;  %v2643_v60 = vshrl.u32 %v2495_v39, 16  ;;  %v7563_v63 = vpop.f32.mrf.mxu2 }
 0x125   : > { %v690_v1 = vpack.c.bf16 %v658_v20, %v658_v20  ;;  %v2932_v18 = vpack.c.b16 %v2905_v62, %v2904_v59  ;;  %9178 = vst [vmem:[#allocation22_spill] sm:$0xff] %v7563_v63  ;;  %v7573_v62 = vpop.f32.mrf.mxu1 }
 0x126   : > { %v1099_v56 = vsel %vm7284_vm6, %v6033_v36, %v1098_v33  ;;  %v1108_v47 = vsel %vm7284_vm6, %v1100_v51, %v1107_v50  ;;  %v889_v19 = vld [vmem:[#allocation2 + $0xbc] sm:$0xf]  ;;  %v888_v36 = vld [vmem:[#allocation2 + $0xb8] sm:$0x8]  ;;  %v2645_v20 = vrot.slane %v2643_v60, 7  ;;  %v2654_v33 = vrot.slane %v2652_v37, 7 }
 0x127   : > { %v1295_v11 = vunpack.c.l.b16 %v1099_v56  ;;  %v1296_v43 = vunpack.c.l.b16 %v1108_v47  ;;  %842 = vst [vmem:[#allocation2 + $0xc0] sm:$0xf] %v690_v1  ;;  %v1115_v31 = vshrl.u32 %v889_v19, 16  ;;  %v760_v51 = vsel %vm7247_vm3, 0, %v759_v21  ;;  %v6788_v1 = vld [vmem:[%s9081_s5 + $0x130] sm:$0xff]  ;;  %3973 = vmatpush.bf16.msrb.mxu2 %v6796_v57 }
 0x128   : > { %v606_v0 = vpop.f32.mrf.mxu0  ;;  %v1110_v50 = vshrl.u32 %v888_v36, 16  ;;  %v2646_v56 = vshll.u32 %v2495_v39, 16  ;;  %v2655_v47 = vshll.u32 %v2496_v53, 16  ;;  %761 = vst [vmem:[#allocation2 + $0xe0] sm:$0x8] %v760_v51  ;;  %3291 = vmatpush.bf16.msrb.mxu1 %v6788_v1  ;;  %v6794_v51 = vld [vmem:[%s9081_s5 + $0x160] sm:$0xff] }
 0x129   : > { %v1319_v5 = vpack.c.b16 %v1296_v43, %v1295_v11  ;;  %v1117_v17 = vrot.slane %v1115_v31, 7  ;;  %9179 = vst [vmem:[#allocation23_spill] sm:$0xff] %v7573_v62  ;;  %v1118_v11 = vshll.u32 %v889_v19, 16  ;;  %v6238_v43 = vrot.slane %v2638_v58, 11  ;;  %v7581_v60 = vld [vmem:[%s9080_s4] ss:$0 sm:$0xff] }
 0x12a   : > { %v607_v37 = vadd.f32 %v7581_v60, %v606_v0  ;;  %v2648_v59 = vor.u32 %v2646_v56, %v2645_v20  ;;  %v2650_v31 = vrot.slane %v2645_v20, 4  ;;  %v2657_v40 = vor.u32 %v2655_v47, %v2654_v33 }
 0x12b   : > { %1439 = vmatmul.bf16.gmra.mxu1 %v1319_v5  ;;  %3036 = vmatmul.bf16.gmra.mxu0 %v2932_v18  ;;  %v6034_v19 = vrot.slane %v1110_v50, 11  ;;  %v1120_v5 = vor.u32 %v1118_v11, %v1117_v17  ;;  %v1122_v47 = vrot.slane %v1117_v17, 4  ;;  %v6793_v17 = vld [vmem:[%s9081_s5 + $0x158] sm:$0xff] }
 0x12c   : > { %3974 = vmatpush.bf16.msrb.mxu2 %v6795_v16  ;;  %v659_v0 = vmax.f32 %v607_v37, 0.0  ;;  %v2649_v1 = vsel %vm7284_vm6, %v6238_v43, %v2648_v59  ;;  %v2658_v20 = vsel %vm7284_vm6, %v2650_v31, %v2657_v40  ;;  %v2499_v16 = vld [vmem:[#allocation2 + $0x98] sm:$0xf] }
 0x12d   : > { %v1121_v56 = vsel %vm7284_vm6, %v6034_v19, %v1120_v5  ;;  %v2907_v43 = vunpack.c.l.b16 %v2658_v20  ;;  %v2674_v40 = vshrl.u32 %v2499_v16, 16  ;;  %v6787_v19 = vld [vmem:[%s9081_s5 + $0x128] sm:$0xff] }
 0x12e   : > { %v6727_v39 = vld [vmem:[#allocation2 + $0xbc] sm:$0xff]  ;;  %v1297_v59 = vunpack.c.l.b16 %v1121_v56  ;;  %v891_v20 = vld [vmem:[#allocation2 + $0xcc] sm:$0x8]  ;;  %3292 = vmatpush.bf16.msrb.mxu1 %v6787_v19 }
 0x12f   : > { %v890_v53 = vld [vmem:[#allocation2 + $0xc0] sm:$0xf]  ;;  %1726 = vmatmul.bf16.gmra.mxu2 %v6727_v39  ;;  %v2498_v39 = vld [vmem:[#allocation2 + $0x94] sm:$0xf]  ;;  %v7617_v19 = vld [vmem:[#allocation2 + $0x1c] sm:$0xf] }
 0x130   : > { %v1124_v36 = vshrl.u32 %v890_v53, 16  ;;  %v608_v18 = vpop.f32.mrf.mxu0  ;;  %v1127_v21 = vshll.u32 %v890_v53, 16  ;;  %v801_v53 = vld [vmem:[#allocation2 + $0xc4] sm:$0x1]  ;;  %3975 = vmatpush.bf16.msrb.mxu2 %v6794_v51  ;;  %v2665_v27 = vshrl.u32 %v2498_v39, 16 }
 0x131   : > { %v609_v58 = vadd.f32 %v7581_v60, %v608_v18  ;;  %v2906_v18 = vunpack.c.l.b16 %v2649_v1  ;;  %v802_v5 = vsel %vm7307_vm8, 0, %v801_v53  ;;  %v2497_v51 = vld [vmem:[#allocation2 + $0x90] sm:$0x8]  ;;  %v6786_v56 = vld [vmem:[%s9081_s5 + $0x120] sm:$0xff]  ;;  %v804_v53 = vld [vmem:[#allocation2 + $0xd8] sm:$0x1] }
 0x132   : > { %v1126_v57 = vrot.slane %v1124_v36, 7  ;;  %v7592_v50 = vpop.f32.mrf.mxu2  ;;  %803 = vst [vmem:[#allocation2 + $0xc4] sm:$0x1] %v802_v5  ;;  %3293 = vmatpush.bf16.msrb.mxu1 %v6786_v56  ;;  %v2509_v52 = vld [vmem:[#allocation2 + $0xe0] sm:$0x8] }
 0x133   : > { %v660_v33 = vmax.f32 %v609_v58, 0.0  ;;  %v2933_v1 = vpack.c.b16 %v2907_v43, %v2906_v18  ;;  %v2660_v18 = vshrl.u32 %v2497_v51, 16  ;;  %v2667_v43 = vrot.slane %v2665_v27, 7 }
 0x134   : > { %v1129_v11 = vor.u32 %v1127_v21, %v1126_v57  ;;  %3976 = vmatpush.bf16.msrb.mxu2 %v6793_v17 }
 0x135   : > { %v6933_v36 = vpack.c.bf16 %v660_v33, %v659_v0  ;;  %v6792_v33 = vld [vmem:[%s9081_s5 + $0x150] sm:$0xff] }
 0x136   : > { %v1130_v37 = vsel %vm7284_vm6, %v1122_v47, %v1129_v11  ;;  %v2676_v47 = vrot.slane %v2674_v40, 7  ;;  %v3412_v11 = vld [vmem:[#allocation2 + $0x20] sm:$0xf]  ;;  %v805_v40 = vsel %vm7307_vm8, 0, %v804_v53  ;;  %v6791_v53 = vld [vmem:[%s9081_s5 + $0x148] sm:$0xff] }
 0x137   : > { %v1298_v31 = vunpack.c.l.b16 %v1130_v37  ;;  %6969 = vst [vmem:[#allocation2 + $0xd0] sm:$0xff] %v6933_v36   ;;  %v3469_v5 = vshll.u32 %v3412_v11, 16 }
 0x138   : > { %v7598_v58 = vpop.f32.mrf.mxu1  ;;  %v611_v57 = vpop.f32.mrf.mxu0  ;;  %3977 = vmatpush.bf16.msrb.mxu2 %v6792_v33  ;;  %v2672_v33 = vrot.slane %v2667_v43, 4  ;;  %806 = vst [vmem:[#allocation2 + $0xd8] sm:$0x1] %v805_v40  ;;  %v3463_v40 = vshll.u32 %v7617_v19, 16 }
 0x139   : > { %v1320_v21 = vpack.c.b16 %v1298_v31, %v1297_v59  ;;  %v612_v0 = vadd.f32 %v7581_v60, %v611_v57  ;;  %v1132_v59 = vshrl.u32 %v891_v20, 16  ;;  %v2677_v31 = vshll.u32 %v2499_v16, 16 }
 0x13a   : > { %v7615_v37 = vpop.f32.mrf.mxu2  ;;  %v3473_v57 = vshrl.u32 %v3412_v11, 16  ;;  %v6239_v20 = vrot.slane %v2660_v18, 11  ;;  %v7649_v45 = vrot.slane %v3469_v5, 5 }
 0x13b   : > { %1444 = vmatmul.bf16.gmra.mxu1 %v1320_v21  ;;  %v661_v36 = vmax.f32 %v612_v0, 0.0  ;;  %3041 = vmatmul.bf16.gmra.mxu0 %v2933_v1  ;;  %v2668_v1 = vshll.u32 %v2498_v39, 16  ;;  %v2679_v9 = vor.u32 %v2677_v31, %v2676_v47  ;;  %v626_v56 = vpop.f32.mrf.mxu3  ;;  %v6035_v55 = vrot.slane %v1132_v59, 11  ;;  %v6785_v39 = vld [vmem:[%s9081_s5 + $0x118] sm:$0xff] }
 0x13c   : > { %3978 = vmatpush.bf16.msrb.mxu2 %v6791_v53  ;;  %3294 = vmatpush.bf16.msrb.mxu1 %v6785_v39  ;;  %v3460_v59 = vshrl.u32 %v7617_v19, 16  ;;  %v627_v39 = vadd.f32 %v7581_v60, %v626_v56  ;;  %v3475_v44 = vrot.slane %v3473_v57, 4 }
 0x13d   : > { %v693_v17 = vpack.c.bf16 %v661_v36, %v661_v36  ;;  %v2670_v54 = vor.u32 %v2668_v1, %v2667_v43  ;;  %v6784_v43 = vld [vmem:[%s9081_s5 + $0x110] sm:$0xff] }
 0x13e   : > { %v6728_v21 = vld [vmem:[#allocation2 + $0xd0] sm:$0xff]  ;;  %v3462_v56 = vrot.slane %v3460_v59, 4 }
 0x13f   : > { %v892_v10 = vld [vmem:[#allocation2 + $0xd0] sm:$0xf]  ;;  %v893_v0 = vld [vmem:[#allocation2 + $0xd4] sm:$0xf]  ;;  %845 = vst [vmem:[#allocation2 + $0xe4] sm:$0xf] %v693_v17  ;;  %1731 = vmatmul.bf16.gmra.mxu2 %v6728_v21  ;;  %v2680_v21 = vsel %vm7284_vm6, %v2672_v33, %v2679_v9  ;;  %v2671_v53 = vsel %vm7284_vm6, %v6239_v20, %v2670_v54 }
 0x140   : > { %v7621_v51 = vpop.f32.mrf.mxu1  ;;  %v1137_v27 = vshrl.u32 %v892_v10, 16  ;;  %v1146_v16 = vshrl.u32 %v893_v0, 16  ;;  %v613_v36 = vpop.f32.mrf.mxu0  ;;  %v1140_v11 = vshll.u32 %v892_v10, 16  ;;  %v1149_v17 = vshll.u32 %v893_v0, 16  ;;  %v6790_v10 = vld [vmem:[%s9081_s5 + $0x140] sm:$0xff]  ;;  %3295 = vmatpush.bf16.msrb.mxu1 %v6784_v43 }
 0x141   : > { %v614_v47 = vadd.f32 %v7581_v60, %v613_v36  ;;  %v7642_v33 = vld [vmem:[#allocation2 + $0xa8] sm:$0xf]  ;;  %v7644_v36 = vld [vmem:[#allocation2 + $0xac] sm:$0xf]  ;;  %3979 = vmatpush.bf16.msrb.mxu2 %v6790_v10  ;;  %v762_v43 = vld [vmem:[#allocation2 + $0xf4] sm:$0x8] }
 0x142   : > { %v1139_v31 = vrot.slane %v1137_v27, 7  ;;  %v1148_v18 = vrot.slane %v1146_v16, 7  ;;  %v7640_v27 = vpop.f32.mrf.mxu2  ;;  %v2687_v54 = vshrl.u32 %v7642_v33, 16  ;;  %v2696_v5 = vshrl.u32 %v7644_v36, 16 }
 0x143   : > { %v662_v1 = vmax.f32 %v614_v47, 0.0  ;;  %v2909_v47 = vunpack.c.l.b16 %v2680_v21  ;;  %v6783_v21 = vld [vmem:[%s9081_s5 + $0x108] sm:$0xff]  ;;  %v763_v59 = vsel %vm7247_vm3, 0, %v762_v43 }
 0x144   : > { %v1142_v0 = vor.u32 %v1140_v11, %v1139_v31  ;;  %v1144_v16 = vrot.slane %v1139_v31, 4  ;;  %v1151_v9 = vor.u32 %v1149_v17, %v1148_v18  ;;  %v3413_v31 = vld [vmem:[#allocation2 + $0x24] sm:$0x1]  ;;  %v2689_v13 = vrot.slane %v2687_v54, 7  ;;  %764 = vst [vmem:[#allocation2 + $0xf4] sm:$0x8] %v763_v59  ;;  %3296 = vmatpush.bf16.msrb.mxu1 %v6783_v21 }
 0x145   : > { %v694_v35 = vpack.c.bf16 %v662_v1, %v662_v1  ;;  %v3465_v1 = vrot.slane %v3463_v40, 5  ;;  %v3479_v24 = vshll.u32 %v3413_v31, 16  ;;  %v3414_v40 = vld [vmem:[#allocation2 + $0x30] sm:$0xf]  ;;  %v2698_v4 = vrot.slane %v2696_v5, 7 }
 0x146   : > { %v1143_v19 = vsel %vm7284_vm6, %v6035_v55, %v1142_v0  ;;  %v1152_v11 = vsel %vm7284_vm6, %v1144_v16, %v1151_v9  ;;  %v895_v34 = vld [vmem:[#allocation2 + $0xe4] sm:$0xf]  ;;  %v2908_v55 = vunpack.c.l.b16 %v2671_v53  ;;  %v628_v0 = vpop.f32.mrf.mxu3  ;;  %v3476_v53 = vor.u32 %v3475_v44, %v7649_v45 }
 0x147   : > { %v1299_v18 = vunpack.c.l.b16 %v1143_v19  ;;  %v1300_v17 = vunpack.c.l.b16 %v1152_v11  ;;  %846 = vst [vmem:[#allocation2 + $0xe8] sm:$0xf] %v694_v35  ;;  %v1159_v20 = vshrl.u32 %v895_v34, 16  ;;  %v894_v19 = vld [vmem:[#allocation2 + $0xe0] sm:$0x8]  ;;  %v667_v11 = vmax.f32 %v627_v39, 0.0 }
 0x148   : > { %v7657_v57 = vpop.f32.mrf.mxu1  ;;  %v616_v16 = vpop.f32.mrf.mxu0  ;;  %v629_v10 = vadd.f32 %v7581_v60, %v628_v0  ;;  %v2934_v35 = vpack.c.b16 %v2909_v47, %v2908_v55  ;;  %v3466_v31 = vor.u32 %v3465_v1, %v3462_v56  ;;  %v2690_v47 = vshll.u32 %v7642_v33, 16  ;;  %3297 = vmatpush.bf16.msrb.mxu1 %v6782_v25  ;;  %v7688_v25 = vld [vmem:[#allocation2 + $0xbc] sm:$0xf] }
 0x149   : > { %v1321_v9 = vpack.c.b16 %v1300_v17, %v1299_v18  ;;  %v1154_v18 = vshrl.u32 %v894_v19, 16  ;;  %v1161_v39 = vrot.slane %v1159_v20, 7  ;;  %v2699_v17 = vshll.u32 %v7644_v36, 16 }
 0x14a   : > { %v668_v3 = vmax.f32 %v629_v10, 0.0  ;;  %v7669_v44 = vpop.f32.mrf.mxu2  ;;  %v3484_v5 = vshrl.u32 %v3414_v40, 16  ;;  %v1162_v55 = vshll.u32 %v895_v34, 16  ;;  %v6240_v0 = vrot.slane %v2682_v14, 11 }
 0x14b   : > { %1449 = vmatmul.bf16.gmra.mxu1 %v1321_v9  ;;  %3046 = vmatmul.bf16.gmra.mxu0 %v2934_v35  ;;  %v3477_v9 = vrot.slane %v3476_v53, 4  ;;  %v3481_v19 = vrot.slane %v3479_v24, 5  ;;  %v617_v20 = vadd.f32 %v7581_v60, %v616_v16  ;;  %v2692_v21 = vor.u32 %v2690_v47, %v2689_v13  ;;  %v2505_v47 = vld [vmem:[#allocation2 + $0xc0] sm:$0xf] }
 0x14c   : > { %v6943_v54 = vpack.c.bf16 %v668_v3, %v667_v11  ;;  %v2694_v10 = vrot.slane %v2689_v13, 4  ;;  %v2701_v43 = vor.u32 %v2699_v17, %v2698_v4  ;;  %v6036_v59 = vrot.slane %v1154_v18, 11 }
 0x14d   : > { %v1164_v33 = vor.u32 %v1162_v55, %v1161_v39  ;;  %v3467_v24 = vrot.slane %v3466_v31, 4  ;;  %v7683_v4 = vrot.slane %v3484_v5, 4  ;;  %v3487_v34 = vshll.u32 %v3414_v40, 16 }
 0x14e   : > { %v6729_v56 = vld [vmem:[#allocation2 + $0xe4] sm:$0xff]  ;;  %6971 = vst [vmem:[#allocation2 + $0x120] sm:$0xff] %v6943_v54   ;;  %v3482_v18 = vsel %vm7678_vm11, %v3477_v9, %v3481_v19  ;;  %v663_v17 = vmax.f32 %v617_v20, 0.0  ;;  %v2693_v54 = vsel %vm7284_vm6, %v6240_v0, %v2692_v21  ;;  %v2702_v31 = vsel %vm7284_vm6, %v2694_v10, %v2701_v43 }
 0x14f   : > { %v896_v1 = vld [vmem:[#allocation2 + $0xe8] sm:$0xf]  ;;  %v631_v3 = vpop.f32.mrf.mxu3  ;;  %1736 = vmatmul.bf16.gmra.mxu2 %v6729_v56  ;;  %v1165_v40 = vsel %vm7284_vm6, %v6036_v59, %v1164_v33  ;;  %v2709_v9 = vshrl.u32 %v7688_v25, 16  ;;  %v2718_v19 = vshrl.u32 %v2505_v47, 16  ;;  %v3489_v20 = vrot.slane %v3487_v34, 5 }
 0x150   : > { %v7674_v35 = vpop.f32.mrf.mxu1  ;;  %v1168_v49 = vshrl.u32 %v896_v1, 16  ;;  %v618_v36 = vpop.f32.mrf.mxu0  ;;  %v632_v13 = vadd.f32 %v7581_v60, %v631_v3  ;;  %v1171_v53 = vshll.u32 %v896_v1, 16  ;;  %v3415_v1 = vld [vmem:[#allocation2 + $0x34] sm:$0xf]  ;;  %v2910_v21 = vunpack.c.l.b16 %v2693_v54 }
 0x151   : > { %v619_v16 = vadd.f32 %v7581_v60, %v618_v36  ;;  %v3416_v36 = vld [vmem:[#allocation2 + $0x38] sm:$0x1]  ;;  %v2911_v10 = vunpack.c.l.b16 %v2702_v31  ;;  %v3497_v59 = vshrl.u32 %v3415_v1, 16  ;;  %v3472_v34 = vsel %vm7678_vm11, %v3467_v24, %v7649_v45 }
 0x152   : > { %v1170_v11 = vrot.slane %v1168_v49, 7  ;;  %v669_v5 = vmax.f32 %v632_v13, 0.0  ;;  %v1166_v49 = vrot.slane %v1161_v39, 4  ;;  %v7699_v43 = vpop.f32.mrf.mxu2  ;;  %v1301_v13 = vunpack.c.l.b16 %v1165_v40 }
 0x153   : > { %v664_v55 = vmax.f32 %v619_v16, 0.0  ;;  %v3493_v39 = vshll.u32 %v3415_v1, 16  ;;  %v2711_v45 = vrot.slane %v2709_v9, 7  ;;  %v3490_v24 = vor.u32 %v3489_v20, %v7683_v4 }
 0x154   : > { %v1173_v56 = vor.u32 %v1171_v53, %v1170_v11  ;;  %v701_v3 = vpack.c.bf16 %v669_v5, %v669_v5  ;;  %v3861_v11 = vunpack.c.l.b16 %v3482_v18  ;;  %v3503_v53 = vshll.u32 %v3416_v36, 16  ;;  %v765_v5 = vld [vmem:[#allocation2 + $0x108] sm:$0x8] }
 0x155   : > { %v6938_v15 = vpack.c.bf16 %v664_v55, %v663_v17  ;;  %v2503_v55 = vld [vmem:[#allocation2 + $0xb8] sm:$0x8]  ;;  %v2721_v18 = vshll.u32 %v2505_v47, 16  ;;  %v7713_v36 = vrot.slane %v3493_v39, 5  ;;  %v2712_v4 = vshll.u32 %v7688_v25, 16 }
 0x156   : > { %v1174_v0 = vsel %vm7284_vm6, %v1166_v49, %v1173_v56  ;;  %853 = vst [vmem:[#allocation2 + $0x134] sm:$0xf] %v701_v3  ;;  %v2720_v49 = vrot.slane %v2718_v19, 7  ;;  %v766_v56 = vsel %vm7247_vm3, 0, %v765_v5  ;;  %v2935_v3 = vpack.c.b16 %v2911_v10, %v2910_v21  ;;  %v3418_v39 = vld [vmem:[#allocation2 + $0x48] sm:$0xf] }
 0x157   : > { %v1302_v16 = vunpack.c.l.b16 %v1174_v0  ;;  %6970 = vst [vmem:[#allocation2 + $0xf8] sm:$0xff] %v6938_v15   ;;  %v633_v17 = vpop.f32.mrf.mxu3  ;;  %v7709_v15 = vld [vmem:[#allocation2 + $0x44] sm:$0xf]  ;;  %v897_v0 = vld [vmem:[#allocation2 + $0xf4] sm:$0x8]  ;;  %v3499_v19 = vrot.slane %v3497_v59, 4 }
 0x158   : > { %v7701_v33 = vpop.f32.mrf.mxu1  ;;  %v621_v54 = vpop.f32.mrf.mxu0  ;;  %v634_v40 = vadd.f32 %v7581_v60, %v633_v17  ;;  %767 = vst [vmem:[#allocation2 + $0x108] sm:$0x8] %v766_v56  ;;  %v3860_v17 = vunpack.c.l.b16 %v3472_v34  ;;  %v2704_v5 = vshrl.u32 %v2503_v55, 16  ;;  %v7715_v41 = vrot.slane %v3503_v53, 5 }
 0x159   : > { %v1322_v31 = vpack.c.b16 %v1302_v16, %v1301_v13  ;;  %v622_v1 = vadd.f32 %v7581_v60, %v621_v54  ;;  %v1176_v48 = vshrl.u32 %v897_v0, 16  ;;  %v2723_v54 = vor.u32 %v2721_v18, %v2720_v49 }
 0x15a   : > { %v670_v13 = vmax.f32 %v634_v40, 0.0  ;;  %v3508_v9 = vshrl.u32 %v7709_v15, 16  ;;  %v2716_v20 = vrot.slane %v2711_v45, 4  ;;  %v7719_v47 = vrot.slane %v3490_v24, 4 }
 0x15b   : > { %1454 = vmatmul.bf16.gmra.mxu1 %v1322_v31  ;;  %v665_v16 = vmax.f32 %v622_v1, 0.0  ;;  %3051 = vmatmul.bf16.gmra.mxu0 %v2935_v3  ;;  %v3892_v59 = vpack.c.b16 %v3861_v11, %v3860_v17  ;;  %v3500_v34 = vor.u32 %v3499_v19, %v7713_v36  ;;  %v6241_v56 = vrot.slane %v2704_v5, 11  ;;  %v7725_v3 = vpop.f32.mrf.mxu2 }
 0x15c   : > { %v702_v21 = vpack.c.bf16 %v670_v13, %v670_v13  ;;  %v3511_v1 = vshll.u32 %v7709_v15, 16  ;;  %v6037_v0 = vrot.slane %v1176_v48, 11  ;;  %v2714_v11 = vor.u32 %v2712_v4, %v2711_v45 }
 0x15d   : > { %v697_v10 = vpack.c.bf16 %v665_v16, %v665_v16  ;;  %v2724_v18 = vsel %vm7284_vm6, %v2716_v20, %v2723_v54  ;;  %v3496_v15 = vsel %vm7678_vm11, %v7719_v47, %v7713_v36  ;;  %v3501_v5 = vrot.slane %v3500_v34, 4  ;;  %v768_v34 = vld [vmem:[#allocation2 + $0x11c] sm:$0x8] }
 0x15e   : > { %v898_v31 = vld [vmem:[#allocation2 + $0xf8] sm:$0xf]  ;;  %v899_v40 = vld [vmem:[#allocation2 + $0xfc] sm:$0xf]  ;;  %854 = vst [vmem:[#allocation2 + $0x138] sm:$0xf] %v702_v21  ;;  %v2913_v20 = vunpack.c.l.b16 %v2724_v18 }
 0x15f   : > { %849 = vst [vmem:[#allocation2 + $0x10c] sm:$0xf] %v697_v10  ;;  %v1181_v55 = vshrl.u32 %v898_v31, 16  ;;  %v1190_v49 = vshrl.u32 %v899_v40, 16  ;;  %3980 = vmatmul.bf16.vlgmr.msrb.gmra.mxu2 %v3892_v59  ;;  %v1184_v24 = vshll.u32 %v898_v31, 16  ;;  %v1193_v17 = vshll.u32 %v899_v40, 16 }
 0x160   : > { %v7722_v53 = vpop.f32.mrf.mxu1  ;;  %v623_v25 = vpop.f32.mrf.mxu0  ;;  %v2507_v21 = vld [vmem:[#allocation2 + $0xd0] sm:$0xf]  ;;  %v2508_v10 = vld [vmem:[#allocation2 + $0xd4] sm:$0xf]  ;;  %v7734_v59 = vrot.slane %v3508_v9, 4  ;;  %v3517_v48 = vshll.u32 %v3418_v39, 16 }
 0x161   : > { %v624_v19 = vadd.f32 %v7581_v60, %v623_v25  ;;  %v1183_v13 = vrot.slane %v1181_v55, 7  ;;  %v1192_v16 = vrot.slane %v1190_v49, 7  ;;  %v2715_v60 = vsel %vm7284_vm6, %v6241_v56, %v2714_v11  ;;  %v2506_v9 = vld [vmem:[#allocation2 + $0xcc] sm:$0x8] }
 0x162   : > { %v2731_v40 = vshrl.u32 %v2507_v21, 16  ;;  %v3521_v55 = vshrl.u32 %v3418_v39, 16  ;;  %v2740_v47 = vshrl.u32 %v2508_v10, 16  ;;  %v769_v56 = vsel %vm7247_vm3, 0, %v768_v34  ;;  %v6758_v39 = vld [vmem:[#allocation2 + $0x1c] sm:$0xff] }
 0x163   : > { %v666_v45 = vmax.f32 %v624_v19, 0.0  ;;  %v1186_v4 = vor.u32 %v1184_v24, %v1183_v13  ;;  %v1188_v31 = vrot.slane %v1183_v13, 4  ;;  %v1195_v54 = vor.u32 %v1193_v17, %v1192_v16  ;;  %770 = vst [vmem:[#allocation2 + $0x11c] sm:$0x8] %v769_v56  ;;  %v7753_v61 = vpop.f32.mrf.mxu2 }
 0x164   : > { %v3513_v16 = vrot.slane %v3511_v1, 5  ;;  %v2912_v18 = vunpack.c.l.b16 %v2715_v60  ;;  %v2726_v1 = vshrl.u32 %v2506_v9, 16  ;;  %v2742_v34 = vrot.slane %v2740_v47, 7 }
 0x165   : > { %v698_v49 = vpack.c.bf16 %v666_v45, %v666_v45  ;;  %v1187_v25 = vsel %vm7284_vm6, %v6037_v0, %v1186_v4  ;;  %v1196_v36 = vsel %vm7284_vm6, %v1188_v31, %v1195_v54  ;;  %v3506_v0 = vsel %vm7678_vm11, %v3501_v5, %v7715_v41  ;;  %v900_v54 = vld [vmem:[#allocation2 + $0x108] sm:$0x8] }
 0x166   : > { %v1303_v19 = vunpack.c.l.b16 %v1187_v25  ;;  %v1304_v24 = vunpack.c.l.b16 %v1196_v36  ;;  %v901_v13 = vld [vmem:[#allocation2 + $0x10c] sm:$0xf]  ;;  %v7749_v45 = vrot.slane %v3517_v48, 5  ;;  %v3523_v25 = vrot.slane %v3521_v55, 4 }
 0x167   : > { %850 = vst [vmem:[#allocation2 + $0x110] sm:$0xf] %v698_v49  ;;  %v1203_v17 = vshrl.u32 %v901_v13, 16  ;;  %v2936_v36 = vpack.c.b16 %v2913_v20, %v2912_v18  ;;  %v2733_v49 = vrot.slane %v2731_v40, 7  ;;  %v3862_v60 = vunpack.c.l.b16 %v3496_v15  ;;  %v3420_v18 = vld [vmem:[#allocation2 + $0x58] sm:$0xf] }
 0x168   : > { %v7744_v11 = vpop.f32.mrf.mxu1  ;;  %v7751_v4 = vpop.f32.mrf.mxu0  ;;  %v1323_v31 = vpack.c.b16 %v1304_v24, %v1303_v19  ;;  %v3863_v41 = vunpack.c.l.b16 %v3506_v0  ;;  %v1198_v5 = vshrl.u32 %v900_v54, 16  ;;  %v2734_v12 = vshll.u32 %v2507_v21, 16  ;;  %v3421_v21 = vld [vmem:[#allocation2 + $0x5c] sm:$0xf] }
 0x169   : > { %9182 = vst [vmem:[#allocation24_spill] sm:$0xff] %v7751_v4  ;;  %v1205_v48 = vrot.slane %v1203_v17, 7  ;;  %v2743_v28 = vshll.u32 %v2508_v10, 16  ;;  %v6242_v19 = vrot.slane %v2726_v1, 11  ;;  %v3514_v9 = vor.u32 %v3513_v16, %v7734_v59 }
 0x16a   : > { %1459 = vmatmul.bf16.vlgmr.msrb.gmra.mxu3 %v1323_v31  ;;  %v3524_v55 = vor.u32 %v3523_v25, %v7749_v45  ;;  %v3527_v20 = vshll.u32 %v3419_v46, 16  ;;  %v1206_v40 = vshll.u32 %v901_v13, 16  ;;  %v2736_v47 = vor.u32 %v2734_v12, %v2733_v49 }
 0x16b   : > { %3298 = vmatmul.bf16.vlgmr.msrb.gmra.mxu1 %v6758_v39  ;;  %3056 = vmatmul.bf16.gmra.mxu0 %v2936_v36  ;;  %v2738_v24 = vrot.slane %v2733_v49, 4  ;;  %v2745_v56 = vor.u32 %v2743_v28, %v2742_v34  ;;  %v3893_v31 = vpack.c.b16 %v3863_v41, %v3862_v60  ;;  %v6038_v0 = vrot.slane %v1198_v5, 11  ;;  %v2511_v36 = vld [vmem:[#allocation2 + $0xe8] sm:$0xf]  ;;  %v904_v34 = vld [vmem:[#allocation2 + $0x120] sm:$0xf] }
 0x16c   : > { %v1208_v54 = vor.u32 %v1206_v40, %v1205_v48  ;;  %v3515_v59 = vrot.slane %v3514_v9, 4  ;;  %v3525_v16 = vrot.slane %v3524_v55, 4  ;;  %v3529_v1 = vrot.slane %v3527_v20, 5  ;;  %v905_v60 = vld [vmem:[#allocation2 + $0x124] sm:$0xf] }
 0x16d   : > { %v3532_v46 = vshrl.u32 %v3420_v18, 16  ;;  %v2737_v28 = vsel %vm7284_vm6, %v6242_v19, %v2736_v47  ;;  %v2746_v25 = vsel %vm7284_vm6, %v2738_v24, %v2745_v56  ;;  %v3535_v41 = vshll.u32 %v3420_v18, 16  ;;  %v2510_v56 = vld [vmem:[#allocation2 + $0xe4] sm:$0xf] }
 0x16e   : > { %v902_v39 = vld [vmem:[#allocation2 + $0x110] sm:$0xf]  ;;  %v3520_v49 = vsel %vm7678_vm11, %v3515_v59, %v7749_v45  ;;  %v3541_v5 = vshll.u32 %v3421_v21, 16  ;;  %v1209_v9 = vsel %vm7284_vm6, %v6038_v0, %v1208_v54  ;;  %v1210_v55 = vrot.slane %v1205_v48, 4  ;;  %v807_v45 = vld [vmem:[#allocation2 + $0xec] sm:$0x1] }
 0x16f   : > { %v1212_v17 = vshrl.u32 %v902_v39, 16  ;;  %3985 = vmatmul.bf16.gmra.mxu2 %v3893_v31  ;;  %v1215_v12 = vshll.u32 %v902_v39, 16  ;;  %v3545_v40 = vshrl.u32 %v3421_v21, 16  ;;  %v7770_v31 = vpop.f32.mrf.mxu2  ;;  %v2914_v19 = vunpack.c.l.b16 %v2737_v28  ;;  %v771_v0 = vld [vmem:[#allocation2 + $0x130] sm:$0x8] }
 0x170   : > { %v7757_v15 = vpop.f32.mrf.mxu1  ;;  %v7759_v10 = vpop.f32.mrf.mxu0  ;;  %v2915_v47 = vunpack.c.l.b16 %v2746_v25  ;;  %v3530_v24 = vsel %vm7678_vm11, %v3525_v16, %v3529_v1  ;;  %v2762_v39 = vshrl.u32 %v2511_v36, 16  ;;  %v1234_v59 = vshrl.u32 %v905_v60, 16  ;;  %v6759_v21 = vld [vmem:[#allocation2 + $0x30] sm:$0xff] }
 0x171   : > { %9183 = vst [vmem:[#allocation25_spill] sm:$0xff] %v7759_v10  ;;  %v1214_v13 = vrot.slane %v1212_v17, 7  ;;  %v1225_v17 = vshrl.u32 %v904_v34, 16  ;;  %v3534_v26 = vrot.slane %v3532_v46, 4  ;;  %v1305_v48 = vunpack.c.l.b16 %v1209_v9 }
 0x172   : > { %v772_v28 = vsel %vm7247_vm3, 0, %v771_v0  ;;  %v2753_v16 = vshrl.u32 %v2510_v56, 16  ;;  %v7780_v1 = vrot.slane %v3541_v5, 5  ;;  %v3547_v6 = vrot.slane %v3545_v40, 4 }
 0x173   : > { %v1217_v20 = vor.u32 %v1215_v12, %v1214_v13  ;;  %v903_v13 = vld [vmem:[#allocation2 + $0x11c] sm:$0x8]  ;;  %v3537_v12 = vrot.slane %v3535_v41, 5  ;;  %773 = vst [vmem:[#allocation2 + $0x130] sm:$0x8] %v772_v28  ;;  %v2764_v41 = vrot.slane %v2762_v39, 7  ;;  %v3865_v5 = vunpack.c.l.b16 %v3530_v24 }
 0x174   : > { %v1220_v42 = vshrl.u32 %v903_v13, 16  ;;  %v1227_v0 = vrot.slane %v1225_v17, 7  ;;  %v1236_v32 = vrot.slane %v1234_v59, 7  ;;  %v1237_v22 = vshll.u32 %v905_v60, 16 }
 0x175   : > { %v1218_v18 = vsel %vm7284_vm6, %v1210_v55, %v1217_v20  ;;  %v808_v55 = vsel %vm7307_vm8, 0, %v807_v45  ;;  %v2937_v20 = vpack.c.b16 %v2915_v47, %v2914_v19  ;;  %v2765_v40 = vshll.u32 %v2511_v36, 16 }
 0x176   : > { %v1306_v54 = vunpack.c.l.b16 %v1218_v18  ;;  %v1228_v18 = vshll.u32 %v904_v34, 16  ;;  %809 = vst [vmem:[#allocation2 + $0xec] sm:$0x1] %v808_v55  ;;  %v3864_v28 = vunpack.c.l.b16 %v3520_v49  ;;  %v2748_v45 = vshrl.u32 %v2509_v52, 16  ;;  %v2514_v55 = vld [vmem:[#allocation2 + $0xfc] sm:$0xf] }
 0x177   : > { %v2755_v2 = vrot.slane %v2753_v16, 7  ;;  %v2767_v19 = vor.u32 %v2765_v40, %v2764_v41  ;;  %v3548_v34 = vor.u32 %v3547_v6, %v7780_v1  ;;  %v3551_v47 = vshll.u32 %v3422_v8, 16  ;;  %v7787_v60 = vpop.f32.mrf.mxu2  ;;  %v907_v6 = vld [vmem:[#allocation2 + $0x134] sm:$0xf]  ;;  %v2513_v16 = vld [vmem:[#allocation2 + $0xf8] sm:$0xf] }
 0x178   : > { %v7778_v25 = vpop.f32.mrf.mxu1  ;;  %v7784_v46 = vpop.f32.mrf.mxu0  ;;  %v1324_v9 = vpack.c.b16 %v1306_v54, %v1305_v48  ;;  %v2756_v48 = vshll.u32 %v2510_v56, 16  ;;  %v6039_v39 = vrot.slane %v1220_v42, 11  ;;  %v1230_v54 = vor.u32 %v1228_v18, %v1227_v0 }
 0x179   : > { %9184 = vst [vmem:[#allocation26_spill] sm:$0xff] %v7784_v46  ;;  %v3538_v46 = vor.u32 %v3537_v12, %v3534_v26  ;;  %v1232_v17 = vrot.slane %v1227_v0, 4  ;;  %v1239_v59 = vor.u32 %v1237_v22, %v1236_v32  ;;  %v3894_v13 = vpack.c.b16 %v3865_v5, %v3864_v28  ;;  %v908_v12 = vld [vmem:[#allocation2 + $0x138] sm:$0xf]  ;;  %v3424_v0 = vld [vmem:[#allocation2 + $0x70] sm:$0xf] }
 0x17a   : > { %1464 = vmatmul.bf16.gmra.mxu3 %v1324_v9  ;;  %v6243_v36 = vrot.slane %v2748_v45, 11  ;;  %v2758_v24 = vor.u32 %v2756_v48, %v2755_v2  ;;  %v2760_v49 = vrot.slane %v2755_v2, 4  ;;  %v3549_v56 = vrot.slane %v3548_v34, 4  ;;  %v3423_v9 = vld [vmem:[#allocation2 + $0x6c] sm:$0xf] }
 0x17b   : > { %3303 = vmatmul.bf16.gmra.mxu1 %v6759_v21  ;;  %3061 = vmatmul.bf16.gmra.mxu0 %v2937_v20  ;;  %v3539_v26 = vrot.slane %v3538_v46, 4  ;;  %v1231_v8 = vsel %vm7284_vm6, %v6039_v39, %v1230_v54  ;;  %v1240_v42 = vsel %vm7284_vm6, %v1232_v17, %v1239_v59  ;;  %v3553_v32 = vrot.slane %v3551_v47, 5  ;;  %v906_v48 = vld [vmem:[#allocation2 + $0x130] sm:$0x8]  ;;  %v2512_v17 = vld [vmem:[#allocation2 + $0xf4] sm:$0x8] }
 0x17c   : > { %v2768_v22 = vsel %vm7284_vm6, %v2760_v49, %v2767_v19  ;;  %v2759_v2 = vsel %vm7284_vm6, %v6243_v36, %v2758_v24  ;;  %v1307_v46 = vunpack.c.l.b16 %v1231_v8  ;;  %v1308_v20 = vunpack.c.l.b16 %v1240_v42 }
 0x17d   : > { %v2917_v18 = vunpack.c.l.b16 %v2768_v22  ;;  %v3544_v41 = vsel %vm7678_vm11, %v3539_v26, %v7780_v1  ;;  %v3554_v5 = vsel %vm7678_vm11, %v3549_v56, %v3553_v32  ;;  %v1247_v40 = vshrl.u32 %v907_v6, 16  ;;  %v6760_v26 = vld [vmem:[#allocation2 + $0x44] sm:$0xff] }
 0x17e   : > { %v1256_v28 = vshrl.u32 %v908_v12, 16  ;;  %v2916_v45 = vunpack.c.l.b16 %v2759_v2  ;;  %v2775_v19 = vshrl.u32 %v2513_v16, 16  ;;  %v2784_v34 = vshrl.u32 %v2514_v55, 16 }
 0x17f   : > { %3990 = vmatmul.bf16.gmra.mxu2 %v3894_v13  ;;  %v3556_v47 = vshrl.u32 %v3423_v9, 16  ;;  %v3866_v54 = vunpack.c.l.b16 %v3544_v41  ;;  %v3559_v59 = vshll.u32 %v3423_v9, 16  ;;  %v3565_v13 = vshll.u32 %v3424_v0, 16  ;;  %v7808_v24 = vpop.f32.mrf.mxu2 }
 0x180   : > { %v7789_v21 = vpop.f32.mrf.mxu1  ;;  %v7791_v52 = vpop.f32.mrf.mxu0  ;;  %v3569_v36 = vshrl.u32 %v3424_v0, 16  ;;  %v1325_v49 = vpack.c.b16 %v1308_v20, %v1307_v46  ;;  %v2938_v56 = vpack.c.b16 %v2917_v18, %v2916_v45  ;;  %v3867_v8 = vunpack.c.l.b16 %v3554_v5  ;;  %v6757_v0 = vld [vmem:[%s9081_s5 + $0xb8] sm:$0xff] }
 0x181   : > { %9185 = vst [vmem:[#allocation27_spill] sm:$0xff] %v7791_v52  ;;  %v1250_v42 = vshll.u32 %v907_v6, 16  ;;  %v1242_v22 = vshrl.u32 %v906_v48, 16  ;;  %v1249_v32 = vrot.slane %v1247_v40, 7  ;;  %v1258_v2 = vrot.slane %v1256_v28, 7  ;;  %2358 = vmatpush.bf16.msrb.mxu3 %v6757_v0 }
 0x182   : > { %v1259_v52 = vshll.u32 %v908_v12, 16  ;;  %v2770_v41 = vshrl.u32 %v2512_v17, 16  ;;  %v2777_v10 = vrot.slane %v2775_v19, 7  ;;  %v2786_v9 = vrot.slane %v2784_v34, 7  ;;  %v3425_v28 = vld [vmem:[#allocation2 + $0x74] sm:$0x1] }
 0x183   : > { %v3561_v46 = vrot.slane %v3559_v59, 5  ;;  %v7815_v20 = vrot.slane %v3565_v13, 5  ;;  %v3571_v18 = vrot.slane %v3569_v36, 4  ;;  %v3895_v6 = vpack.c.b16 %v3867_v8, %v3866_v54  ;;  %v3427_v8 = vld [vmem:[#allocation2 + $0x84] sm:$0xf] }
 0x184   : > { %v2778_v5 = vshll.u32 %v2513_v16, 16  ;;  %v2787_v40 = vshll.u32 %v2514_v55, 16  ;;  %v6040_v12 = vrot.slane %v1242_v22, 11  ;;  %v1252_v45 = vor.u32 %v1250_v42, %v1249_v32  ;;  %v6756_v16 = vld [vmem:[%s9081_s5 + $0xb0] sm:$0xff]  ;;  %v3426_v55 = vld [vmem:[#allocation2 + $0x80] sm:$0xf] }
 0x185   : > { %v1254_v48 = vrot.slane %v1249_v32, 4  ;;  %v1261_v19 = vor.u32 %v1259_v52, %v1258_v2  ;;  %v6244_v34 = vrot.slane %v2770_v41, 11  ;;  %v3572_v59 = vor.u32 %v3571_v18, %v7815_v20  ;;  %2359 = vmatpush.bf16.msrb.mxu3 %v6756_v16  ;;  %v2517_v2 = vld [vmem:[#allocation2 + $0x110] sm:$0xf]  ;;  %v2515_v16 = vld [vmem:[#allocation2 + $0x108] sm:$0x8] }
 0x186   : > { %v2780_v17 = vor.u32 %v2778_v5, %v2777_v10  ;;  %v3575_v13 = vshll.u32 %v3425_v28, 16  ;;  %v1253_v52 = vsel %vm7284_vm6, %v6040_v12, %v1252_v45  ;;  %v3580_v0 = vshrl.u32 %v3426_v55, 16  ;;  %v2516_v5 = vld [vmem:[#allocation2 + $0x10c] sm:$0xf] }
 0x187   : > { %v7829_v54 = vpop.f32.mrf.mxu2  ;;  %v3573_v22 = vrot.slane %v3572_v59, 4  ;;  %v1309_v41 = vunpack.c.l.b16 %v1253_v52  ;;  %v3593_v28 = vshrl.u32 %v3427_v8, 16  ;;  %v2806_v12 = vshrl.u32 %v2517_v2, 16 }
 0x188   : > { %v7806_v39 = vpop.f32.mrf.mxu1  ;;  %v7810_v1 = vpop.f32.mrf.mxu0  ;;  %v3577_v32 = vrot.slane %v3575_v13, 5 }
 0x189   : > { %9186 = vst [vmem:[#allocation28_spill] sm:$0xff] %v7810_v1  ;;  %v3558_v1 = vrot.slane %v3556_v47, 4 }
 0x18a   : > { %1469 = vmatmul.bf16.gmra.mxu3 %v1325_v49  ;;  %v2782_v49 = vrot.slane %v2777_v10, 4  ;;  %v1262_v10 = vsel %vm7284_vm6, %v1254_v48, %v1261_v19  ;;  %v3578_v19 = vsel %vm7678_vm11, %v3573_v22, %v3577_v32  ;;  %v2792_v22 = vshrl.u32 %v2515_v16, 16  ;;  %v2519_v16 = vld [vmem:[#allocation2 + $0x120] sm:$0xf] }
 0x18b   : > { %3308 = vmatmul.bf16.gmra.mxu1 %v6760_v26  ;;  %3066 = vmatmul.bf16.gmra.mxu0 %v2938_v56  ;;  %v2789_v26 = vor.u32 %v2787_v40, %v2786_v9  ;;  %v3562_v47 = vor.u32 %v3561_v46, %v3558_v1  ;;  %v2781_v1 = vsel %vm7284_vm6, %v6244_v34, %v2780_v17  ;;  %v1310_v9 = vunpack.c.l.b16 %v1262_v10 }
 0x18c   : > { %v3583_v46 = vshll.u32 %v3426_v55, 16  ;;  %v2918_v18 = vunpack.c.l.b16 %v2781_v1  ;;  %v3589_v40 = vshll.u32 %v3427_v8, 16  ;;  %v3595_v10 = vrot.slane %v3593_v28, 4 }
 0x18d   : > { %v2790_v56 = vsel %vm7284_vm6, %v2782_v49, %v2789_v26  ;;  %v3563_v42 = vrot.slane %v3562_v47, 4  ;;  %v1326_v17 = vpack.c.b16 %v1310_v9, %v1309_v41  ;;  %v6761_v49 = vld [vmem:[#allocation2 + $0x58] sm:$0xff]  ;;  %v2797_v26 = vshrl.u32 %v2516_v5, 16 }
 0x18e   : > { %v3582_v47 = vrot.slane %v3580_v0, 4  ;;  %v3585_v59 = vrot.slane %v3583_v46, 5  ;;  %v3591_v52 = vrot.slane %v3589_v40, 5  ;;  %v3869_v55 = vunpack.c.l.b16 %v3578_v19 }
 0x18f   : > { %3995 = vmatmul.bf16.gmra.mxu2 %v3895_v6  ;;  %v2919_v6 = vunpack.c.l.b16 %v2790_v56  ;;  %v3568_v48 = vsel %vm7678_vm11, %v3563_v42, %v7815_v20  ;;  %v2808_v1 = vrot.slane %v2806_v12, 7  ;;  %v3428_v56 = vld [vmem:[#allocation2 + $0x88] sm:$0x1]  ;;  %v7847_v42 = vpop.f32.mrf.mxu2  ;;  %v2799_v32 = vrot.slane %v2797_v26, 7 }
 0x190   : > { %v7817_v63 = vpop.f32.mrf.mxu1  ;;  %v7820_v36 = vpop.f32.mrf.mxu0  ;;  %v6755_v20 = vld [vmem:[%s9081_s5 + $0xa8] sm:$0xff]  ;;  %v3868_v8 = vunpack.c.l.b16 %v3568_v48  ;;  %9191 = vst [vmem:[#allocation33_spill] sm:$0xff] %v7847_v42  ;;  %v2809_v41 = vshll.u32 %v2517_v2, 16  ;;  %v3586_v9 = vor.u32 %v3585_v59, %v3582_v47  ;;  %v3596_v0 = vor.u32 %v3595_v10, %v3591_v52  ;;  %v6754_v2 = vld [vmem:[%s9081_s5 + $0xa0] sm:$0xff] }
 0x191   : > { %9187 = vst [vmem:[#allocation29_spill] sm:$0xff] %v7817_v63  ;;  %v2939_v13 = vpack.c.b16 %v2919_v6, %v2918_v18  ;;  %2360 = vmatpush.bf16.msrb.mxu3 %v6755_v20  ;;  %v3599_v46 = vshll.u32 %v3428_v56, 16  ;;  %v2800_v6 = vshll.u32 %v2516_v5, 16  ;;  %v6245_v19 = vrot.slane %v2792_v22, 11  ;;  %v3430_v5 = vld [vmem:[#allocation2 + $0x98] sm:$0xf] }
 0x192   : > { %9188 = vst [vmem:[#allocation30_spill] sm:$0xff] %v7820_v36  ;;  %v3896_v18 = vpack.c.b16 %v3869_v55, %v3868_v8  ;;  %v2811_v40 = vor.u32 %v2809_v41, %v2808_v1  ;;  %v2804_v48 = vrot.slane %v2799_v32, 4  ;;  %v3597_v26 = vrot.slane %v3596_v0, 4  ;;  %v2520_v10 = vld [vmem:[#allocation2 + $0x124] sm:$0xf] }
 0x193   : > { %v3601_v47 = vrot.slane %v3599_v46, 5  ;;  %v3429_v8 = vld [vmem:[#allocation2 + $0x94] sm:$0xf]  ;;  %v3613_v22 = vshll.u32 %v3430_v5, 16  ;;  %v2819_v0 = vshrl.u32 %v2519_v16, 16  ;;  %v2828_v46 = vshrl.u32 %v2520_v10, 16 }
 0x194   : > { %v2812_v59 = vsel %vm7284_vm6, %v2804_v48, %v2811_v40  ;;  %v2831_v4 = vshll.u32 %v2520_v10, 16  ;;  %v822_v63 = vld [vmem:[#allocation2 + $0x150] sm:$0x1] }
 0x195   : > { %2361 = vmatpush.bf16.msrb.mxu3 %v6754_v2  ;;  %v2921_v56 = vunpack.c.l.b16 %v2812_v59  ;;  %v3602_v20 = vsel %vm7678_vm11, %v3597_v26, %v3601_v47  ;;  %v3604_v2 = vshrl.u32 %v3429_v8, 16  ;;  %v3607_v26 = vshll.u32 %v3429_v8, 16 }
 0x196   : > { %v3871_v48 = vunpack.c.l.b16 %v3602_v20  ;;  %v2830_v20 = vrot.slane %v2828_v46, 7 }
 0x197   : > { %v7864_v41 = vpop.f32.mrf.mxu2 }
 0x198   : > { %v7835_v45 = vpop.f32.mrf.mxu1  ;;  %v7842_v34 = vpop.f32.mrf.mxu0  ;;  %9194 = vst [vmem:[#allocation36_spill] sm:$0xff] %v7864_v41 }
 0x199   : > { %9189 = vst [vmem:[#allocation31_spill] sm:$0xff] %v7835_v45 }
 0x19a   : > { %9190 = vst [vmem:[#allocation32_spill] sm:$0xff] %v7842_v34  ;;  %1474 = vmatmul.bf16.gmra.mxu3 %v1326_v17  ;;  %v2802_v17 = vor.u32 %v2800_v6, %v2799_v32  ;;  %v3617_v32 = vshrl.u32 %v3430_v5, 16  ;;  %v7873_v34 = vrot.slane %v3613_v22, 5 }
 0x19b   : > { %3313 = vmatmul.bf16.gmra.mxu1 %v6761_v49  ;;  %3071 = vmatmul.bf16.gmra.mxu0 %v2939_v13  ;;  %v3587_v49 = vrot.slane %v3586_v9, 4  ;;  %v2518_v9 = vld [vmem:[#allocation2 + $0x11c] sm:$0x8] }
 0x19c   : > { %v2803_v55 = vsel %vm7284_vm6, %v6245_v19, %v2802_v17  ;;  %v6730_v19 = vld [vmem:[#allocation2 + $0xf8] sm:$0xff]  ;;  %v6762_v17 = vld [vmem:[#allocation2 + $0x6c] sm:$0xff]  ;;  %v2814_v5 = vshrl.u32 %v2518_v9, 16  ;;  %v3619_v36 = vrot.slane %v3617_v32, 4  ;;  %v3609_v32 = vrot.slane %v3607_v26, 5 }
 0x19d   : > { %v3592_v1 = vsel %vm7678_vm11, %v3587_v49, %v3591_v52  ;;  %v2920_v6 = vunpack.c.l.b16 %v2803_v55  ;;  %v7006_v52 = vld [vmem:[%s9080_s4] ss:$0 sm:$0xff]  ;;  %v2821_v55 = vrot.slane %v2819_v0, 7 }
 0x19e   : > { %v3870_v40 = vunpack.c.l.b16 %v3592_v1  ;;  %v2822_v1 = vshll.u32 %v2519_v16, 16  ;;  %v6246_v0 = vrot.slane %v2814_v5, 11  ;;  %v3620_v16 = vor.u32 %v3619_v36, %v7873_v34  ;;  %v6752_v36 = vld [vmem:[%s9081_s5 + $0x90] sm:$0xff] }
 0x19f   : > { %4000 = vmatmul.bf16.gmra.mxu2 %v3896_v18  ;;  %v2940_v59 = vpack.c.b16 %v2921_v56, %v2920_v6  ;;  %v6829_v56 = vld [vmem:[%s9081_s5 + $0x1f8] sm:$0xff]  ;;  %v3606_v6 = vrot.slane %v3604_v2, 4 }
 0x1a0   : > { %v7849_v28 = vpop.f32.mrf.mxu1  ;;  %v7851_v12 = vpop.f32.mrf.mxu0  ;;  %4905 = vmatpush.bf16.msra.mxu0 %v6829_v56  ;;  %v2824_v46 = vor.u32 %v2822_v1, %v2821_v55  ;;  %v3621_v26 = vrot.slane %v3620_v16, 4  ;;  %v2521_v16 = vld [vmem:[#allocation2 + $0x130] sm:$0x8] }
 0x1a1   : > { %9192 = vst [vmem:[#allocation34_spill] sm:$0xff] %v7849_v28  ;;  %v636_v13 = vpop.f32.mrf.mxu3 }
 0x1a2   : > { %9193 = vst [vmem:[#allocation35_spill] sm:$0xff] %v7851_v12  ;;  %v637_v49 = vadd.f32 %v7006_v52, %v636_v13  ;;  %v3431_v12 = vld [vmem:[#allocation2 + $0x9c] sm:$0x1] }
 0x1a3   : > { %v6753_v13 = vld [vmem:[%s9081_s5 + $0x98] sm:$0xff]  ;;  %v3623_v10 = vshll.u32 %v3431_v12, 16  ;;  %v3610_v12 = vor.u32 %v3609_v32, %v3606_v6 }
 0x1a4   : > { %v671_v9 = vmax.f32 %v637_v49, 0.0  ;;  %2362 = vmatpush.bf16.msrb.mxu3 %v6753_v13  ;;  %v6827_v13 = vld [vmem:[%s9081_s5 + $0x1e8] sm:$0xff] }
 0x1a5   : > { %v3625_v5 = vrot.slane %v3623_v10, 5 }
 0x1a8   : > { %v7866_v18 = vpop.f32.mrf.mxu1  ;;  %v7871_v47 = vpop.f32.mrf.mxu0  ;;  %2363 = vmatpush.bf16.msrb.mxu3 %v6752_v36 }
 0x1a9   : > { %9195 = vst [vmem:[#allocation37_spill] sm:$0xff] %v7866_v18  ;;  %v638_v8 = vpop.f32.mrf.mxu3  ;;  %v7884_v18 = vpop.f32.mrf.mxu2 }
 0x1aa   : > { %9196 = vst [vmem:[#allocation38_spill] sm:$0xff] %v7871_v47  ;;  %1741 = vmatmul.bf16.vlgmr.msra.gmra.mxu3 %v6730_v19  ;;  %v639_v22 = vadd.f32 %v7006_v52, %v638_v8  ;;  %v3897_v19 = vpack.c.b16 %v3871_v48, %v3870_v40  ;;  %v2833_v47 = vor.u32 %v2831_v4, %v2830_v20  ;;  %v6828_v52 = vld [vmem:[%s9081_s5 + $0x1f0] sm:$0xff]  ;;  %v3432_v40 = vld [vmem:[#allocation2 + $0xa8] sm:$0xf]  ;;  %v3433_v48 = vld [vmem:[#allocation2 + $0xac] sm:$0xf] }
 0x1ab   : > { %3318 = vmatmul.bf16.gmra.mxu1 %v6762_v17  ;;  %3076 = vmatmul.bf16.gmra.mxu0 %v2940_v59  ;;  %v2826_v17 = vrot.slane %v2821_v55, 4  ;;  %9198 = vst [vmem:[#allocation40_spill] sm:$0xff] %v7884_v18  ;;  %v2825_v4 = vsel %vm7284_vm6, %v6246_v0, %v2824_v46  ;;  %v2522_v55 = vld [vmem:[#allocation2 + $0x134] sm:$0xf]  ;;  %v2523_v20 = vld [vmem:[#allocation2 + $0x138] sm:$0xf]  ;;  %v3626_v0 = vsel %vm7678_vm11, %v3621_v26, %v3625_v5 }
 0x1ac   : > { %v672_v59 = vmax.f32 %v639_v22, 0.0  ;;  %4906 = vmatpush.bf16.msra.mxu0 %v6828_v52  ;;  %v3628_v8 = vshrl.u32 %v3432_v40, 16  ;;  %v3631_v56 = vshll.u32 %v3432_v40, 16  ;;  %v3641_v22 = vshrl.u32 %v3433_v48, 16  ;;  %v1804_v18 = vld [vmem:[#allocation2 + $0x48] sm:$0xf] }
 0x1ad   : > { %v2834_v2 = vsel %vm7284_vm6, %v2826_v17, %v2833_v47  ;;  %v2922_v6 = vunpack.c.l.b16 %v2825_v4  ;;  %v3611_v47 = vrot.slane %v3610_v12, 4  ;;  %v2850_v10 = vshrl.u32 %v2523_v20, 16  ;;  %v6763_v17 = vld [vmem:[#allocation2 + $0x80] sm:$0xff] }
 0x1ae   : > { %v6948_v49 = vpack.c.bf16 %v672_v59, %v671_v9  ;;  %v3637_v9 = vshll.u32 %v3433_v48, 16  ;;  %v2923_v32 = vunpack.c.l.b16 %v2834_v2  ;;  %v3630_v52 = vrot.slane %v3628_v8, 4  ;;  %v6826_v48 = vld [vmem:[%s9081_s5 + $0x1e0] sm:$0xff] }
 0x1af   : > { %4005 = vmatmul.bf16.gmra.mxu2 %v3897_v19  ;;  %v2841_v19 = vshrl.u32 %v2522_v55, 16  ;;  %v3616_v59 = vsel %vm7678_vm11, %v3611_v47, %v7873_v34  ;;  %v3633_v36 = vrot.slane %v3631_v56, 5  ;;  %v3643_v12 = vrot.slane %v3641_v22, 4  ;;  %v6751_v56 = vld [vmem:[%s9081_s5 + $0x88] sm:$0xff] }
 0x1b0   : > { %v7882_v62 = vpop.f32.mrf.mxu1  ;;  %6972 = vst [vmem:[#allocation2 + $0x148] sm:$0xff] %v6948_v49   ;;  %v7896_v1 = vpop.f32.mrf.mxu0  ;;  %4907 = vmatpush.bf16.msra.mxu0 %v6827_v13  ;;  %v6731_v49 = vld [vmem:[#allocation2 + $0x10c] sm:$0xff]  ;;  %v7908_v40 = vrot.slane %v3637_v9, 5  ;;  %v2941_v4 = vpack.c.b16 %v2923_v32, %v2922_v6  ;;  %v3873_v2 = vunpack.c.l.b16 %v3626_v0  ;;  %v2836_v26 = vshrl.u32 %v2521_v16, 16  ;;  %v774_v9 = vld [vmem:[#allocation2 + $0x144] sm:$0x8]  ;;  %2364 = vmatpush.bf16.msrb.mxu3 %v6751_v56 }
 0x1b1   : > { %9197 = vst [vmem:[#allocation39_spill] sm:$0xff] %v7882_v62  ;;  %v2843_v5 = vrot.slane %v2841_v19, 7  ;;  %v3434_v13 = vld [vmem:[#allocation2 + $0xb0] sm:$0x1]  ;;  %v2844_v34 = vshll.u32 %v2522_v55, 16  ;;  %v2852_v47 = vrot.slane %v2850_v10, 7  ;;  %v3872_v22 = vunpack.c.l.b16 %v3616_v59 }
 0x1b2   : > { %9199 = vst [vmem:[#allocation41_spill] sm:$0xff] %v7896_v1  ;;  %v7913_v1 = vpop.f32.mrf.mxu2  ;;  %v2853_v8 = vshll.u32 %v2523_v20, 16  ;;  %v775_v6 = vsel %vm7247_vm3, 0, %v774_v9  ;;  %v3634_v32 = vor.u32 %v3633_v36, %v3630_v52  ;;  %v3644_v19 = vor.u32 %v3643_v12, %v7908_v40  ;;  %v6825_v55 = vld [vmem:[%s9081_s5 + $0x1d8] sm:$0xff]  ;;  %v6824_v56 = vld [vmem:[%s9081_s5 + $0x1d0] sm:$0xff] }
 0x1b3   : > { %9201 = vst [vmem:[#allocation43_spill] sm:$0xff] %v7913_v1  ;;  %v3647_v0 = vshll.u32 %v3434_v13, 16  ;;  %v3898_v16 = vpack.c.b16 %v3873_v2, %v3872_v22  ;;  %v6247_v10 = vrot.slane %v2836_v26, 11  ;;  %v2848_v59 = vrot.slane %v2843_v5, 4  ;;  %v6750_v2 = vld [vmem:[%s9081_s5 + $0x80] sm:$0xff] }
 0x1b4   : > { %4908 = vmatpush.bf16.msra.mxu0 %v6826_v48  ;;  %776 = vst [vmem:[#allocation2 + $0x144] sm:$0x8] %v775_v6  ;;  %v3635_v12 = vrot.slane %v3634_v32, 4  ;;  %v3645_v48 = vrot.slane %v3644_v19, 4  ;;  %v3436_v26 = vld [vmem:[#allocation2 + $0xc0] sm:$0xf]  ;;  %2365 = vmatpush.bf16.msrb.mxu3 %v6750_v2 }
 0x1b5   : > { %v3649_v13 = vrot.slane %v3647_v0, 5  ;;  %v3661_v19 = vshll.u32 %v3436_v26, 16  ;;  %v6823_v0 = vld [vmem:[%s9081_s5 + $0x1c8] sm:$0xff] }
 0x1b6   : > { %v3640_v6 = vsel %vm7678_vm11, %v3635_v12, %v7908_v40  ;;  %v6764_v12 = vld [vmem:[#allocation2 + $0x94] sm:$0xff] }
 0x1b7   : > { %v2525_v52 = vld [vmem:[#allocation2 + $0x148] sm:$0xf]  ;;  %v2526_v36 = vld [vmem:[#allocation2 + $0x14c] sm:$0xf]  ;;  %v3650_v32 = vsel %vm7678_vm11, %v3645_v48, %v3649_v13  ;;  %v6732_v48 = vld [vmem:[#allocation2 + $0x120] sm:$0xff]  ;;  %v3874_v13 = vunpack.c.l.b16 %v3640_v6 }
 0x1b8   : > { %v7903_v46 = vpop.f32.mrf.mxu1  ;;  %v7924_v20 = vpop.f32.mrf.mxu0  ;;  %4909 = vmatpush.bf16.msra.mxu0 %v6825_v55 }
 0x1b9   : > { %9200 = vst [vmem:[#allocation42_spill] sm:$0xff] %v7903_v46 }
 0x1ba   : > { %1746 = vmatmul.bf16.gmra.mxu3 %v6731_v49  ;;  %9202 = vst [vmem:[#allocation44_spill] sm:$0xff] %v7924_v20  ;;  %v2855_v49 = vor.u32 %v2853_v8, %v2852_v47  ;;  %v2863_v47 = vshrl.u32 %v2525_v52, 16  ;;  %v2872_v8 = vshrl.u32 %v2526_v36, 16  ;;  %v7938_v22 = vpop.f32.mrf.mxu2  ;;  %v2875_v20 = vshll.u32 %v2526_v36, 16 }
 0x1bb   : > { %3323 = vmatmul.bf16.gmra.mxu1 %v6763_v17  ;;  %3081 = vmatmul.bf16.gmra.mxu0 %v2941_v4  ;;  %v2846_v17 = vor.u32 %v2844_v34, %v2843_v5  ;;  %v2524_v9 = vld [vmem:[#allocation2 + $0x144] sm:$0x8]  ;;  %9204 = vst [vmem:[#allocation46_spill] sm:$0xff] %v7938_v22 }
 0x1bc   : > { %v2856_v34 = vsel %vm7284_vm6, %v2848_v59, %v2855_v49  ;;  %4910 = vmatpush.bf16.msra.mxu0 %v6824_v56  ;;  %v3665_v59 = vshrl.u32 %v3436_v26, 16  ;;  %v2858_v49 = vshrl.u32 %v2524_v9, 16  ;;  %v2865_v2 = vrot.slane %v2863_v47, 7  ;;  %v716_v26 = vld [vmem:[#allocation2 + $0x10] sm:$0x1] }
 0x1bd   : > { %v2847_v5 = vsel %vm7284_vm6, %v6247_v10, %v2846_v17  ;;  %v2866_v10 = vshll.u32 %v2525_v52, 16  ;;  %v3435_v17 = vld [vmem:[#allocation2 + $0xbc] sm:$0xf]  ;;  %v2874_v38 = vrot.slane %v2872_v8, 7  ;;  %v3875_v56 = vunpack.c.l.b16 %v3650_v32  ;;  %v6822_v52 = vld [vmem:[%s9081_s5 + $0x1c0] sm:$0xff] }
 0x1be   : > { %v2924_v55 = vunpack.c.l.b16 %v2847_v5  ;;  %v3652_v46 = vshrl.u32 %v3435_v17, 16  ;;  %v3655_v22 = vshll.u32 %v3435_v17, 16  ;;  %v3667_v36 = vrot.slane %v3665_v59, 4  ;;  %v3437_v17 = vld [vmem:[#allocation2 + $0xc4] sm:$0x1] }
 0x1bf   : > { %4010 = vmatmul.bf16.gmra.mxu2 %v3898_v16  ;;  %v2925_v16 = vunpack.c.l.b16 %v2856_v34  ;;  %v7955_v34 = vrot.slane %v3661_v19, 5  ;;  %v717_v47 = vsel %vm7307_vm8, 0, %v716_v26  ;;  %v6248_v8 = vrot.slane %v2858_v49, 11  ;;  %v1794_v19 = vld [vmem:[#allocation2 + $0x8] sm:$0xf] }
 0x1c0   : > { %v7926_v4 = vpop.f32.mrf.mxu1  ;;  %4911 = vmatpush.bf16.msra.mxu0 %v6823_v0  ;;  %v2868_v9 = vor.u32 %v2866_v10, %v2865_v2  ;;  %v2870_v6 = vrot.slane %v2865_v2, 4  ;;  %v2877_v32 = vor.u32 %v2875_v20, %v2874_v38  ;;  %718 = vst [vmem:[#allocation2 + $0x10] sm:$0x1] %v717_v47  ;;  %v6821_v0 = vld [vmem:[%s9081_s5 + $0x1b8] sm:$0xff]  ;;  %v3654_v59 = vrot.slane %v3652_v46, 4 }
 0x1c1   : > { %9203 = vst [vmem:[#allocation45_spill] sm:$0xff] %v7926_v4  ;;  %v7948_v4 = vpop.f32.mrf.mxu0  ;;  %v2942_v5 = vpack.c.b16 %v2925_v16, %v2924_v55  ;;  %v1795_v55 = vld [vmem:[#allocation2 + $0xc] sm:$0xf]  ;;  %4623 = vmatpush.bf16.msra.mxu3 %v6821_v0  ;;  %v3899_v16 = vpack.c.b16 %v3875_v56, %v3874_v13  ;;  %v3657_v26 = vrot.slane %v3655_v22, 5  ;;  %v3668_v20 = vor.u32 %v3667_v36, %v7955_v34 }
 0x1c2   : > { %9205 = vst [vmem:[#allocation47_spill] sm:$0xff] %v7948_v4  ;;  %v2869_v10 = vsel %vm7284_vm6, %v6248_v8, %v2868_v9  ;;  %v2878_v38 = vsel %vm7284_vm6, %v2870_v6, %v2877_v32  ;;  %v3671_v49 = vshll.u32 %v3437_v17, 16  ;;  %v1859_v47 = vshrl.u32 %v1795_v55, 16  ;;  %v3438_v9 = vld [vmem:[#allocation2 + $0xd0] sm:$0xf] }
 0x1c3   : > { %v3658_v22 = vor.u32 %v3657_v26, %v3654_v59  ;;  %v2926_v13 = vunpack.c.l.b16 %v2869_v10  ;;  %v2927_v56 = vunpack.c.l.b16 %v2878_v38  ;;  %v3669_v0 = vrot.slane %v3668_v20, 4  ;;  %v3439_v4 = vld [vmem:[#allocation2 + $0xd4] sm:$0xf] }
 0x1c4   : > { %4912 = vmatpush.bf16.msra.mxu0 %v6822_v52  ;;  %v1849_v52 = vshll.u32 %v1794_v19, 16  ;;  %v3673_v8 = vrot.slane %v3671_v49, 5  ;;  %v1861_v17 = vrot.slane %v1859_v47, 4  ;;  %v3679_v26 = vshll.u32 %v3438_v9, 16 }
 0x1c5   : > { %v3685_v10 = vshll.u32 %v3439_v4, 16  ;;  %v3689_v38 = vshrl.u32 %v3439_v4, 16  ;;  %v2943_v49 = vpack.c.b16 %v2927_v56, %v2926_v13 }
 0x1c6   : > { %v1851_v32 = vrot.slane %v1849_v52, 5  ;;  %v3674_v59 = vsel %vm7678_vm11, %v3669_v0, %v3673_v8 }
 0x1c7   : > { %v3877_v0 = vunpack.c.l.b16 %v3674_v59  ;;  %v3687_v4 = vrot.slane %v3685_v10, 5 }
 0x1c8   : > { %v7950_v40 = vpop.f32.mrf.mxu1 }
 0x1c9   : > { %9206 = vst [vmem:[#allocation48_spill] sm:$0xff] %v7950_v40  ;;  %v7971_v46 = vpop.f32.mrf.mxu0  ;;  %v6765_v40 = vld [vmem:[#allocation2 + $0xa8] sm:$0xff] }
 0x1ca   : > { %1751 = vmatmul.bf16.gmra.mxu3 %v6732_v48  ;;  %v7962_v48 = vpop.f32.mrf.mxu2  ;;  %9209 = vst [vmem:[#allocation51_spill] sm:$0xff] %v7971_v46  ;;  %v6733_v46 = vld [vmem:[#allocation2 + $0x134] sm:$0xff] }
 0x1cb   : > { %3328 = vmatmul.bf16.gmra.mxu1 %v6764_v12  ;;  %3086 = vmatmul.bf16.gmra.mxu0 %v2942_v5  ;;  %9207 = vst [vmem:[#allocation49_spill] sm:$0xff] %v7962_v48  ;;  %v1846_v12 = vshrl.u32 %v1794_v19, 16  ;;  %v1855_v5 = vshll.u32 %v1795_v55, 16  ;;  %v6837_v19 = vld [vmem:[%s9081_s5 + $0x238] sm:$0xff]  ;;  %v3659_v55 = vrot.slane %v3658_v22, 4 }
 0x1cc   : > { %5587 = vmatpush.bf16.msra.mxu1 %v6837_v19  ;;  %v1798_v48 = vld [vmem:[#allocation2 + $0x20] sm:$0xf] }
 0x1cd   : > { %v1848_v6 = vrot.slane %v1846_v12, 4  ;;  %v1857_v36 = vrot.slane %v1855_v5, 5  ;;  %v3664_v22 = vsel %vm7678_vm11, %v3659_v55, %v7955_v34  ;;  %v1879_v59 = vshll.u32 %v1798_v48, 16 }
 0x1cf   : > { %4015 = vmatmul.bf16.gmra.mxu2 %v3899_v16  ;;  %v3676_v16 = vshrl.u32 %v3438_v9, 16  ;;  %v1852_v12 = vor.u32 %v1851_v32, %v1848_v6  ;;  %v1862_v52 = vor.u32 %v1861_v17, %v1857_v36  ;;  %v3681_v9 = vrot.slane %v3679_v26, 5  ;;  %v3440_v17 = vld [vmem:[#allocation2 + $0xd8] sm:$0x1] }
 0x1d0   : > { %v7969_v2 = vpop.f32.mrf.mxu1  ;;  %v3691_v6 = vrot.slane %v3689_v38, 4  ;;  %v3876_v32 = vunpack.c.l.b16 %v3664_v22  ;;  %v3695_v55 = vshll.u32 %v3440_v17, 16  ;;  %v1883_v26 = vshrl.u32 %v1798_v48, 16  ;;  %v3442_v22 = vld [vmem:[#allocation2 + $0xe8] sm:$0xf] }
 0x1d1   : > { %9208 = vst [vmem:[#allocation50_spill] sm:$0xff] %v7969_v2  ;;  %v1796_v2 = vld [vmem:[#allocation2 + $0x10] sm:$0x1]  ;;  %v3678_v8 = vrot.slane %v3676_v16, 4  ;;  %v7985_v19 = vpop.f32.mrf.mxu0  ;;  %v1853_v13 = vrot.slane %v1852_v12, 4  ;;  %v1863_v56 = vrot.slane %v1862_v52, 4 }
 0x1d2   : > { %v1865_v5 = vshll.u32 %v1796_v2, 16  ;;  %v7980_v47 = vpop.f32.mrf.mxu2  ;;  %9212 = vst [vmem:[#allocation54_spill] sm:$0xff] %v7985_v19  ;;  %v1797_v16 = vld [vmem:[#allocation2 + $0x1c] sm:$0xf]  ;;  %v1799_v48 = vld [vmem:[#allocation2 + $0x24] sm:$0x1] }
 0x1d3   : > { %9211 = vst [vmem:[#allocation53_spill] sm:$0xff] %v7980_v47  ;;  %v3682_v47 = vor.u32 %v3681_v9, %v3678_v8  ;;  %v1873_v8 = vshll.u32 %v1797_v16, 16  ;;  %v7997_v9 = vrot.slane %v1879_v59, 5 }
 0x1d4   : > { %v1867_v2 = vrot.slane %v1865_v5, 5  ;;  %v3697_v5 = vrot.slane %v3695_v55, 5  ;;  %v6798_v55 = vld [vmem:[#allocation2 + $0x30] sm:$0xff] }
 0x1d5   : > { %v3683_v12 = vrot.slane %v3682_v47, 4 }
 0x1d6   : > { %v1868_v34 = vsel %vm7678_vm11, %v1863_v56, %v1867_v2  ;;  %v3441_v2 = vld [vmem:[#allocation2 + $0xe4] sm:$0xf] }
 0x1d8   : > { %v7978_v20 = vpop.f32.mrf.mxu1 }
 0x1d9   : > { %9210 = vst [vmem:[#allocation52_spill] sm:$0xff] %v7978_v20  ;;  %v3900_v20 = vpack.c.b16 %v3877_v0, %v3876_v32  ;;  %v1870_v0 = vshrl.u32 %v1797_v16, 16  ;;  %v3713_v32 = vshrl.u32 %v3442_v22, 16 }
 0x1da   : > { %1756 = vmatmul.bf16.gmra.mxu3 %v6733_v46  ;;  %v3692_v46 = vor.u32 %v3691_v6, %v3687_v4  ;;  %v7993_v10 = vpop.f32.mrf.mxu2  ;;  %v3709_v6 = vshll.u32 %v3442_v22, 16 }
 0x1db   : > { %3333 = vmatmul.bf16.gmra.mxu1 %v6765_v40  ;;  %3091 = vmatmul.bf16.gmra.mxu0 %v2943_v49  ;;  %v1858_v40 = vsel %vm7678_vm11, %v1853_v13, %v1857_v36  ;;  %9214 = vst [vmem:[#allocation56_spill] sm:$0xff] %v7993_v10  ;;  %v2247_v49 = vunpack.c.l.b16 %v1868_v34  ;;  %v7995_v36 = vpop.f32.mrf.mxu0  ;;  %v1885_v13 = vrot.slane %v1883_v26, 4  ;;  %v1872_v34 = vrot.slane %v1870_v0, 4 }
 0x1dc   : > { %v2246_v38 = vunpack.c.l.b16 %v1858_v40  ;;  %v3693_v52 = vrot.slane %v3692_v46, 4  ;;  %9215 = vst [vmem:[#allocation57_spill] sm:$0xff] %v7995_v36  ;;  %v6766_v40 = vld [vmem:[#allocation2 + $0xbc] sm:$0xff]  ;;  %v1875_v46 = vrot.slane %v1873_v8, 5  ;;  %v1889_v26 = vshll.u32 %v1799_v48, 16 }
 0x1dd   : > { %v1886_v59 = vor.u32 %v1885_v13, %v7997_v9  ;;  %v3715_v22 = vrot.slane %v3713_v32, 4  ;;  %v1801_v36 = vld [vmem:[#allocation2 + $0x34] sm:$0xf] }
 0x1de   : > { %v2278_v56 = vpack.c.b16 %v2247_v49, %v2246_v38  ;;  %v3698_v47 = vsel %vm7678_vm11, %v3693_v52, %v3697_v5  ;;  %v3700_v38 = vshrl.u32 %v3441_v2, 16  ;;  %v3703_v49 = vshll.u32 %v3441_v2, 16  ;;  %v6820_v52 = vld [vmem:[%s9081_s5 + $0x1b0] sm:$0xff]  ;;  %v3443_v5 = vld [vmem:[#allocation2 + $0xec] sm:$0x1] }
 0x1df   : > { %4020 = vmatmul.bf16.gmra.mxu2 %v3900_v20  ;;  %v3688_v20 = vsel %vm7678_vm11, %v3683_v12, %v3687_v4  ;;  %v3879_v4 = vunpack.c.l.b16 %v3698_v47  ;;  %v8006_v12 = vrot.slane %v3709_v6, 5  ;;  %v1876_v8 = vor.u32 %v1875_v46, %v1872_v34  ;;  %4624 = vmatpush.bf16.msra.mxu3 %v6820_v52  ;;  %v1800_v47 = vld [vmem:[#allocation2 + $0x30] sm:$0xf]  ;;  %v810_v52 = vld [vmem:[#allocation2 + $0x100] sm:$0x1] }
 0x1e0   : > { %v7987_v62 = vpop.f32.mrf.mxu1  ;;  %v3878_v16 = vunpack.c.l.b16 %v3688_v20  ;;  %v1887_v20 = vrot.slane %v1886_v59, 4  ;;  %v3702_v48 = vrot.slane %v3700_v38, 4  ;;  %v3705_v6 = vrot.slane %v3703_v49, 5 }
 0x1e1   : > { %9213 = vst [vmem:[#allocation55_spill] sm:$0xff] %v7987_v62  ;;  %v3716_v32 = vor.u32 %v3715_v22, %v8006_v12  ;;  %v1894_v34 = vshrl.u32 %v1800_v47, 16  ;;  %v1897_v46 = vshll.u32 %v1800_v47, 16  ;;  %v1907_v38 = vshrl.u32 %v1801_v36, 16 }
 0x1e2   : > { %v8011_v0 = vpop.f32.mrf.mxu2  ;;  %v3901_v2 = vpack.c.b16 %v3879_v4, %v3878_v16  ;;  %v811_v16 = vsel %vm7307_vm8, 0, %v810_v52  ;;  %v3706_v4 = vor.u32 %v3705_v6, %v3702_v48 }
 0x1e3   : > { %9217 = vst [vmem:[#allocation59_spill] sm:$0xff] %v8011_v0  ;;  %v8016_v19 = vpop.f32.mrf.mxu0  ;;  %v3717_v49 = vrot.slane %v3716_v32, 4  ;;  %v1909_v48 = vrot.slane %v1907_v38, 4  ;;  %v6767_v0 = vld [vmem:[#allocation2 + $0xd0] sm:$0xff]  ;;  %v6799_v38 = vld [vmem:[#allocation2 + $0x44] sm:$0xff] }
 0x1e4   : > { %9218 = vst [vmem:[#allocation60_spill] sm:$0xff] %v8016_v19 }
 0x1e5   : > { %812 = vst [vmem:[#allocation2 + $0x100] sm:$0x1] %v811_v16 }
 0x1e8   : > { %v8001_v17 = vpop.f32.mrf.mxu1 }
 0x1e9   : > { %9216 = vst [vmem:[#allocation58_spill] sm:$0xff] %v8001_v17  ;;  %v1877_v17 = vrot.slane %v1876_v8, 4  ;;  %v6836_v8 = vld [vmem:[%s9081_s5 + $0x230] sm:$0xff] }
 0x1ea   : > { %2366 = vmatmul.bf16.vlgmr.msrb.gmra.mxu3 %v2278_v56  ;;  %v1891_v56 = vrot.slane %v1889_v26, 5  ;;  %v1903_v26 = vshll.u32 %v1801_v36, 16  ;;  %v3445_v36 = vld [vmem:[#allocation2 + $0xfc] sm:$0xf]  ;;  %5588 = vmatpush.bf16.msra.mxu1 %v6836_v8  ;;  %v8032_v6 = vpop.f32.mrf.mxu2 }
 0x1eb   : > { %3338 = vmatmul.bf16.gmra.mxu1 %v6766_v40  ;;  %4913 = vmatmul.bf16.vlgmr.msra.gmra.mxu0 %v6798_v55  ;;  %v3719_v40 = vshll.u32 %v3443_v5, 16  ;;  %v1882_v5 = vsel %vm7678_vm11, %v1877_v17, %v7997_v9  ;;  %9220 = vst [vmem:[#allocation62_spill] sm:$0xff] %v8032_v6  ;;  %v1802_v17 = vld [vmem:[#allocation2 + $0x38] sm:$0x1] }
 0x1ec   : > { %v1892_v59 = vsel %vm7678_vm11, %v1887_v20, %v1891_v56  ;;  %v1899_v20 = vrot.slane %v1897_v46, 5  ;;  %v3444_v56 = vld [vmem:[#allocation2 + $0xf8] sm:$0xf]  ;;  %v1905_v52 = vrot.slane %v1903_v26, 5  ;;  %v2248_v32 = vunpack.c.l.b16 %v1882_v5  ;;  %v8038_v26 = vpop.f32.mrf.mxu0 }
 0x1ed   : > { %v8013_v13 = vpop.f32.mrf.mxu3  ;;  %v3721_v22 = vrot.slane %v3719_v40, 5  ;;  %v2249_v47 = vunpack.c.l.b16 %v1892_v59  ;;  %v3707_v40 = vrot.slane %v3706_v4, 4  ;;  %v3724_v59 = vshrl.u32 %v3444_v56, 16  ;;  %9222 = vst [vmem:[#allocation64_spill] sm:$0xff] %v8038_v26 }
 0x1ee   : > { %v3733_v46 = vshll.u32 %v3445_v36, 16  ;;  %v1910_v5 = vor.u32 %v1909_v48, %v1905_v52  ;;  %v1913_v8 = vshll.u32 %v1802_v17, 16  ;;  %v1927_v17 = vshll.u32 %v1804_v18, 16 }
 0x1ef   : > { %4025 = vmatmul.bf16.gmra.mxu2 %v3901_v2  ;;  %v1896_v2 = vrot.slane %v1894_v34, 4  ;;  %v3722_v9 = vsel %vm7678_vm11, %v3717_v49, %v3721_v22  ;;  %v3727_v34 = vshll.u32 %v3444_v56, 16  ;;  %v2279_v62 = vpack.c.b16 %v2249_v47, %v2248_v32 }
 0x1f0   : > { %v8018_v55 = vpop.f32.mrf.mxu1  ;;  %v3712_v4 = vsel %vm7678_vm11, %v3707_v40, %v8006_v12  ;;  %v3881_v49 = vunpack.c.l.b16 %v3722_v9  ;;  %v3726_v22 = vrot.slane %v3724_v59, 4  ;;  %v1911_v26 = vrot.slane %v1910_v5, 4  ;;  %v813_v9 = vld [vmem:[#allocation2 + $0x114] sm:$0x1] }
 0x1f1   : > { %9219 = vst [vmem:[#allocation61_spill] sm:$0xff] %v8018_v55  ;;  %v3737_v55 = vshrl.u32 %v3445_v36, 16  ;;  %v1900_v10 = vor.u32 %v1899_v20, %v1896_v2  ;;  %v3729_v56 = vrot.slane %v3727_v34, 5  ;;  %v3880_v47 = vunpack.c.l.b16 %v3712_v4  ;;  %v3446_v2 = vld [vmem:[#allocation2 + $0x100] sm:$0x1] }
 0x1f2   : > { %v1915_v6 = vrot.slane %v1913_v8, 5  ;;  %v8047_v40 = vpop.f32.mrf.mxu2  ;;  %v1931_v59 = vshrl.u32 %v1804_v18, 16  ;;  %v814_v34 = vsel %vm7307_vm8, 0, %v813_v9  ;;  %v6768_v9 = vld [vmem:[#allocation2 + $0xe4] sm:$0xff] }
 0x1f3   : > { %v3739_v36 = vrot.slane %v3737_v55, 4  ;;  %v1901_v32 = vrot.slane %v1900_v10, 4  ;;  %v3902_v1 = vpack.c.b16 %v3881_v49, %v3880_v47  ;;  %v3730_v48 = vor.u32 %v3729_v56, %v3726_v22  ;;  %9224 = vst [vmem:[#allocation66_spill] sm:$0xff] %v8047_v40  ;;  %v3448_v22 = vld [vmem:[#allocation2 + $0x110] sm:$0xf] }
 0x1f4   : > { %v1916_v10 = vsel %vm7678_vm11, %v1911_v26, %v1915_v6  ;;  %815 = vst [vmem:[#allocation2 + $0x114] sm:$0x1] %v814_v34  ;;  %v8059_v6 = vrot.slane %v1927_v17, 5  ;;  %v1933_v18 = vrot.slane %v1931_v59, 4  ;;  %v1805_v26 = vld [vmem:[#allocation2 + $0x4c] sm:$0x1] }
 0x1f5   : > { %v8030_v19 = vpop.f32.mrf.mxu3  ;;  %v1906_v55 = vsel %vm7678_vm11, %v1901_v32, %v1905_v52  ;;  %v3731_v4 = vrot.slane %v3730_v48, 4  ;;  %v2251_v49 = vunpack.c.l.b16 %v1916_v10  ;;  %v3447_v48 = vld [vmem:[#allocation2 + $0x10c] sm:$0xf]  ;;  %v6800_v10 = vld [vmem:[#allocation2 + $0x58] sm:$0xff]  ;;  %v1937_v59 = vshll.u32 %v1805_v26, 16 }
 0x1f6   : > { %v1934_v17 = vor.u32 %v1933_v18, %v8059_v6 }
 0x1f8   : > { %v8036_v16 = vpop.f32.mrf.mxu1  ;;  %v1935_v26 = vrot.slane %v1934_v17, 4 }
 0x1f9   : > { %9221 = vst [vmem:[#allocation63_spill] sm:$0xff] %v8036_v16  ;;  %v3735_v16 = vrot.slane %v3733_v46, 5  ;;  %v1803_v46 = vld [vmem:[#allocation2 + $0x44] sm:$0xf] }
 0x1fa   : > { %2371 = vmatmul.bf16.gmra.mxu3 %v2279_v62  ;;  %v1918_v56 = vshrl.u32 %v1803_v46, 16 }
 0x1fb   : > { %3343 = vmatmul.bf16.gmra.mxu1 %v6767_v0  ;;  %4918 = vmatmul.bf16.gmra.mxu0 %v6799_v38  ;;  %v3740_v62 = vor.u32 %v3739_v36, %v3735_v16  ;;  %v3743_v0 = vshll.u32 %v3446_v2, 16  ;;  %v8055_v38 = vpop.f32.mrf.mxu0  ;;  %v1921_v36 = vshll.u32 %v1803_v46, 16  ;;  %v3736_v32 = vsel %vm7678_vm11, %v3731_v4, %v3735_v16 }
 0x1fc   : > { %9225 = vst [vmem:[#allocation67_spill] sm:$0xff] %v8055_v38  ;;  %v1920_v34 = vrot.slane %v1918_v56, 4  ;;  %v8068_v38 = vpop.f32.mrf.mxu2  ;;  %v3748_v4 = vshrl.u32 %v3447_v48, 16 }
 0x1fd   : > { %v8043_v20 = vpop.f32.mrf.mxu3  ;;  %v3741_v5 = vrot.slane %v3740_v62, 4  ;;  %v3745_v8 = vrot.slane %v3743_v0, 5  ;;  %v3757_v62 = vshll.u32 %v3448_v22, 16  ;;  %v3761_v0 = vshrl.u32 %v3448_v22, 16  ;;  %9227 = vst [vmem:[#allocation69_spill] sm:$0xff] %v8068_v38 }
 0x1fe   : > { %v1923_v46 = vrot.slane %v1921_v36, 5  ;;  %v1806_v22 = vld [vmem:[#allocation2 + $0x58] sm:$0xf] }
 0x1ff   : > { %4030 = vmatmul.bf16.gmra.mxu2 %v3902_v1  ;;  %v2250_v1 = vunpack.c.l.b16 %v1906_v55  ;;  %v3746_v2 = vsel %vm7678_vm11, %v3741_v5, %v3745_v8  ;;  %v6819_v5 = vld [vmem:[%s9081_s5 + $0x1a8] sm:$0xff]  ;;  %v8073_v8 = vrot.slane %v3757_v62, 5  ;;  %v1942_v40 = vshrl.u32 %v1806_v22, 16 }
 0x200   : > { %v8045_v12 = vpop.f32.mrf.mxu1  ;;  %v3883_v16 = vunpack.c.l.b16 %v3746_v2  ;;  %4625 = vmatpush.bf16.msra.mxu3 %v6819_v5  ;;  %v1924_v18 = vor.u32 %v1923_v46, %v1920_v34  ;;  %v1807_v2 = vld [vmem:[#allocation2 + $0x5c] sm:$0xf] }
 0x201   : > { %9223 = vst [vmem:[#allocation65_spill] sm:$0xff] %v8045_v12  ;;  %v2280_v55 = vpack.c.b16 %v2251_v49, %v2250_v1  ;;  %v3751_v12 = vshll.u32 %v3447_v48, 16  ;;  %v3763_v1 = vrot.slane %v3761_v0, 4  ;;  %v3449_v49 = vld [vmem:[#allocation2 + $0x114] sm:$0x1]  ;;  %v1951_v34 = vshll.u32 %v1807_v2, 16 }
 0x202   : > { %v816_v48 = vld [vmem:[#allocation2 + $0x128] sm:$0x1]  ;;  %v3767_v5 = vshll.u32 %v3449_v49, 16  ;;  %v1955_v46 = vshrl.u32 %v1807_v2, 16  ;;  %v1925_v17 = vrot.slane %v1924_v18, 4  ;;  %v1944_v49 = vrot.slane %v1942_v40, 4 }
 0x203   : > { %v8075_v56 = vpop.f32.mrf.mxu0  ;;  %v3753_v38 = vrot.slane %v3751_v12, 5  ;;  %v817_v62 = vsel %vm7307_vm8, 0, %v816_v48  ;;  %v3764_v0 = vor.u32 %v3763_v1, %v8073_v8  ;;  %v3450_v12 = vld [vmem:[#allocation2 + $0x120] sm:$0xf] }
 0x204   : > { %9228 = vst [vmem:[#allocation70_spill] sm:$0xff] %v8075_v56  ;;  %v1945_v56 = vshll.u32 %v1806_v22, 16  ;;  %v3769_v1 = vrot.slane %v3767_v5, 5  ;;  %v6835_v22 = vld [vmem:[%s9081_s5 + $0x228] sm:$0xff]  ;;  %v1808_v2 = vld [vmem:[#allocation2 + $0x60] sm:$0x1] }
 0x205   : > { %v8057_v52 = vpop.f32.mrf.mxu3  ;;  %818 = vst [vmem:[#allocation2 + $0x128] sm:$0x1] %v817_v62  ;;  %v3765_v48 = vrot.slane %v3764_v0, 4  ;;  %5589 = vmatpush.bf16.msra.mxu1 %v6835_v22 }
 0x206   : > { %v1947_v62 = vrot.slane %v1945_v56, 5 }
 0x208   : > { %v8061_v47 = vpop.f32.mrf.mxu1 }
 0x209   : > { %9226 = vst [vmem:[#allocation68_spill] sm:$0xff] %v8061_v47  ;;  %v3882_v47 = vunpack.c.l.b16 %v3736_v32  ;;  %v1939_v32 = vrot.slane %v1937_v59, 5 }
 0x20a   : > { %2376 = vmatmul.bf16.gmra.mxu3 %v2280_v55 }
 0x20b   : > { %3348 = vmatmul.bf16.gmra.mxu1 %v6768_v9  ;;  %4923 = vmatmul.bf16.gmra.mxu0 %v6800_v10  ;;  %v3903_v55 = vpack.c.b16 %v3883_v16, %v3882_v47  ;;  %v3750_v9 = vrot.slane %v3748_v4, 4  ;;  %v1940_v47 = vsel %vm7678_vm11, %v1935_v26, %v1939_v32  ;;  %v3451_v16 = vld [vmem:[#allocation2 + $0x124] sm:$0xf]  ;;  %v1930_v4 = vsel %vm7678_vm11, %v1925_v17, %v8059_v6  ;;  %v8096_v5 = vpop.f32.mrf.mxu0 }
 0x20c   : > { %v2253_v18 = vunpack.c.l.b16 %v1940_v47  ;;  %v1953_v26 = vrot.slane %v1951_v34, 5  ;;  %v3781_v29 = vshll.u32 %v3451_v16, 16  ;;  %v3785_v6 = vshrl.u32 %v3451_v16, 16  ;;  %9231 = vst [vmem:[#allocation73_spill] sm:$0xff] %v8096_v5  ;;  %v6769_v34 = vld [vmem:[#allocation2 + $0xf8] sm:$0xff]  ;;  %v6801_v16 = vld [vmem:[#allocation2 + $0x6c] sm:$0xff] }
 0x20d   : > { %v8077_v36 = vpop.f32.mrf.mxu3  ;;  %v3754_v59 = vor.u32 %v3753_v38, %v3750_v9  ;;  %v1957_v38 = vrot.slane %v1955_v46, 4  ;;  %v3772_v9 = vshrl.u32 %v3450_v12, 16  ;;  %v2252_v0 = vunpack.c.l.b16 %v1930_v4 }
 0x20e   : > { %v3770_v47 = vsel %vm7678_vm11, %v3765_v48, %v3769_v1  ;;  %v3787_v41 = vrot.slane %v3785_v6, 4 }
 0x20f   : > { %4035 = vmatmul.bf16.gmra.mxu2 %v3903_v55  ;;  %v8092_v55 = vpop.f32.mrf.mxu2  ;;  %v3755_v40 = vrot.slane %v3754_v59, 4  ;;  %v2281_v56 = vpack.c.b16 %v2253_v18, %v2252_v0  ;;  %v1958_v28 = vor.u32 %v1957_v38, %v1953_v26  ;;  %v3774_v22 = vrot.slane %v3772_v9, 4  ;;  %v819_v38 = vld [vmem:[#allocation2 + $0x13c] sm:$0x1] }
 0x210   : > { %v8081_v10 = vpop.f32.mrf.mxu1  ;;  %9230 = vst [vmem:[#allocation72_spill] sm:$0xff] %v8092_v55  ;;  %v1961_v55 = vshll.u32 %v1808_v2, 16  ;;  %v3783_v59 = vrot.slane %v3781_v29, 5  ;;  %v3885_v5 = vunpack.c.l.b16 %v3770_v47 }
 0x211   : > { %9229 = vst [vmem:[#allocation71_spill] sm:$0xff] %v8081_v10  ;;  %v3775_v10 = vshll.u32 %v3450_v12, 16  ;;  %v3760_v46 = vsel %vm7678_vm11, %v3755_v40, %v8073_v8  ;;  %v1948_v12 = vor.u32 %v1947_v62, %v1944_v49  ;;  %v1959_v0 = vrot.slane %v1958_v28, 4  ;;  %v1810_v62 = vld [vmem:[#allocation2 + $0x70] sm:$0xf] }
 0x212   : > { %v3884_v48 = vunpack.c.l.b16 %v3760_v46  ;;  %v1963_v18 = vrot.slane %v1961_v55, 5  ;;  %v3788_v8 = vor.u32 %v3787_v41, %v3783_v59  ;;  %v1975_v40 = vshll.u32 %v1810_v62, 16  ;;  %v3453_v46 = vld [vmem:[#allocation2 + $0x134] sm:$0xf] }
 0x213   : > { %v3777_v4 = vrot.slane %v3775_v10, 5  ;;  %v1949_v1 = vrot.slane %v1948_v12, 4  ;;  %v820_v10 = vsel %vm7307_vm8, 0, %v819_v38  ;;  %v1979_v28 = vshrl.u32 %v1810_v62, 16  ;;  %v8115_v47 = vpop.f32.mrf.mxu0  ;;  %v3454_v12 = vld [vmem:[#allocation2 + $0x138] sm:$0xf] }
 0x214   : > { %v3904_v29 = vpack.c.b16 %v3885_v5, %v3884_v48  ;;  %821 = vst [vmem:[#allocation2 + $0x13c] sm:$0x1] %v820_v10  ;;  %v1964_v41 = vsel %vm7678_vm11, %v1959_v0, %v1963_v18  ;;  %v8125_v62 = vrot.slane %v1975_v40, 5  ;;  %v1811_v18 = vld [vmem:[#allocation2 + $0x74] sm:$0x1]  ;;  %v3796_v0 = vshrl.u32 %v3453_v46, 16 }
 0x215   : > { %v8094_v32 = vpop.f32.mrf.mxu3  ;;  %v3778_v45 = vor.u32 %v3777_v4, %v3774_v22  ;;  %v1954_v55 = vsel %vm7678_vm11, %v1949_v1, %v1953_v26  ;;  %9235 = vst [vmem:[#allocation77_spill] sm:$0xff] %v8115_v47  ;;  %v2255_v22 = vunpack.c.l.b16 %v1964_v41  ;;  %v6802_v40 = vld [vmem:[#allocation2 + $0x80] sm:$0xff] }
 0x217   : > { %v8107_v9 = vpop.f32.mrf.mxu2 }
 0x218   : > { %v8098_v17 = vpop.f32.mrf.mxu1  ;;  %9233 = vst [vmem:[#allocation75_spill] sm:$0xff] %v8107_v9  ;;  %v1813_v9 = vld [vmem:[#allocation2 + $0x84] sm:$0xf] }
 0x219   : > { %9232 = vst [vmem:[#allocation74_spill] sm:$0xff] %v8098_v17  ;;  %v3452_v17 = vld [vmem:[#allocation2 + $0x128] sm:$0x1] }
 0x21a   : > { %2381 = vmatmul.bf16.gmra.mxu3 %v2281_v56  ;;  %v3791_v49 = vshll.u32 %v3452_v17, 16  ;;  %v3779_v17 = vrot.slane %v3778_v45, 4  ;;  %v3789_v56 = vrot.slane %v3788_v8, 4  ;;  %v1981_v45 = vrot.slane %v1979_v28, 4 }
 0x21b   : > { %3353 = vmatmul.bf16.gmra.mxu1 %v6769_v34  ;;  %4928 = vmatmul.bf16.gmra.mxu0 %v6801_v16  ;;  %v1809_v34 = vld [vmem:[#allocation2 + $0x6c] sm:$0xf]  ;;  %v2254_v16 = vunpack.c.l.b16 %v1954_v55  ;;  %v3799_v8 = vshll.u32 %v3453_v46, 16  ;;  %v3798_v46 = vrot.slane %v3796_v0, 4 }
 0x21c   : > { %v3793_v5 = vrot.slane %v3791_v49, 5  ;;  %v1966_v4 = vshrl.u32 %v1809_v34, 16  ;;  %v1969_v48 = vshll.u32 %v1809_v34, 16  ;;  %v3784_v26 = vsel %vm7678_vm11, %v3779_v17, %v3783_v59  ;;  %v6770_v34 = vld [vmem:[#allocation2 + $0x10c] sm:$0xff]  ;;  %v8134_v59 = vld [vmem:[%s9082_s6] ss:$0 sm:$0xff] }
 0x21d   : > { %v8105_v2 = vpop.f32.mrf.mxu3  ;;  %v3805_v49 = vshll.u32 %v3454_v12, 16  ;;  %v2282_v41 = vpack.c.b16 %v2255_v22, %v2254_v16  ;;  %v3886_v28 = vunpack.c.l.b16 %v3784_v26  ;;  %v6818_v22 = vld [vmem:[%s9081_s5 + $0x1a0] sm:$0xff]  ;;  %v1504_v26 = vadd.f32 %v8134_v59, %v8013_v13 }
 0x21e   : > { %v3794_v1 = vsel %vm7678_vm11, %v3789_v56, %v3793_v5  ;;  %v1968_v47 = vrot.slane %v1966_v4, 4  ;;  %v1982_v56 = vor.u32 %v1981_v45, %v8125_v62  ;;  %v1985_v5 = vshll.u32 %v1811_v18, 16  ;;  %v8142_v4 = vpop.f32.mrf.mxu0  ;;  %4626 = vmatpush.bf16.msra.mxu3 %v6818_v22  ;;  %v6834_v22 = vld [vmem:[%s9081_s5 + $0x220] sm:$0xff] }
 0x21f   : > { %4040 = vmatmul.bf16.gmra.mxu2 %v3904_v29  ;;  %v3809_v29 = vshrl.u32 %v3454_v12, 16  ;;  %v8127_v10 = vpop.f32.mrf.mxu2  ;;  %v3887_v17 = vunpack.c.l.b16 %v3794_v1  ;;  %v3801_v12 = vrot.slane %v3799_v8, 5  ;;  %9238 = vst [vmem:[#allocation80_spill] sm:$0xff] %v8142_v4  ;;  %5590 = vmatpush.bf16.msra.mxu1 %v6834_v22 }
 0x220   : > { %v8111_v6 = vpop.f32.mrf.mxu1  ;;  %9236 = vst [vmem:[#allocation78_spill] sm:$0xff] %v8127_v10  ;;  %v1983_v0 = vrot.slane %v1982_v56, 4  ;;  %v1987_v8 = vrot.slane %v1985_v5, 5 }
 0x221   : > { %9234 = vst [vmem:[#allocation76_spill] sm:$0xff] %v8111_v6  ;;  %v1971_v6 = vrot.slane %v1969_v48, 5  ;;  %v3811_v16 = vrot.slane %v3809_v29, 4  ;;  %v3455_v48 = vld [vmem:[#allocation2 + $0x13c] sm:$0x1]  ;;  %v3905_v18 = vpack.c.b16 %v3887_v17, %v3886_v28  ;;  %v3802_v29 = vor.u32 %v3801_v12, %v3798_v46 }
 0x222   : > { %v3815_v10 = vshll.u32 %v3455_v48, 16  ;;  %v1988_v13 = vsel %vm7678_vm11, %v1983_v0, %v1987_v8  ;;  %v823_v28 = vsel %vm7307_vm8, 0, %v822_v63 }
 0x223   : > { %v1972_v1 = vor.u32 %v1971_v6, %v1968_v47  ;;  %v1999_v6 = vshll.u32 %v1813_v9, 16  ;;  %v2003_v47 = vshrl.u32 %v1813_v9, 16  ;;  %v3803_v5 = vrot.slane %v3802_v29, 4  ;;  %824 = vst [vmem:[#allocation2 + $0x150] sm:$0x1] %v823_v28 }
 0x224   : > { %v3817_v12 = vrot.slane %v3815_v10, 5  ;;  %v1505_v9 = vadd.f32 %v8134_v59, %v8030_v19  ;;  %v2257_v63 = vunpack.c.l.b16 %v1988_v13 }
 0x225   : > { %v8119_v38 = vpop.f32.mrf.mxu3  ;;  %v2001_v0 = vrot.slane %v1999_v6, 5  ;;  %v2005_v8 = vrot.slane %v2003_v47, 4  ;;  %v6803_v47 = vld [vmem:[#allocation2 + $0x94] sm:$0xff] }
 0x227   : > { %v8153_v17 = vpop.f32.mrf.mxu2  ;;  %v2006_v22 = vor.u32 %v2005_v8, %v2001_v0 }
 0x228   : > { %v8129_v55 = vpop.f32.mrf.mxu1 }
 0x229   : > { %9237 = vst [vmem:[#allocation79_spill] sm:$0xff] %v8129_v55  ;;  %v8137_v55 = vrot.slane %v3805_v49, 5  ;;  %v1812_v49 = vld [vmem:[#allocation2 + $0x80] sm:$0xf]  ;;  %v2007_v8 = vrot.slane %v2006_v22, 4 }
 0x22a   : > { %2386 = vmatmul.bf16.gmra.mxu3 %v2282_v41  ;;  %v1990_v4 = vshrl.u32 %v1812_v49, 16  ;;  %v1993_v42 = vshll.u32 %v1812_v49, 16 }
 0x22b   : > { %3358 = vmatmul.bf16.gmra.mxu1 %v6770_v34  ;;  %4933 = vmatmul.bf16.gmra.mxu0 %v6802_v40  ;;  %v3812_v34 = vor.u32 %v3811_v16, %v8137_v55  ;;  %v1973_v40 = vrot.slane %v1972_v1, 4  ;;  %v3456_v1 = vld [vmem:[#allocation2 + $0x148] sm:$0xf]  ;;  %v3808_v29 = vsel %vm7678_vm11, %v3803_v5, %v8137_v55 }
 0x22c   : > { %v1992_v48 = vrot.slane %v1990_v4, 4  ;;  %v1814_v4 = vld [vmem:[#allocation2 + $0x88] sm:$0x1] }
 0x22d   : > { %v1742_v45 = vpop.f32.mrf.mxu3  ;;  %v3813_v46 = vrot.slane %v3812_v34, 4  ;;  %v1978_v16 = vsel %vm7678_vm11, %v1973_v40, %v8125_v62  ;;  %v3823_v34 = vshll.u32 %v3456_v1, 16 }
 0x22e   : > { %v8146_v41 = vadd.f32 %v1742_v45, %v1504_v26  ;;  %v1995_v26 = vrot.slane %v1993_v42, 5  ;;  %v3457_v45 = vld [vmem:[#allocation2 + $0x14c] sm:$0xf]  ;;  %v2256_v62 = vunpack.c.l.b16 %v1978_v16  ;;  %v3820_v42 = vshrl.u32 %v3456_v1, 16 }
 0x22f   : > { %4045 = vmatmul.bf16.gmra.mxu2 %v3905_v18  ;;  %v8165_v18 = vpop.f32.mrf.mxu0  ;;  %v3818_v19 = vsel %vm7678_vm11, %v3813_v46, %v3817_v12  ;;  %v3829_v40 = vshll.u32 %v3457_v45, 16  ;;  %v3833_v13 = vshrl.u32 %v3457_v45, 16  ;;  %v3888_v16 = vunpack.c.l.b16 %v3808_v29  ;;  %v6833_v12 = vld [vmem:[%s9081_s5 + $0x218] sm:$0xff]  ;;  %v3458_v45 = vld [vmem:[#allocation2 + $0x150] sm:$0x1] }
 0x230   : > { %v8155_v56 = vpop.f32.mrf.mxu1  ;;  %9240 = vst [vmem:[#allocation82_spill] sm:$0xff] %v8165_v18  ;;  %v2283_v28 = vpack.c.b16 %v2257_v63, %v2256_v62  ;;  %v6771_v18 = vld [vmem:[#allocation2 + $0x120] sm:$0xff]  ;;  %v1996_v6 = vor.u32 %v1995_v26, %v1992_v48  ;;  %v3822_v55 = vrot.slane %v3820_v42, 4  ;;  %v3825_v5 = vrot.slane %v3823_v34, 5  ;;  %v8179_v48 = vpop.f32.mrf.mxu2  ;;  %v1816_v29 = vld [vmem:[#allocation2 + $0x98] sm:$0xf]  ;;  %5591 = vmatpush.bf16.msra.mxu1 %v6833_v12 }
 0x231   : > { %9239 = vst [vmem:[#allocation81_spill] sm:$0xff] %v8155_v56  ;;  %v3831_v7 = vrot.slane %v3829_v40, 5  ;;  %v3835_v46 = vrot.slane %v3833_v13, 4  ;;  %v1506_v63 = vadd.f32 %v8134_v59, %v8043_v20  ;;  %v3839_v13 = vshll.u32 %v3458_v45, 16  ;;  %v6832_v20 = vld [vmem:[%s9081_s5 + $0x210] sm:$0xff] }
 0x232   : > { %9241 = vst [vmem:[#allocation83_spill] sm:$0xff] %v8179_v48  ;;  %v1997_v1 = vrot.slane %v1996_v6, 4  ;;  %v3826_v34 = vor.u32 %v3825_v5, %v3822_v55  ;;  %v2023_v6 = vshll.u32 %v1816_v29, 16  ;;  %v1507_v12 = vadd.f32 %v8134_v59, %v8057_v52 }
 0x233   : > { %v3836_v40 = vor.u32 %v3835_v46, %v3831_v7  ;;  %v3841_v46 = vrot.slane %v3839_v13, 5 }
 0x234   : > { %5592 = vmatpush.bf16.msra.mxu1 %v6832_v20  ;;  %v3827_v55 = vrot.slane %v3826_v34, 4 }
 0x235   : > { %v1744_v10 = vpop.f32.mrf.mxu3  ;;  %v3837_v5 = vrot.slane %v3836_v40, 4  ;;  %v6830_v40 = vld [vmem:[%s9081_s5 + $0x200] sm:$0xff] }
 0x236   : > { %v8167_v49 = vadd.f32 %v1744_v10, %v1505_v9  ;;  %v2009_v9 = vshll.u32 %v1814_v4, 16  ;;  %v3889_v10 = vunpack.c.l.b16 %v3818_v19  ;;  %v3832_v34 = vsel %vm7678_vm11, %v3827_v55, %v3831_v7 }
 0x237   : > { %v8185_v42 = vpop.f32.mrf.mxu0  ;;  %v3842_v52 = vsel %vm7678_vm11, %v3837_v5, %v3841_v46  ;;  %v3890_v7 = vunpack.c.l.b16 %v3832_v34  ;;  %v6817_v5 = vld [vmem:[%s9081_s5 + $0x198] sm:$0xff]  ;;  %v5026_v46 = vld [vmem:[#allocation2 + $0x30] sm:$0xf] }
 0x238   : > { %v8181_v26 = vpop.f32.mrf.mxu1  ;;  %v2011_v62 = vrot.slane %v2009_v9, 5  ;;  %v3906_v4 = vpack.c.b16 %v3889_v10, %v3888_v16  ;;  %9243 = vst [vmem:[#allocation85_spill] sm:$0xff] %v8185_v42  ;;  %v6831_v9 = vld [vmem:[%s9081_s5 + $0x208] sm:$0xff]  ;;  %v1815_v16 = vld [vmem:[#allocation2 + $0x94] sm:$0xf]  ;;  %v3891_v55 = vunpack.c.l.b16 %v3842_v52  ;;  %4627 = vmatpush.bf16.msra.mxu3 %v6817_v5 }
 0x239   : > { %9242 = vst [vmem:[#allocation84_spill] sm:$0xff] %v8181_v26  ;;  %5593 = vmatpush.bf16.msra.mxu1 %v6831_v9  ;;  %v6804_v9 = vld [vmem:[#allocation2 + $0xa8] sm:$0xff] }
 0x23a   : > { %2391 = vmatmul.bf16.gmra.mxu3 %v2283_v28  ;;  %v2002_v28 = vsel %vm7678_vm11, %v1997_v1, %v2001_v0  ;;  %v2012_v22 = vsel %vm7678_vm11, %v2007_v8, %v2011_v62  ;;  %v8199_v0 = vrot.slane %v2023_v6, 5  ;;  %v2014_v8 = vshrl.u32 %v1815_v16, 16 }
 0x23b   : > { %3363 = vmatmul.bf16.gmra.mxu1 %v6771_v18  ;;  %4938 = vmatmul.bf16.gmra.mxu0 %v6803_v47  ;;  %v2027_v47 = vshrl.u32 %v1816_v29, 16  ;;  %v2258_v10 = vunpack.c.l.b16 %v2002_v28  ;;  %v2017_v62 = vshll.u32 %v1815_v16, 16  ;;  %v8201_v29 = vpop.f32.mrf.mxu2  ;;  %v6772_v28 = vld [vmem:[#allocation2 + $0x134] sm:$0xff]  ;;  %v3907_v52 = vpack.c.b16 %v3891_v55, %v3890_v7 }
 0x23c   : > { %9244 = vst [vmem:[#allocation86_spill] sm:$0xff] %v8201_v29  ;;  %v2016_v16 = vrot.slane %v2014_v8, 4 }
 0x23d   : > { %v1747_v18 = vpop.f32.mrf.mxu3  ;;  %v2029_v1 = vrot.slane %v2027_v47, 4  ;;  %5594 = vmatpush.bf16.msra.mxu1 %v6830_v40  ;;  %v1819_v40 = vld [vmem:[#allocation2 + $0xac] sm:$0xf] }
 0x23e   : > { %v8183_v19 = vadd.f32 %v1747_v18, %v1506_v63  ;;  %v2259_v63 = vunpack.c.l.b16 %v2012_v22  ;;  %v1817_v18 = vld [vmem:[#allocation2 + $0x9c] sm:$0x1] }
 0x23f   : > { %4050 = vmatmul.bf16.gmra.mxu2 %v3906_v4  ;;  %v2030_v6 = vor.u32 %v2029_v1, %v8199_v0  ;;  %v2033_v47 = vshll.u32 %v1817_v18, 16  ;;  %v8215_v22 = vpop.f32.mrf.mxu0  ;;  %v1818_v18 = vld [vmem:[#allocation2 + $0xa8] sm:$0xf] }
 0x240   : > { %v8203_v4 = vpop.f32.mrf.mxu1  ;;  %v2284_v13 = vpack.c.b16 %v2259_v63, %v2258_v10  ;;  %9246 = vst [vmem:[#allocation88_spill] sm:$0xff] %v8215_v22  ;;  %v5027_v10 = vld [vmem:[#allocation2 + $0x34] sm:$0xf]  ;;  %v1508_v63 = vadd.f32 %v8134_v59, %v8077_v36  ;;  %v2038_v42 = vshrl.u32 %v1818_v18, 16 }
 0x241   : > { %9245 = vst [vmem:[#allocation87_spill] sm:$0xff] %v8203_v4  ;;  %v2031_v1 = vrot.slane %v2030_v6, 4  ;;  %v5084_v22 = vshll.u32 %v5027_v10, 16  ;;  %v5088_v4 = vshrl.u32 %v5027_v10, 16  ;;  %v2041_v6 = vshll.u32 %v1818_v18, 16 }
 0x242   : > { %v2040_v10 = vrot.slane %v2038_v42, 4 }
 0x245   : > { %v1749_v45 = vpop.f32.mrf.mxu3 }
 0x246   : > { %v8205_v20 = vadd.f32 %v1749_v45, %v1507_v12  ;;  %v2019_v12 = vrot.slane %v2017_v62, 5  ;;  %v2035_v45 = vrot.slane %v2033_v47, 5  ;;  %v2047_v47 = vshll.u32 %v1819_v40, 16 }
 0x247   : > { %v8230_v7 = vpop.f32.mrf.mxu0 }
 0x248   : > { %v2020_v62 = vor.u32 %v2019_v12, %v2016_v16  ;;  %v8226_v26 = vpop.f32.mrf.mxu1  ;;  %v2036_v36 = vsel %vm7678_vm11, %v2031_v1, %v2035_v45  ;;  %v2051_v16 = vshrl.u32 %v1819_v40, 16  ;;  %9249 = vst [vmem:[#allocation91_spill] sm:$0xff] %v8230_v7  ;;  %v2043_v1 = vrot.slane %v2041_v6, 5  ;;  %v5028_v40 = vld [vmem:[#allocation2 + $0x38] sm:$0x1] }
 0x249   : > { %9248 = vst [vmem:[#allocation90_spill] sm:$0xff] %v8226_v26  ;;  %v5090_v26 = vrot.slane %v5088_v4, 4  ;;  %v2049_v45 = vrot.slane %v2047_v47, 5 }
 0x24a   : > { %2396 = vmatmul.bf16.gmra.mxu3 %v2284_v13  ;;  %v5075_v13 = vshrl.u32 %v5026_v46, 16  ;;  %v2021_v12 = vrot.slane %v2020_v62, 4  ;;  %v2053_v18 = vrot.slane %v2051_v16, 4  ;;  %v5030_v16 = vld [vmem:[#allocation2 + $0x48] sm:$0xf] }
 0x24b   : > { %3368 = vmatmul.bf16.gmra.mxu1 %v6772_v28  ;;  %4943 = vmatmul.bf16.gmra.mxu0 %v6804_v9  ;;  %v5078_v28 = vshll.u32 %v5026_v46, 16  ;;  %v8224_v9 = vpop.f32.mrf.mxu2  ;;  %v2261_v46 = vunpack.c.l.b16 %v2036_v36  ;;  %v2044_v36 = vor.u32 %v2043_v1, %v2040_v10 }
 0x24c   : > { %9247 = vst [vmem:[#allocation89_spill] sm:$0xff] %v8224_v9  ;;  %v5077_v5 = vrot.slane %v5075_v13, 4  ;;  %v2026_v55 = vsel %vm7678_vm11, %v2021_v12, %v8199_v0  ;;  %v1820_v13 = vld [vmem:[#allocation2 + $0xb0] sm:$0x1]  ;;  %v5094_v9 = vshll.u32 %v5028_v40, 16  ;;  %v6773_v0 = vld [vmem:[#allocation2 + $0x148] sm:$0xff]  ;;  %v2054_v42 = vor.u32 %v2053_v18, %v2049_v45 }
 0x24d   : > { %v1752_v8 = vpop.f32.mrf.mxu3  ;;  %v2057_v4 = vshll.u32 %v1820_v13, 16  ;;  %v6805_v12 = vld [vmem:[#allocation2 + $0xbc] sm:$0xff]  ;;  %v5029_v18 = vld [vmem:[#allocation2 + $0x44] sm:$0xf]  ;;  %v5112_v40 = vshrl.u32 %v5030_v16, 16 }
 0x24e   : > { %v8222_v34 = vadd.f32 %v1752_v8, %v1508_v63  ;;  %v5080_v63 = vrot.slane %v5078_v28, 5  ;;  %v5086_v8 = vrot.slane %v5084_v22, 5  ;;  %v2260_v22 = vunpack.c.l.b16 %v2026_v55 }
 0x24f   : > { %4055 = vmatmul.bf16.gmra.mxu2 %v3907_v52  ;;  %v1509_v52 = vadd.f32 %v8134_v59, %v8094_v32  ;;  %v5096_v47 = vrot.slane %v5094_v9, 5  ;;  %v2059_v55 = vrot.slane %v2057_v4, 5  ;;  %v5102_v4 = vshll.u32 %v5029_v18, 16 }
 0x250   : > { %v5081_v7 = vor.u32 %v5080_v63, %v5077_v5  ;;  %v5091_v56 = vor.u32 %v5090_v26, %v5086_v8  ;;  %v2285_v29 = vpack.c.b16 %v2261_v46, %v2260_v22  ;;  %v8239_v48 = vpop.f32.mrf.mxu1  ;;  %v1510_v5 = vadd.f32 %v8134_v59, %v8105_v2  ;;  %v8243_v46 = vpop.f32.mrf.mxu0 }
 0x251   : > { %9250 = vst [vmem:[#allocation92_spill] sm:$0xff] %v8239_v48  ;;  %v2045_v26 = vrot.slane %v2044_v36, 4  ;;  %v2055_v63 = vrot.slane %v2054_v42, 4  ;;  %v5099_v36 = vshrl.u32 %v5029_v18, 16  ;;  %v1823_v18 = vld [vmem:[#allocation2 + $0xc4] sm:$0x1] }
 0x252   : > { %v5082_v32 = vrot.slane %v5081_v7, 4  ;;  %v5092_v6 = vrot.slane %v5091_v56, 4  ;;  %9251 = vst [vmem:[#allocation93_spill] sm:$0xff] %v8243_v46  ;;  %v6806_v48 = vld [vmem:[#allocation2 + $0xd0] sm:$0xff] }
 0x253   : > { %v2050_v2 = vsel %vm7678_vm11, %v2045_v26, %v2049_v45  ;;  %v2060_v7 = vsel %vm7678_vm11, %v2055_v63, %v2059_v55 }
 0x254   : > { %v5087_v56 = vsel %vm7678_vm11, %v5082_v32, %v5086_v8  ;;  %v5097_v9 = vsel %vm7678_vm11, %v5092_v6, %v5096_v47  ;;  %v2262_v32 = vunpack.c.l.b16 %v2050_v2  ;;  %v2263_v6 = vunpack.c.l.b16 %v2060_v7 }
 0x255   : > { %v1754_v62 = vpop.f32.mrf.mxu3  ;;  %v5475_v42 = vunpack.c.l.b16 %v5087_v56  ;;  %v5476_v45 = vunpack.c.l.b16 %v5097_v9  ;;  %v5101_v56 = vrot.slane %v5099_v36, 4 }
 0x256   : > { %v8237_v28 = vadd.f32 %v1754_v62, %v1509_v52  ;;  %v1822_v52 = vld [vmem:[#allocation2 + $0xc0] sm:$0xf]  ;;  %v1821_v62 = vld [vmem:[#allocation2 + $0xbc] sm:$0xf]  ;;  %v2286_v7 = vpack.c.b16 %v2263_v6, %v2262_v32 }
 0x257   : > { %v2071_v13 = vshll.u32 %v1822_v52, 16  ;;  %v2075_v22 = vshrl.u32 %v1822_v52, 16  ;;  %v2062_v47 = vshrl.u32 %v1821_v62, 16  ;;  %v2065_v63 = vshll.u32 %v1821_v62, 16 }
 0x258   : > { %v8262_v26 = vpop.f32.mrf.mxu1  ;;  %v8270_v2 = vpop.f32.mrf.mxu0 }
 0x259   : > { %9252 = vst [vmem:[#allocation94_spill] sm:$0xff] %v8262_v26  ;;  %v8264_v55 = vrot.slane %v2071_v13, 5  ;;  %v2064_v62 = vrot.slane %v2062_v47, 4  ;;  %v2067_v13 = vrot.slane %v2065_v63, 5  ;;  %v2081_v26 = vshll.u32 %v1823_v18, 16 }
 0x25a   : > { %2401 = vmatmul.bf16.gmra.mxu3 %v2285_v29  ;;  %v5108_v29 = vshll.u32 %v5030_v16, 16  ;;  %v5031_v16 = vld [vmem:[#allocation2 + $0x4c] sm:$0x1]  ;;  %9253 = vst [vmem:[#allocation95_spill] sm:$0xff] %v8270_v2  ;;  %v1825_v18 = vld [vmem:[#allocation2 + $0xd4] sm:$0xf] }
 0x25b   : > { %3373 = vmatmul.bf16.gmra.mxu1 %v6773_v0  ;;  %4948 = vmatmul.bf16.gmra.mxu0 %v6805_v12  ;;  %v6845_v0 = vld [vmem:[%s9083_s7 + $0x38] sm:$0xff]  ;;  %v5114_v12 = vrot.slane %v5112_v40, 4  ;;  %v5118_v9 = vshll.u32 %v5031_v16, 16 }
 0x25c   : > { %v8258_v8 = vrot.slane %v5108_v29, 5  ;;  %5820 = vmatpush.bf16.msra.mxu2 %v6845_v0  ;;  %v1480_v29 = vadd.f32 %v8134_v59, %v7552_v23  ;;  %v5507_v0 = vpack.c.b16 %v5476_v45, %v5475_v42  ;;  %v6816_v23 = vld [vmem:[%s9081_s5 + $0x190] sm:$0xff]  ;;  %v5032_v42 = vld [vmem:[#allocation2 + $0x58] sm:$0xf]  ;;  %v2083_v45 = vrot.slane %v2081_v26, 5 }
 0x25d   : > { %v1757_v10 = vpop.f32.mrf.mxu3  ;;  %v5120_v32 = vrot.slane %v5118_v9, 5  ;;  %4628 = vmatpush.bf16.msra.mxu3 %v6816_v23  ;;  %v1826_v2 = vld [vmem:[#allocation2 + $0xd8] sm:$0x1] }
 0x25e   : > { %v8245_v1 = vadd.f32 %v1757_v10, %v1510_v5  ;;  %v1511_v5 = vadd.f32 %v8134_v59, %v8119_v38  ;;  %v2077_v10 = vrot.slane %v2075_v22, 4  ;;  %v5104_v38 = vrot.slane %v5102_v4, 5 }
 0x25f   : > { %v5115_v46 = vor.u32 %v5114_v12, %v8258_v8  ;;  %v1762_v4 = vadd.f32 %v7542_v30, %v1480_v29  ;;  %v2068_v12 = vor.u32 %v2067_v13, %v2064_v62  ;;  %v2095_v13 = vshll.u32 %v1825_v18, 16 }
 0x260   : > { %v2078_v22 = vor.u32 %v2077_v10, %v8264_v55  ;;  %v5105_v36 = vor.u32 %v5104_v38, %v5101_v56  ;;  %v8278_v63 = vpop.f32.mrf.mxu1 }
 0x261   : > { %v5116_v16 = vrot.slane %v5115_v46, 4  ;;  %9254 = vst [vmem:[#allocation96_spill] sm:$0xff] %v8278_v63  ;;  %v2069_v9 = vrot.slane %v2068_v12, 4 }
 0x262   : > { %v2079_v6 = vrot.slane %v2078_v22, 4  ;;  %v5106_v56 = vrot.slane %v5105_v36, 4  ;;  %v2099_v22 = vshrl.u32 %v1825_v18, 16 }
 0x263   : > { %v5121_v46 = vsel %vm7678_vm11, %v5116_v16, %v5120_v32  ;;  %v2074_v36 = vsel %vm7678_vm11, %v2069_v9, %v8264_v55  ;;  %v1482_v55 = vadd.f32 %v8134_v59, %v7598_v58 }
 0x264   : > { %v2084_v30 = vsel %vm7678_vm11, %v2079_v6, %v2083_v45  ;;  %v5111_v16 = vsel %vm7678_vm11, %v5106_v56, %v8258_v8  ;;  %v2101_v18 = vrot.slane %v2099_v22, 4 }
 0x265   : > { %v1759_v52 = vpop.f32.mrf.mxu3  ;;  %v2265_v32 = vunpack.c.l.b16 %v2084_v30 }
 0x266   : > { %v8268_v40 = vadd.f32 %v1759_v52, %v1511_v5  ;;  %v5033_v5 = vld [vmem:[#allocation2 + $0x5c] sm:$0xf]  ;;  %v1824_v52 = vld [vmem:[#allocation2 + $0xd0] sm:$0xf] }
 0x267   : > { %v5132_v26 = vshll.u32 %v5033_v5, 16  ;;  %v5136_v29 = vshrl.u32 %v5033_v5, 16  ;;  %v2086_v38 = vshrl.u32 %v1824_v52, 16  ;;  %v2089_v62 = vshll.u32 %v1824_v52, 16 }
 0x268   : > { %v2097_v52 = vrot.slane %v2095_v13, 5  ;;  %v8298_v9 = vpop.f32.mrf.mxu1 }
 0x269   : > { %v5134_v12 = vrot.slane %v5132_v26, 5  ;;  %v5138_v6 = vrot.slane %v5136_v29, 4  ;;  %v2091_v5 = vrot.slane %v2089_v62, 5  ;;  %9256 = vst [vmem:[#allocation98_spill] sm:$0xff] %v8298_v9  ;;  %v6807_v26 = vld [vmem:[#allocation2 + $0xe4] sm:$0xff]  ;;  %v2105_v62 = vshll.u32 %v1826_v2, 16 }
 0x26a   : > { %2406 = vmatmul.bf16.gmra.mxu3 %v2286_v7  ;;  %v5123_v7 = vshrl.u32 %v5032_v42, 16 }
 0x26b   : > { %5595 = vmatmul.bf16.vlgmr.msra.gmra.mxu1 %v5507_v0  ;;  %4953 = vmatmul.bf16.gmra.mxu0 %v6806_v48  ;;  %v5126_v48 = vshll.u32 %v5032_v42, 16  ;;  %v8286_v0 = vpop.f32.mrf.mxu0  ;;  %v5478_v42 = vunpack.c.l.b16 %v5121_v46  ;;  %v5139_v46 = vor.u32 %v5138_v6, %v5134_v12  ;;  %v1828_v6 = vld [vmem:[#allocation2 + $0xe8] sm:$0xf] }
 0x26c   : > { %9255 = vst [vmem:[#allocation97_spill] sm:$0xff] %v8286_v0  ;;  %v5125_v23 = vrot.slane %v5123_v7, 4  ;;  %v5034_v7 = vld [vmem:[#allocation2 + $0x60] sm:$0x1]  ;;  %v5477_v0 = vunpack.c.l.b16 %v5111_v16 }
 0x26d   : > { %v2367_v47 = vpop.f32.mrf.mxu3  ;;  %v5142_v30 = vshll.u32 %v5034_v7, 16  ;;  %v5140_v58 = vrot.slane %v5139_v46, 4 }
 0x26e   : > { %v8280_v10 = vadd.f32 %v2367_v47, %v1762_v4  ;;  %v5128_v4 = vrot.slane %v5126_v48, 5  ;;  %v2088_v47 = vrot.slane %v2086_v38, 4  ;;  %v2264_v48 = vunpack.c.l.b16 %v2074_v36 }
 0x26f   : > { %v5508_v56 = vpack.c.b16 %v5478_v42, %v5477_v0  ;;  %v2102_v38 = vor.u32 %v2101_v18, %v2097_v52  ;;  %v5144_v36 = vrot.slane %v5142_v30, 5  ;;  %v2107_v42 = vrot.slane %v2105_v62, 5  ;;  %v5035_v18 = vld [vmem:[#allocation2 + $0x6c] sm:$0xf] }
 0x270   : > { %v5129_v63 = vor.u32 %v5128_v4, %v5125_v23  ;;  %v2287_v8 = vpack.c.b16 %v2265_v32, %v2264_v48  ;;  %v2092_v29 = vor.u32 %v2091_v5, %v2088_v47  ;;  %v5036_v23 = vld [vmem:[#allocation2 + $0x70] sm:$0xf]  ;;  %v1764_v4 = vadd.f32 %v7592_v50, %v1482_v55  ;;  %v1827_v48 = vld [vmem:[#allocation2 + $0xe4] sm:$0xf] }
 0x271   : > { %v2103_v0 = vrot.slane %v2102_v38, 4  ;;  %v5156_v47 = vshll.u32 %v5036_v23, 16  ;;  %v1483_v5 = vadd.f32 %v8134_v59, %v7621_v51  ;;  %v5145_v50 = vsel %vm7678_vm11, %v5140_v58, %v5144_v36 }
 0x272   : > { %v5130_v13 = vrot.slane %v5129_v63, 4  ;;  %v2093_v32 = vrot.slane %v2092_v29, 4  ;;  %v5160_v63 = vshrl.u32 %v5036_v23, 16  ;;  %v2119_v55 = vshll.u32 %v1828_v6, 16 }
 0x273   : > { %v8300_v22 = vpop.f32.mrf.mxu0  ;;  %v5147_v51 = vshrl.u32 %v5035_v18, 16  ;;  %v5150_v29 = vshll.u32 %v5035_v18, 16  ;;  %v8320_v38 = vrot.slane %v5156_v47, 5  ;;  %v5480_v23 = vunpack.c.l.b16 %v5145_v50 }
 0x274   : > { %9257 = vst [vmem:[#allocation99_spill] sm:$0xff] %v8300_v22  ;;  %v5135_v2 = vsel %vm7678_vm11, %v5130_v13, %v5134_v12  ;;  %v2098_v46 = vsel %vm7678_vm11, %v2093_v32, %v2097_v52  ;;  %v2108_v12 = vsel %vm7678_vm11, %v2103_v0, %v2107_v42  ;;  %v5162_v62 = vrot.slane %v5160_v63, 4  ;;  %v5037_v0 = vld [vmem:[#allocation2 + $0x74] sm:$0x1]  ;;  %v5040_v22 = vld [vmem:[#allocation2 + $0x88] sm:$0x1] }
 0x275   : > { %v8294_v45 = vpop.f32.mrf.mxu3  ;;  %v5479_v30 = vunpack.c.l.b16 %v5135_v2  ;;  %v1765_v13 = vadd.f32 %v7615_v37, %v1483_v5  ;;  %v2113_v58 = vshll.u32 %v1827_v48, 16  ;;  %v2266_v36 = vunpack.c.l.b16 %v2098_v46  ;;  %v1829_v2 = vld [vmem:[#allocation2 + $0xec] sm:$0x1] }
 0x276   : > { %v8323_v52 = vrot.slane %v2119_v55, 5  ;;  %v1484_v47 = vadd.f32 %v8134_v59, %v7657_v57  ;;  %v5149_v18 = vrot.slane %v5147_v51, 4  ;;  %v5152_v37 = vrot.slane %v5150_v29, 5  ;;  %v6815_v57 = vld [vmem:[%s9081_s5 + $0x188] sm:$0xff] }
 0x277   : > { %v5509_v5 = vpack.c.b16 %v5480_v23, %v5479_v30  ;;  %v2115_v46 = vrot.slane %v2113_v58, 5  ;;  %4629 = vmatpush.bf16.msra.mxu3 %v6815_v57 }
 0x278   : > { %v5153_v51 = vor.u32 %v5152_v37, %v5149_v18 }
 0x27a   : > { %2411 = vmatmul.bf16.gmra.mxu3 %v2287_v8  ;;  %v2123_v8 = vshrl.u32 %v1828_v6, 16  ;;  %v5154_v37 = vrot.slane %v5153_v51, 4 }
 0x27b   : > { %5600 = vmatmul.bf16.gmra.mxu1 %v5508_v56  ;;  %4958 = vmatmul.bf16.gmra.mxu0 %v6807_v26  ;;  %v6844_v56 = vld [vmem:[%s9083_s7 + $0x30] sm:$0xff]  ;;  %v8318_v26 = vpop.f32.mrf.mxu1  ;;  %v8325_v42 = vpop.f32.mrf.mxu0 }
 0x27c   : > { %9258 = vst [vmem:[#allocation100_spill] sm:$0xff] %v8318_v26  ;;  %5821 = vmatpush.bf16.msra.mxu2 %v6844_v56  ;;  %v2125_v32 = vrot.slane %v2123_v8, 4  ;;  %v5166_v56 = vshll.u32 %v5037_v0, 16  ;;  %v1485_v0 = vadd.f32 %v8134_v59, %v7674_v35  ;;  %v5159_v57 = vsel %vm7678_vm11, %v5154_v37, %v8320_v38 }
 0x27d   : > { %v2372_v16 = vpop.f32.mrf.mxu3  ;;  %9259 = vst [vmem:[#allocation101_spill] sm:$0xff] %v8325_v42  ;;  %v6808_v42 = vld [vmem:[#allocation2 + $0xf8] sm:$0xff] }
 0x27e   : > { %v8303_v7 = vadd.f32 %v2372_v16, %v1764_v4  ;;  %v2110_v4 = vshrl.u32 %v1827_v48, 16  ;;  %v2267_v16 = vunpack.c.l.b16 %v2108_v12  ;;  %v5163_v48 = vor.u32 %v5162_v62, %v8320_v38 }
 0x27f   : > { %v2126_v8 = vor.u32 %v2125_v32, %v8323_v52  ;;  %v2129_v12 = vshll.u32 %v1829_v2, 16  ;;  %v5168_v30 = vrot.slane %v5166_v56, 5  ;;  %v1766_v62 = vadd.f32 %v7640_v27, %v1484_v47  ;;  %v5039_v32 = vld [vmem:[#allocation2 + $0x84] sm:$0xf]  ;;  %v1831_v2 = vld [vmem:[#allocation2 + $0xfc] sm:$0xf] }
 0x280   : > { %v2112_v50 = vrot.slane %v2110_v4, 4  ;;  %v2288_v55 = vpack.c.b16 %v2267_v16, %v2266_v36  ;;  %v5164_v29 = vrot.slane %v5163_v48, 4  ;;  %v5038_v36 = vld [vmem:[#allocation2 + $0x80] sm:$0xf]  ;;  %v5180_v56 = vshll.u32 %v5039_v32, 16 }
 0x281   : > { %v2127_v4 = vrot.slane %v2126_v8, 4  ;;  %v2131_v58 = vrot.slane %v2129_v12, 5  ;;  %v5171_v47 = vshrl.u32 %v5038_v36, 16  ;;  %v2143_v8 = vshll.u32 %v1831_v2, 16 }
 0x282   : > { %v2116_v23 = vor.u32 %v2115_v46, %v2112_v50  ;;  %v5169_v27 = vsel %vm7678_vm11, %v5164_v29, %v5168_v30  ;;  %v2147_v12 = vshrl.u32 %v1831_v2, 16 }
 0x283   : > { %v8343_v18 = vpop.f32.mrf.mxu0  ;;  %v2132_v48 = vsel %vm7678_vm11, %v2127_v4, %v2131_v58  ;;  %v5482_v29 = vunpack.c.l.b16 %v5169_v27  ;;  %v5173_v30 = vrot.slane %v5171_v47, 4  ;;  %v5182_v58 = vrot.slane %v5180_v56, 5  ;;  %v1832_v27 = vld [vmem:[#allocation2 + $0x100] sm:$0x1] }
 0x284   : > { %9261 = vst [vmem:[#allocation103_spill] sm:$0xff] %v8343_v18  ;;  %v2117_v50 = vrot.slane %v2116_v23, 4  ;;  %v1767_v23 = vadd.f32 %v7669_v44, %v1485_v0  ;;  %v2269_v4 = vunpack.c.l.b16 %v2132_v48  ;;  %v2145_v2 = vrot.slane %v2143_v8, 5 }
 0x285   : > { %v2374_v6 = vpop.f32.mrf.mxu3  ;;  %v2149_v18 = vrot.slane %v2147_v12, 4  ;;  %v1486_v47 = vadd.f32 %v8134_v59, %v7701_v33  ;;  %v5190_v48 = vshll.u32 %v5040_v22, 16  ;;  %v2153_v8 = vshll.u32 %v1832_v27, 16  ;;  %v5042_v33 = vld [vmem:[#allocation2 + $0x98] sm:$0xf]  ;;  %v6843_v27 = vld [vmem:[%s9083_s7 + $0x28] sm:$0xff] }
 0x286   : > { %v8329_v63 = vadd.f32 %v2374_v6, %v1765_v13  ;;  %v8336_v13 = vpop.f32.mrf.mxu1  ;;  %v2122_v51 = vsel %vm7678_vm11, %v2117_v50, %v8323_v52  ;;  %v5481_v52 = vunpack.c.l.b16 %v5159_v57  ;;  %5822 = vmatpush.bf16.msra.mxu2 %v6843_v27  ;;  %v6810_v27 = vld [vmem:[#allocation2 + $0x120] sm:$0xff] }
 0x287   : > { %9260 = vst [vmem:[#allocation102_spill] sm:$0xff] %v8336_v13  ;;  %v2268_v37 = vunpack.c.l.b16 %v2122_v51  ;;  %v1768_v57 = vadd.f32 %v7699_v43, %v1486_v47 }
 0x289   : > { %v2289_v0 = vpack.c.b16 %v2269_v4, %v2268_v37  ;;  %v2155_v4 = vrot.slane %v2153_v8, 5 }
 0x28a   : > { %2416 = vmatmul.bf16.gmra.mxu3 %v2288_v55  ;;  %v5184_v55 = vshrl.u32 %v5039_v32, 16 }
 0x28b   : > { %5605 = vmatmul.bf16.gmra.mxu1 %v5509_v5  ;;  %4963 = vmatmul.bf16.gmra.mxu0 %v6808_v42  ;;  %v1830_v42 = vld [vmem:[#allocation2 + $0xf8] sm:$0xf]  ;;  %v5174_v5 = vshll.u32 %v5038_v36, 16  ;;  %v8362_v56 = vpop.f32.mrf.mxu0 }
 0x28c   : > { %v2134_v46 = vshrl.u32 %v1830_v42, 16  ;;  %v2137_v35 = vshll.u32 %v1830_v42, 16  ;;  %v5186_v36 = vrot.slane %v5184_v55, 4  ;;  %v6809_v55 = vld [vmem:[#allocation2 + $0x10c] sm:$0xff] }
 0x28d   : > { %v2377_v16 = vpop.f32.mrf.mxu3 }
 0x28e   : > { %v8341_v6 = vadd.f32 %v2377_v16, %v1766_v62  ;;  %v5176_v62 = vrot.slane %v5174_v5, 5  ;;  %v2136_v32 = vrot.slane %v2134_v46, 4  ;;  %v2139_v42 = vrot.slane %v2137_v35, 5  ;;  %v8356_v13 = vpop.f32.mrf.mxu1 }
 0x28f   : > { %9262 = vst [vmem:[#allocation104_spill] sm:$0xff] %v8356_v13  ;;  %v5510_v5 = vpack.c.b16 %v5482_v29, %v5481_v52  ;;  %v5187_v50 = vor.u32 %v5186_v36, %v5182_v58  ;;  %v2150_v35 = vor.u32 %v2149_v18, %v2145_v2  ;;  %v1834_v36 = vld [vmem:[#allocation2 + $0x110] sm:$0xf]  ;;  %v5041_v52 = vld [vmem:[#allocation2 + $0x94] sm:$0xf] }
 0x290   : > { %v5177_v44 = vor.u32 %v5176_v62, %v5173_v30  ;;  %v2140_v46 = vor.u32 %v2139_v42, %v2136_v32  ;;  %v5208_v32 = vshrl.u32 %v5042_v33, 16  ;;  %v1487_v42 = vadd.f32 %v8134_v59, %v7722_v53  ;;  %v1833_v53 = vld [vmem:[#allocation2 + $0x10c] sm:$0xf] }
 0x291   : > { %v5188_v51 = vrot.slane %v5187_v50, 4  ;;  %v2151_v29 = vrot.slane %v2150_v35, 4 }
 0x292   : > { %v5178_v12 = vrot.slane %v5177_v44, 4  ;;  %v2141_v62 = vrot.slane %v2140_v46, 4  ;;  %v2167_v44 = vshll.u32 %v1834_v36, 16  ;;  %v5210_v35 = vrot.slane %v5208_v32, 4 }
 0x293   : > { %v8382_v50 = vpop.f32.mrf.mxu0  ;;  %v1769_v8 = vadd.f32 %v7725_v3, %v1487_v42  ;;  %v1488_v3 = vadd.f32 %v8134_v59, %v7744_v11 }
 0x294   : > { %v5183_v18 = vsel %vm7678_vm11, %v5178_v12, %v5182_v58  ;;  %v2146_v47 = vsel %vm7678_vm11, %v2141_v62, %v2145_v2  ;;  %v2156_v58 = vsel %vm7678_vm11, %v2151_v29, %v2155_v4  ;;  %v8387_v62 = vrot.slane %v2167_v44, 5 }
 0x295   : > { %v2379_v16 = vpop.f32.mrf.mxu3  ;;  %v2270_v12 = vunpack.c.l.b16 %v2146_v47 }
 0x296   : > { %v8358_v38 = vadd.f32 %v2379_v16, %v1767_v23  ;;  %v5192_v23 = vrot.slane %v5190_v48, 5  ;;  %v5204_v16 = vshll.u32 %v5042_v33, 16  ;;  %v8371_v37 = vpop.f32.mrf.mxu1  ;;  %v5195_v48 = vshrl.u32 %v5041_v52, 16 }
 0x297   : > { %9263 = vst [vmem:[#allocation105_spill] sm:$0xff] %v8371_v37  ;;  %v2158_v33 = vshrl.u32 %v1833_v53, 16 }
 0x298   : > { %v5193_v43 = vsel %vm7678_vm11, %v5188_v51, %v5192_v23  ;;  %v8384_v46 = vrot.slane %v5204_v16, 5  ;;  %v5043_v51 = vld [vmem:[#allocation2 + $0x9c] sm:$0x1] }
 0x299   : > { %v5484_v2 = vunpack.c.l.b16 %v5193_v43  ;;  %v5214_v32 = vshll.u32 %v5043_v51, 16  ;;  %v2160_v47 = vrot.slane %v2158_v33, 4 }
 0x29a   : > { %2421 = vmatmul.bf16.gmra.mxu3 %v2289_v0  ;;  %v2171_v0 = vshrl.u32 %v1834_v36, 16  ;;  %v1835_v36 = vld [vmem:[#allocation2 + $0x114] sm:$0x1]  ;;  %v5211_v16 = vor.u32 %v5210_v35, %v8384_v46 }
 0x29b   : > { %5610 = vmatmul.bf16.gmra.mxu1 %v5510_v5  ;;  %4968 = vmatmul.bf16.gmra.mxu0 %v6809_v55  ;;  %v5483_v5 = vunpack.c.l.b16 %v5183_v18  ;;  %v5198_v55 = vshll.u32 %v5041_v52, 16  ;;  %v5197_v18 = vrot.slane %v5195_v48, 4  ;;  %v6814_v48 = vld [vmem:[%s9081_s5 + $0x180] sm:$0xff]  ;;  %v5216_v11 = vrot.slane %v5214_v32, 5  ;;  %v8403_v51 = vpop.f32.mrf.mxu0 }
 0x29c   : > { %v2173_v29 = vrot.slane %v2171_v0, 4  ;;  %v5212_v35 = vrot.slane %v5211_v16, 4  ;;  %4630 = vmatpush.bf16.msra.mxu3 %v6814_v48 }
 0x29d   : > { %v2382_v30 = vpop.f32.mrf.mxu3  ;;  %v5200_v52 = vrot.slane %v5198_v55, 5  ;;  %v5511_v43 = vpack.c.b16 %v5484_v2, %v5483_v5  ;;  %v5045_v5 = vld [vmem:[#allocation2 + $0xac] sm:$0xf]  ;;  %v1489_v2 = vadd.f32 %v8134_v59, %v7757_v15 }
 0x29e   : > { %v8365_v22 = vadd.f32 %v2382_v30, %v1768_v57  ;;  %v2271_v57 = vunpack.c.l.b16 %v2156_v58  ;;  %v2161_v30 = vshll.u32 %v1833_v53, 16  ;;  %v2174_v44 = vor.u32 %v2173_v29, %v8387_v62  ;;  %v8395_v0 = vpop.f32.mrf.mxu1 }
 0x29f   : > { %v2177_v53 = vshll.u32 %v1835_v36, 16  ;;  %9264 = vst [vmem:[#allocation106_spill] sm:$0xff] %v8395_v0  ;;  %v5201_v55 = vor.u32 %v5200_v52, %v5197_v18  ;;  %v1837_v36 = vld [vmem:[#allocation2 + $0x124] sm:$0xf]  ;;  %v5228_v16 = vshll.u32 %v5045_v5, 16 }
 0x2a0   : > { %v2290_v42 = vpack.c.b16 %v2271_v57, %v2270_v12  ;;  %v2163_v58 = vrot.slane %v2161_v30, 5  ;;  %v1770_v12 = vadd.f32 %v7753_v61, %v1488_v3  ;;  %v1836_v57 = vld [vmem:[#allocation2 + $0x120] sm:$0xf]  ;;  %v2175_v30 = vrot.slane %v2174_v44, 4 }
 0x2a1   : > { %v2179_v29 = vrot.slane %v2177_v53, 5  ;;  %v5202_v32 = vrot.slane %v5201_v55, 4  ;;  %v5217_v61 = vsel %vm7678_vm11, %v5212_v35, %v5216_v11  ;;  %v2182_v3 = vshrl.u32 %v1836_v57, 16 }
 0x2a2   : > { %v2164_v33 = vor.u32 %v2163_v58, %v2160_v47  ;;  %v2191_v15 = vshll.u32 %v1837_v36, 16  ;;  %v2195_v59 = vshrl.u32 %v1837_v36, 16  ;;  %v5486_v44 = vunpack.c.l.b16 %v5217_v61  ;;  %v5046_v36 = vld [vmem:[#allocation2 + $0xb0] sm:$0x1] }
 0x2a3   : > { %v2180_v47 = vsel %vm7678_vm11, %v2175_v30, %v2179_v29  ;;  %v5207_v58 = vsel %vm7678_vm11, %v5202_v32, %v8384_v46  ;;  %v5230_v55 = vrot.slane %v5228_v16, 5  ;;  %v2184_v11 = vrot.slane %v2182_v3, 4  ;;  %v8429_v16 = vpop.f32.mrf.mxu0 }
 0x2a4   : > { %v2165_v48 = vrot.slane %v2164_v33, 4  ;;  %v2193_v30 = vrot.slane %v2191_v15, 5  ;;  %v2197_v29 = vrot.slane %v2195_v59, 4  ;;  %v5485_v32 = vunpack.c.l.b16 %v5207_v58  ;;  %v6811_v58 = vld [vmem:[#allocation2 + $0x134] sm:$0xff] }
 0x2a5   : > { %v2384_v23 = vpop.f32.mrf.mxu3 }
 0x2a6   : > { %v8389_v4 = vadd.f32 %v2384_v23, %v1769_v8  ;;  %v5044_v8 = vld [vmem:[#allocation2 + $0xa8] sm:$0xf]  ;;  %v2170_v35 = vsel %vm7678_vm11, %v2165_v48, %v8387_v62  ;;  %v5512_v61 = vpack.c.b16 %v5486_v44, %v5485_v32  ;;  %v2198_v48 = vor.u32 %v2197_v29, %v2193_v30  ;;  %v5048_v44 = vld [vmem:[#allocation2 + $0xc0] sm:$0xf] }
 0x2a7   : > { %v5219_v18 = vshrl.u32 %v5044_v8, 16  ;;  %v5222_v52 = vshll.u32 %v5044_v8, 16  ;;  %v5252_v32 = vshll.u32 %v5048_v44, 16 }
 0x2a9   : > { %v5221_v53 = vrot.slane %v5219_v18, 4  ;;  %v5224_v8 = vrot.slane %v5222_v52, 5  ;;  %v1838_v18 = vld [vmem:[#allocation2 + $0x128] sm:$0x1]  ;;  %v2272_v52 = vunpack.c.l.b16 %v2170_v35 }
 0x2aa   : > { %2426 = vmatmul.bf16.gmra.mxu3 %v2290_v42 }
 0x2ab   : > { %5615 = vmatmul.bf16.gmra.mxu1 %v5511_v43  ;;  %4973 = vmatmul.bf16.gmra.mxu0 %v6810_v27  ;;  %v5232_v43 = vshrl.u32 %v5045_v5, 16  ;;  %v2185_v27 = vshll.u32 %v1836_v57, 16  ;;  %v8418_v57 = vpop.f32.mrf.mxu1  ;;  %v5225_v3 = vor.u32 %v5224_v8, %v5221_v53 }
 0x2ac   : > { %9265 = vst [vmem:[#allocation107_spill] sm:$0xff] %v8418_v57 }
 0x2ad   : > { %v2387_v23 = vpop.f32.mrf.mxu3  ;;  %v5234_v5 = vrot.slane %v5232_v43, 4  ;;  %v2187_v33 = vrot.slane %v2185_v27, 5  ;;  %v5238_v27 = vshll.u32 %v5046_v36, 16  ;;  %v5226_v57 = vrot.slane %v5225_v3, 4  ;;  %v5047_v36 = vld [vmem:[#allocation2 + $0xbc] sm:$0xf] }
 0x2ae   : > { %v8405_v42 = vadd.f32 %v2387_v23, %v1770_v12  ;;  %v1771_v12 = vadd.f32 %v7770_v31, %v1489_v2  ;;  %v2273_v23 = vunpack.c.l.b16 %v2180_v47  ;;  %v8423_v31 = vld [vmem:[%s9082_s6] ss:$0 sm:$0xff]  ;;  %v2201_v47 = vshll.u32 %v1838_v18, 16 }
 0x2af   : > { %v1490_v62 = vadd.f32 %v8423_v31, %v7778_v25  ;;  %v5235_v43 = vor.u32 %v5234_v5, %v5230_v55  ;;  %v2188_v59 = vor.u32 %v2187_v33, %v2184_v11  ;;  %v5240_v25 = vrot.slane %v5238_v27, 5  ;;  %v1839_v11 = vld [vmem:[#allocation2 + $0x134] sm:$0xf] }
 0x2b0   : > { %v2291_v15 = vpack.c.b16 %v2273_v23, %v2272_v52  ;;  %v2203_v37 = vrot.slane %v2201_v47, 5  ;;  %v1840_v23 = vld [vmem:[#allocation2 + $0x138] sm:$0xf]  ;;  %v1491_v33 = vadd.f32 %v8423_v31, %v7789_v21  ;;  %v5231_v29 = vsel %vm7678_vm11, %v5226_v57, %v5230_v55  ;;  %v8449_v21 = vpop.f32.mrf.mxu0 }
 0x2b1   : > { %v5236_v0 = vrot.slane %v5235_v43, 4  ;;  %v2189_v35 = vrot.slane %v2188_v59, 4  ;;  %v5256_v52 = vshrl.u32 %v5048_v44, 16  ;;  %v2206_v3 = vshrl.u32 %v1839_v11, 16 }
 0x2b2   : > { %v2209_v55 = vshll.u32 %v1839_v11, 16  ;;  %v2215_v57 = vshll.u32 %v1840_v23, 16  ;;  %v2219_v43 = vshrl.u32 %v1840_v23, 16  ;;  %v5243_v27 = vshrl.u32 %v5047_v36, 16  ;;  %v1841_v23 = vld [vmem:[#allocation2 + $0x13c] sm:$0x1] }
 0x2b3   : > { %v8432_v8 = vpop.f32.mrf.mxu1  ;;  %v5246_v59 = vshll.u32 %v5047_v36, 16 }
 0x2b4   : > { %9266 = vst [vmem:[#allocation108_spill] sm:$0xff] %v8432_v8  ;;  %v2221_v44 = vrot.slane %v2219_v43, 4  ;;  %v5245_v36 = vrot.slane %v5243_v27, 4 }
 0x2b5   : > { %v2389_v46 = vpop.f32.mrf.mxu3 }
 0x2b6   : > { %v8427_v2 = vadd.f32 %v2389_v46, %v1771_v12  ;;  %v1772_v12 = vadd.f32 %v7787_v60, %v1490_v62  ;;  %v2199_v46 = vrot.slane %v2198_v48, 4  ;;  %v2194_v60 = vsel %vm7678_vm11, %v2189_v35, %v2193_v30 }
 0x2b7   : > { %v5241_v62 = vsel %vm7678_vm11, %v5236_v0, %v5240_v25  ;;  %v5487_v30 = vunpack.c.l.b16 %v5231_v29  ;;  %v1773_v0 = vadd.f32 %v7808_v24, %v1491_v33  ;;  %v2274_v48 = vunpack.c.l.b16 %v2194_v60 }
 0x2b8   : > { %v2204_v18 = vsel %vm7678_vm11, %v2199_v46, %v2203_v37  ;;  %v8451_v37 = vrot.slane %v5252_v32, 5  ;;  %v2211_v35 = vrot.slane %v2209_v55, 5  ;;  %v2217_v46 = vrot.slane %v2215_v57, 5  ;;  %v8461_v57 = vpop.f32.mrf.mxu0 }
 0x2b9   : > { %v2275_v47 = vunpack.c.l.b16 %v2204_v18  ;;  %v1492_v29 = vadd.f32 %v8423_v31, %v7806_v39  ;;  %v5248_v32 = vrot.slane %v5246_v59, 5  ;;  %v2225_v55 = vshll.u32 %v1841_v23, 16 }
 0x2ba   : > { %2431 = vmatmul.bf16.gmra.mxu3 %v2291_v15  ;;  %v5488_v15 = vunpack.c.l.b16 %v5241_v62 }
 0x2bb   : > { %5620 = vmatmul.bf16.gmra.mxu1 %v5512_v61  ;;  %4978 = vmatmul.bf16.gmra.mxu0 %v6811_v58  ;;  %v6842_v61 = vld [vmem:[%s9083_s7 + $0x20] sm:$0xff]  ;;  %v5258_v58 = vrot.slane %v5256_v52, 4  ;;  %v8458_v62 = vpop.f32.mrf.mxu1  ;;  %v2292_v24 = vpack.c.b16 %v2275_v47, %v2274_v48  ;;  %v6812_v52 = vld [vmem:[#allocation2 + $0x148] sm:$0xff]  ;;  %v1774_v39 = vadd.f32 %v7829_v54, %v1492_v29  ;;  %v5249_v43 = vor.u32 %v5248_v32, %v5245_v36  ;;  %v4096_v29 = vld [vmem:[#allocation2 + $0x34] sm:$0xf] }
 0x2bc   : > { %5823 = vmatpush.bf16.msra.mxu2 %v6842_v61  ;;  %9267 = vst [vmem:[#allocation109_spill] sm:$0xff] %v8458_v62  ;;  %v5513_v33 = vpack.c.b16 %v5488_v15, %v5487_v30  ;;  %v2227_v47 = vrot.slane %v2225_v55, 5  ;;  %v4157_v55 = vshrl.u32 %v4096_v29, 16  ;;  %v9273_v62 = vld [vmem:[#allocation31_spill] sm:$0xff] }
 0x2bd   : > { %v2392_v53 = vpop.f32.mrf.mxu3  ;;  %v5259_v60 = vor.u32 %v5258_v58, %v8451_v37  ;;  %v5250_v23 = vrot.slane %v5249_v43, 4  ;;  %v9271_v43 = vld [vmem:[#allocation33_spill] sm:$0xff]  ;;  %v1494_v8 = vadd.f32 %v8423_v31, %v9273_v62 }
 0x2be   : > { %v8434_v5 = vadd.f32 %v2392_v53, %v1772_v12  ;;  %v2208_v12 = vrot.slane %v2206_v3, 4  ;;  %v5049_v53 = vld [vmem:[#allocation2 + $0xc4] sm:$0x1]  ;;  %v2222_v3 = vor.u32 %v2221_v44, %v2217_v46  ;;  %v9269_v44 = vld [vmem:[#allocation29_spill] sm:$0xff]  ;;  %v4159_v13 = vrot.slane %v4157_v55, 7 }
 0x2bf   : > { %v5262_v18 = vshll.u32 %v5049_v53, 16  ;;  %v5260_v27 = vrot.slane %v5259_v60, 4  ;;  %v1493_v53 = vadd.f32 %v8423_v31, %v9269_v44 }
 0x2c0   : > { %v2212_v61 = vor.u32 %v2211_v35, %v2208_v12  ;;  %v2223_v15 = vrot.slane %v2222_v3, 4  ;;  %v4095_v12 = vld [vmem:[#allocation2 + $0x30] sm:$0xf] }
 0x2c1   : > { %v5264_v59 = vrot.slane %v5262_v18, 5 }
 0x2c2   : > { %v2213_v30 = vrot.slane %v2212_v61, 4  ;;  %v5255_v61 = vsel %vm7678_vm11, %v5250_v23, %v8451_v37 }
 0x2c3   : > { %v5265_v54 = vsel %vm7678_vm11, %v5260_v27, %v5264_v59  ;;  %v8474_v18 = vpop.f32.mrf.mxu1  ;;  %v1775_v27 = vadd.f32 %v9271_v43, %v1493_v53  ;;  %v5489_v44 = vunpack.c.l.b16 %v5255_v61  ;;  %v9275_v61 = vld [vmem:[#allocation36_spill] sm:$0xff] }
 0x2c4   : > { %v2218_v32 = vsel %vm7678_vm11, %v2213_v30, %v2217_v46  ;;  %9270 = vst [vmem:[#allocation29_spill] sm:$0xff] %v8474_v18  ;;  %v5490_v3 = vunpack.c.l.b16 %v5265_v54  ;;  %v4094_v46 = vld [vmem:[#allocation2 + $0x2c] sm:$0x8]  ;;  %v5052_v18 = vld [vmem:[#allocation2 + $0xd8] sm:$0x1] }
 0x2c5   : > { %v2394_v25 = vpop.f32.mrf.mxu3  ;;  %v2276_v59 = vunpack.c.l.b16 %v2218_v32  ;;  %v4143_v37 = vshrl.u32 %v4094_v46, 16  ;;  %v4151_v32 = vshll.u32 %v4095_v12, 16  ;;  %v5286_v43 = vshll.u32 %v5052_v18, 16 }
 0x2c6   : > { %v8454_v11 = vadd.f32 %v2394_v25, %v1773_v0  ;;  %v5050_v0 = vld [vmem:[#allocation2 + $0xd0] sm:$0xf]  ;;  %v5051_v25 = vld [vmem:[#allocation2 + $0xd4] sm:$0xf] }
 0x2c7   : > { %v5267_v35 = vshrl.u32 %v5050_v0, 16  ;;  %v5270_v36 = vshll.u32 %v5050_v0, 16  ;;  %v5280_v60 = vshrl.u32 %v5051_v25, 16 }
 0x2ca   : > { %2436 = vmatmul.bf16.gmra.mxu3 %v2292_v24  ;;  %v2228_v24 = vsel %vm7678_vm11, %v2223_v15, %v2227_v47  ;;  %v5282_v47 = vrot.slane %v5280_v60, 4 }
 0x2cb   : > { %5625 = vmatmul.bf16.gmra.mxu1 %v5513_v33  ;;  %4983 = vmatmul.bf16.gmra.mxu0 %v6812_v52  ;;  %v5276_v33 = vshll.u32 %v5051_v25, 16  ;;  %v4148_v52 = vshrl.u32 %v4095_v12, 16  ;;  %v2277_v0 = vunpack.c.l.b16 %v2228_v24  ;;  %v5054_v12 = vld [vmem:[#allocation2 + $0xe8] sm:$0xf] }
 0x2cd   : > { %v2397_v48 = vpop.f32.mrf.mxu3  ;;  %v5278_v15 = vrot.slane %v5276_v33, 5  ;;  %v4150_v23 = vrot.slane %v4148_v52, 7  ;;  %v2293_v54 = vpack.c.b16 %v2277_v0, %v2276_v59  ;;  %v6457_v33 = vrot.slane %v4143_v37, 11  ;;  %v5053_v37 = vld [vmem:[#allocation2 + $0xe4] sm:$0xf]  ;;  %v9359_v0 = vld [vmem:[#allocation57_spill] sm:$0xff] }
 0x2ce   : > { %v8464_v58 = vadd.f32 %v2397_v48, %v1774_v39  ;;  %v5269_v39 = vrot.slane %v5267_v35, 4  ;;  %v5272_v48 = vrot.slane %v5270_v36, 5  ;;  %v5514_v35 = vpack.c.b16 %v5490_v3, %v5489_v44 }
 0x2cf   : > { %v5283_v24 = vor.u32 %v5282_v47, %v5278_v15  ;;  %v4160_v36 = vshll.u32 %v4096_v29, 16  ;;  %v4153_v60 = vor.u32 %v4151_v32, %v4150_v23  ;;  %v4155_v26 = vrot.slane %v4150_v23, 4  ;;  %v6841_v47 = vld [vmem:[%s9083_s7 + $0x18] sm:$0xff] }
 0x2d0   : > { %9268 = vst [vmem:[#allocation110_spill] sm:$0xff] %v8464_v58  ;;  %v5273_v53 = vor.u32 %v5272_v48, %v5269_v39  ;;  %v5288_v3 = vrot.slane %v5286_v43, 5  ;;  %v9277_v39 = vld [vmem:[#allocation34_spill] sm:$0xff]  ;;  %v5300_v23 = vshll.u32 %v5054_v12, 16  ;;  %5824 = vmatpush.bf16.msra.mxu2 %v6841_v47  ;;  %v9279_v43 = vld [vmem:[#allocation40_spill] sm:$0xff] }
 0x2d1   : > { %v4162_v62 = vor.u32 %v4160_v36, %v4159_v13  ;;  %v5284_v59 = vrot.slane %v5283_v24, 4  ;;  %v1495_v18 = vadd.f32 %v8423_v31, %v9277_v39  ;;  %v4154_v29 = vsel %vm7284_vm6, %v6457_v33, %v4153_v60  ;;  %v4099_v13 = vld [vmem:[#allocation2 + $0x48] sm:$0xf]  ;;  %v4098_v24 = vld [vmem:[#allocation2 + $0x44] sm:$0xf] }
 0x2d2   : > { %v5274_v46 = vrot.slane %v5273_v53, 4  ;;  %v5291_v33 = vshrl.u32 %v5053_v37, 16  ;;  %v5294_v60 = vshll.u32 %v5053_v37, 16  ;;  %v5066_v58 = vld [vmem:[#allocation2 + $0x138] sm:$0xf] }
 0x2d3   : > { %v4163_v48 = vsel %vm7284_vm6, %v4155_v26, %v4162_v62  ;;  %v5289_v44 = vsel %vm7678_vm11, %v5284_v59, %v5288_v3  ;;  %v4179_v26 = vshrl.u32 %v4099_v13, 16  ;;  %v1777_v36 = vadd.f32 %v9279_v43, %v1495_v18  ;;  %v5055_v3 = vld [vmem:[#allocation2 + $0xec] sm:$0x1] }
 0x2d4   : > { %v4512_v53 = vunpack.c.l.b16 %v4163_v48  ;;  %v4170_v59 = vshrl.u32 %v4098_v24, 16  ;;  %v5293_v18 = vrot.slane %v5291_v33, 4  ;;  %v5310_v37 = vshll.u32 %v5055_v3, 16 }
 0x2d5   : > { %v2399_v30 = vpop.f32.mrf.mxu3  ;;  %v4181_v47 = vrot.slane %v4179_v26, 7 }
 0x2d6   : > { %v8480_v25 = vadd.f32 %v2399_v30, %v1775_v27  ;;  %v8484_v27 = vpop.f32.mrf.mxu1  ;;  %v1776_v30 = vadd.f32 %v9275_v61, %v1494_v8  ;;  %v5279_v8 = vsel %vm7678_vm11, %v5274_v46, %v5278_v15  ;;  %v5492_v15 = vunpack.c.l.b16 %v5289_v44 }
 0x2d7   : > { %9274 = vst [vmem:[#allocation31_spill] sm:$0xff] %v8484_v27  ;;  %v5491_v32 = vunpack.c.l.b16 %v5279_v8  ;;  %v4097_v8 = vld [vmem:[#allocation2 + $0x40] sm:$0x8]  ;;  %v5296_v44 = vrot.slane %v5294_v60, 5 }
 0x2d8   : > { %9272 = vst [vmem:[#allocation33_spill] sm:$0xff] %v8480_v25 }
 0x2d9   : > { %v5515_v48 = vpack.c.b16 %v5492_v15, %v5491_v32  ;;  %v5297_v9 = vor.u32 %v5296_v44, %v5293_v18  ;;  %v5057_v15 = vld [vmem:[#allocation2 + $0xfc] sm:$0xf] }
 0x2da   : > { %2441 = vmatmul.bf16.gmra.mxu3 %v2293_v54  ;;  %v5304_v54 = vshrl.u32 %v5054_v12, 16  ;;  %v9282_v12 = vld [vmem:[#allocation37_spill] sm:$0xff]  ;;  %v5328_v18 = vshrl.u32 %v5057_v15, 16 }
 0x2db   : > { %5630 = vmatmul.bf16.gmra.mxu1 %v5514_v35  ;;  %v4511_v35 = vunpack.c.l.b16 %v4154_v29  ;;  %v1496_v39 = vadd.f32 %v8423_v31, %v9282_v12 }
 0x2dc   : > { %v5306_v62 = vrot.slane %v5304_v54, 4  ;;  %v4182_v54 = vshll.u32 %v4099_v13, 16 }
 0x2dd   : > { %v2402_v52 = vpop.f32.mrf.mxu3  ;;  %v4543_v29 = vpack.c.b16 %v4512_v53, %v4511_v35  ;;  %v5312_v35 = vrot.slane %v5310_v37, 5  ;;  %v5056_v53 = vld [vmem:[#allocation2 + $0xf8] sm:$0xf] }
 0x2de   : > { %v8487_v55 = vadd.f32 %v2402_v52, %v1776_v30  ;;  %v5302_v30 = vrot.slane %v5300_v23, 5  ;;  %v8503_v46 = vpop.f32.mrf.mxu1  ;;  %v4172_v23 = vrot.slane %v4170_v59, 7  ;;  %v4184_v27 = vor.u32 %v4182_v54, %v4181_v47 }
 0x2df   : > { %9280 = vst [vmem:[#allocation34_spill] sm:$0xff] %v8503_v46  ;;  %v4165_v46 = vshrl.u32 %v4097_v8, 16  ;;  %v5318_v8 = vshll.u32 %v5056_v53, 16  ;;  %v5324_v47 = vshll.u32 %v5057_v15, 16 }
 0x2e0   : > { %9276 = vst [vmem:[#allocation36_spill] sm:$0xff] %v8487_v55  ;;  %v5307_v43 = vor.u32 %v5306_v62, %v5302_v30  ;;  %v4173_v55 = vshll.u32 %v4098_v24, 16  ;;  %v4177_v26 = vrot.slane %v4172_v23, 4  ;;  %v9285_v62 = vld [vmem:[#allocation39_spill] sm:$0xff]  ;;  %v5315_v24 = vshrl.u32 %v5056_v53, 16 }
 0x2e1   : > { %v6458_v33 = vrot.slane %v4165_v46, 11  ;;  %v1497_v59 = vadd.f32 %v8423_v31, %v9285_v62  ;;  %v5330_v53 = vrot.slane %v5328_v18, 4 }
 0x2e2   : > { %v5308_v12 = vrot.slane %v5307_v43, 4  ;;  %v4175_v60 = vor.u32 %v4173_v55, %v4172_v23  ;;  %v4185_v3 = vsel %vm7284_vm6, %v4177_v26, %v4184_v27  ;;  %v9287_v43 = vld [vmem:[#allocation46_spill] sm:$0xff]  ;;  %v4100_v23 = vld [vmem:[#allocation2 + $0x54] sm:$0x8] }
 0x2e3   : > { %v1779_v37 = vadd.f32 %v9287_v43, %v1497_v59  ;;  %v4514_v27 = vunpack.c.l.b16 %v4185_v3 }
 0x2e4   : > { %v4176_v55 = vsel %vm7284_vm6, %v6458_v33, %v4175_v60  ;;  %v5058_v33 = vld [vmem:[#allocation2 + $0x100] sm:$0x1] }
 0x2e5   : > { %v2404_v61 = vpop.f32.mrf.mxu3  ;;  %v4513_v15 = vunpack.c.l.b16 %v4176_v55  ;;  %v9289_v60 = vld [vmem:[#allocation42_spill] sm:$0xff]  ;;  %v5334_v25 = vshll.u32 %v5058_v33, 16  ;;  %v9291_v55 = vld [vmem:[#allocation49_spill] sm:$0xff] }
 0x2e6   : > { %v8505_v52 = vadd.f32 %v2404_v61, %v1777_v36  ;;  %v9283_v36 = vld [vmem:[#allocation43_spill] sm:$0xff]  ;;  %v8514_v13 = vpop.f32.mrf.mxu1 }
 0x2e7   : > { %v1778_v61 = vadd.f32 %v9283_v36, %v1496_v39  ;;  %9286 = vst [vmem:[#allocation37_spill] sm:$0xff] %v8514_v13  ;;  %v5298_v39 = vrot.slane %v5297_v9, 4  ;;  %v4544_v13 = vpack.c.b16 %v4514_v27, %v4513_v15  ;;  %v4105_v15 = vld [vmem:[#allocation2 + $0x70] sm:$0xf] }
 0x2e8   : > { %9281 = vst [vmem:[#allocation13_spill] sm:$0xff] %v8505_v52 }
 0x2e9   : > { %v5303_v46 = vsel %vm7678_vm11, %v5298_v39, %v5302_v30  ;;  %v1498_v30 = vadd.f32 %v8423_v31, %v9289_v60  ;;  %v4187_v39 = vshrl.u32 %v4100_v23, 16 }
 0x2ea   : > { %4631 = vmatmul.bf16.vlgmr.msra.gmra.mxu3 %v4543_v29  ;;  %v4101_v29 = vld [vmem:[#allocation2 + $0x58] sm:$0xf]  ;;  %v5493_v62 = vunpack.c.l.b16 %v5303_v46 }
 0x2eb   : > { %5635 = vmatmul.bf16.gmra.mxu1 %v5515_v48  ;;  %v5313_v48 = vsel %vm7678_vm11, %v5308_v12, %v5312_v35  ;;  %v4192_v44 = vshrl.u32 %v4101_v29, 16  ;;  %v5320_v12 = vrot.slane %v5318_v8, 5  ;;  %v5326_v35 = vrot.slane %v5324_v47, 5 }
 0x2ec   : > { %v5494_v9 = vunpack.c.l.b16 %v5313_v48  ;;  %v4195_v8 = vshll.u32 %v4101_v29, 16  ;;  %v6459_v18 = vrot.slane %v4187_v39, 11  ;;  %v1780_v46 = vadd.f32 %v9291_v55, %v1498_v30  ;;  %v5059_v39 = vld [vmem:[#allocation2 + $0x10c] sm:$0xf] }
 0x2ed   : > { %v2407_v52 = vpop.f32.mrf.mxu3  ;;  %v4194_v3 = vrot.slane %v4192_v44, 7  ;;  %v5336_v44 = vrot.slane %v5334_v25, 5 }
 0x2ee   : > { %v8510_v32 = vadd.f32 %v2407_v52, %v1778_v61  ;;  %v4102_v52 = vld [vmem:[#allocation2 + $0x5c] sm:$0xf]  ;;  %v5317_v61 = vrot.slane %v5315_v24, 4  ;;  %v5516_v59 = vpack.c.b16 %v5494_v9, %v5493_v62  ;;  %v8529_v24 = vpop.f32.mrf.mxu1  ;;  %v6840_v62 = vld [vmem:[%s9083_s7 + $0x10] sm:$0xff] }
 0x2ef   : > { %v4201_v54 = vshrl.u32 %v4102_v52, 16  ;;  %9290 = vst [vmem:[#allocation39_spill] sm:$0xff] %v8529_v24  ;;  %v4204_v47 = vshll.u32 %v4102_v52, 16  ;;  %v4104_v52 = vld [vmem:[#allocation2 + $0x6c] sm:$0xf]  ;;  %5825 = vmatpush.bf16.msra.mxu2 %v6840_v62 }
 0x2f0   : > { %9284 = vst [vmem:[#allocation40_spill] sm:$0xff] %v8510_v32  ;;  %v5321_v43 = vor.u32 %v5320_v12, %v5317_v61  ;;  %v5331_v32 = vor.u32 %v5330_v53, %v5326_v35  ;;  %v5060_v61 = vld [vmem:[#allocation2 + $0x110] sm:$0xf]  ;;  %v9293_v12 = vld [vmem:[#allocation45_spill] sm:$0xff] }
 0x2f1   : > { %v4203_v48 = vrot.slane %v4201_v54, 7  ;;  %v1499_v53 = vadd.f32 %v8423_v31, %v9293_v12  ;;  %v5348_v33 = vshll.u32 %v5060_v61, 16  ;;  %v5352_v30 = vshrl.u32 %v5060_v61, 16  ;;  %v4103_v12 = vld [vmem:[#allocation2 + $0x68] sm:$0x8] }
 0x2f2   : > { %v5322_v27 = vrot.slane %v5321_v43, 4  ;;  %v5332_v9 = vrot.slane %v5331_v32, 4 }
 0x2f3   : > { %v4206_v60 = vor.u32 %v4204_v47, %v4203_v48  ;;  %v4223_v48 = vshrl.u32 %v4105_v15, 16 }
 0x2f4   : > { %v5327_v25 = vsel %vm7678_vm11, %v5322_v27, %v5326_v35  ;;  %v5337_v32 = vsel %vm7678_vm11, %v5332_v9, %v5336_v44  ;;  %v5342_v35 = vshll.u32 %v5059_v39, 16  ;;  %v5061_v9 = vld [vmem:[#allocation2 + $0x114] sm:$0x1] }
 0x2f5   : > { %v2409_v36 = vpop.f32.mrf.mxu3  ;;  %v5495_v55 = vunpack.c.l.b16 %v5327_v25  ;;  %v9297_v44 = vld [vmem:[#allocation48_spill] sm:$0xff] }
 0x2f6   : > { %v8525_v26 = vadd.f32 %v2409_v36, %v1779_v37  ;;  %v4197_v37 = vor.u32 %v4195_v8, %v4194_v3  ;;  %v4199_v36 = vrot.slane %v4194_v3, 4  ;;  %v4214_v3 = vshrl.u32 %v4104_v52, 16  ;;  %v8547_v43 = vpop.f32.mrf.mxu1  ;;  %v9295_v8 = vld [vmem:[#allocation53_spill] sm:$0xff] }
 0x2f7   : > { %9294 = vst [vmem:[#allocation42_spill] sm:$0xff] %v8547_v43  ;;  %v1781_v47 = vadd.f32 %v9295_v8, %v1499_v53  ;;  %v1500_v61 = vadd.f32 %v8423_v31, %v9297_v44  ;;  %v4226_v53 = vshll.u32 %v4105_v15, 16  ;;  %v5344_v25 = vrot.slane %v5342_v35, 5 }
 0x2f8   : > { %9288 = vst [vmem:[#allocation43_spill] sm:$0xff] %v8525_v26  ;;  %v4207_v29 = vsel %vm7284_vm6, %v4199_v36, %v4206_v60  ;;  %v5339_v36 = vshrl.u32 %v5059_v39, 16  ;;  %v5350_v60 = vrot.slane %v5348_v33, 5  ;;  %v4216_v24 = vrot.slane %v4214_v3, 7  ;;  %v9298_v39 = vld [vmem:[#allocation56_spill] sm:$0xff] }
 0x2f9   : > { %v5358_v8 = vshll.u32 %v5061_v9, 16  ;;  %v4209_v33 = vshrl.u32 %v4103_v12, 16 }
 0x2fa   : > { %4636 = vmatmul.bf16.gmra.mxu3 %v4544_v13  ;;  %v4198_v13 = vsel %vm7284_vm6, %v6459_v18, %v4197_v37  ;;  %v4516_v18 = vunpack.c.l.b16 %v4207_v29  ;;  %v5341_v29 = vrot.slane %v5339_v36, 4  ;;  %v4221_v44 = vrot.slane %v4216_v24, 4  ;;  %v4107_v36 = vld [vmem:[#allocation2 + $0x80] sm:$0xf] }
 0x2fb   : > { %5640 = vmatmul.bf16.gmra.mxu1 %v5516_v59  ;;  %v4515_v59 = vunpack.c.l.b16 %v4198_v13  ;;  %v4225_v13 = vrot.slane %v4223_v48, 7 }
 0x2fc   : > { %v5345_v26 = vor.u32 %v5344_v25, %v5341_v29  ;;  %v4236_v29 = vshrl.u32 %v4107_v36, 16 }
 0x2fd   : > { %v2412_v23 = vpop.f32.mrf.mxu3  ;;  %v4545_v62 = vpack.c.b16 %v4516_v18, %v4515_v59  ;;  %v5360_v59 = vrot.slane %v5358_v8, 5  ;;  %v5063_v18 = vld [vmem:[#allocation2 + $0x124] sm:$0xf] }
 0x2fe   : > { %v8532_v54 = vadd.f32 %v2412_v23, %v1780_v46  ;;  %v5496_v46 = vunpack.c.l.b16 %v5337_v32  ;;  %v5354_v23 = vrot.slane %v5352_v30, 4  ;;  %v4228_v30 = vor.u32 %v4226_v53, %v4225_v13  ;;  %v8555_v3 = vpop.f32.mrf.mxu1 }
 0x2ff   : > { %9299 = vst [vmem:[#allocation45_spill] sm:$0xff] %v8555_v3  ;;  %v5372_v12 = vshll.u32 %v5063_v18, 16  ;;  %v5376_v13 = vshrl.u32 %v5063_v18, 16 }
 0x300   : > { %9292 = vst [vmem:[#allocation46_spill] sm:$0xff] %v8532_v54  ;;  %v5517_v43 = vpack.c.b16 %v5496_v46, %v5495_v55  ;;  %v5355_v32 = vor.u32 %v5354_v23, %v5350_v60  ;;  %v6460_v55 = vrot.slane %v4209_v33, 11 }
 0x302   : > { %v5356_v48 = vrot.slane %v5355_v32, 4  ;;  %v4106_v32 = vld [vmem:[#allocation2 + $0x7c] sm:$0x8] }
 0x304   : > { %v5361_v53 = vsel %vm7678_vm11, %v5356_v48, %v5360_v59  ;;  %v5064_v59 = vld [vmem:[#allocation2 + $0x128] sm:$0x1] }
 0x305   : > { %v2414_v37 = vpop.f32.mrf.mxu3 }
 0x306   : > { %v8550_v27 = vadd.f32 %v2414_v37, %v1781_v47  ;;  %v1782_v47 = vadd.f32 %v9298_v39, %v1500_v61  ;;  %v4217_v37 = vshll.u32 %v4104_v52, 16  ;;  %v9301_v52 = vld [vmem:[#allocation50_spill] sm:$0xff]  ;;  %v9302_v39 = vld [vmem:[#allocation59_spill] sm:$0xff]  ;;  %v8576_v3 = vpop.f32.mrf.mxu1 }
 0x307   : > { %v1501_v9 = vadd.f32 %v8423_v31, %v9301_v52  ;;  %v4108_v61 = vld [vmem:[#allocation2 + $0x84] sm:$0xf]  ;;  %v9304_v52 = vld [vmem:[#allocation52_spill] sm:$0xff] }
 0x308   : > { %9296 = vst [vmem:[#allocation49_spill] sm:$0xff] %v8550_v27  ;;  %v5062_v27 = vld [vmem:[#allocation2 + $0x120] sm:$0xf]  ;;  %v4219_v46 = vor.u32 %v4217_v37, %v4216_v24  ;;  %v5374_v37 = vrot.slane %v5372_v12, 5  ;;  %v5382_v12 = vshll.u32 %v5064_v59, 16 }
 0x309   : > { %v5363_v35 = vshrl.u32 %v5062_v27, 16  ;;  %v5366_v23 = vshll.u32 %v5062_v27, 16  ;;  %v4245_v27 = vshrl.u32 %v4108_v61, 16 }
 0x30a   : > { %4641 = vmatmul.bf16.gmra.mxu3 %v4545_v62  ;;  %v5346_v62 = vrot.slane %v5345_v26, 4  ;;  %v5498_v26 = vunpack.c.l.b16 %v5361_v53 }
 0x30b   : > { %5645 = vmatmul.bf16.gmra.mxu1 %v5517_v43  ;;  %v4229_v43 = vsel %vm7284_vm6, %v4221_v44, %v4228_v30  ;;  %v5365_v8 = vrot.slane %v5363_v35, 4  ;;  %v5368_v33 = vrot.slane %v5366_v23, 5  ;;  %v8569_v30 = vpop.f32.mrf.mxu2  ;;  %v5378_v44 = vrot.slane %v5376_v13, 4 }
 0x30c   : > { %v4518_v24 = vunpack.c.l.b16 %v4229_v43  ;;  %v5351_v25 = vsel %vm7678_vm11, %v5346_v62, %v5350_v60  ;;  %v4231_v43 = vshrl.u32 %v4106_v32, 16  ;;  %v1502_v60 = vadd.f32 %v8423_v31, %v9304_v52 }
 0x30d   : > { %v2417_v54 = vpop.f32.mrf.mxu3  ;;  %v4238_v62 = vrot.slane %v4236_v29, 7  ;;  %v4247_v35 = vrot.slane %v4245_v27, 7  ;;  %v5369_v23 = vor.u32 %v5368_v33, %v5365_v8  ;;  %v5379_v53 = vor.u32 %v5378_v44, %v5374_v37  ;;  %v5065_v8 = vld [vmem:[#allocation2 + $0x134] sm:$0xf] }
 0x30e   : > { %v8557_v15 = vadd.f32 %v2417_v54, %v1782_v47  ;;  %v4220_v54 = vsel %vm7284_vm6, %v6460_v55, %v4219_v46  ;;  %v1783_v47 = vadd.f32 %v9302_v39, %v1501_v9  ;;  %v5497_v46 = vunpack.c.l.b16 %v5351_v25 }
 0x30f   : > { %v4517_v55 = vunpack.c.l.b16 %v4220_v54  ;;  %v4239_v13 = vshll.u32 %v4107_v36, 16  ;;  %v4248_v39 = vshll.u32 %v4108_v61, 16  ;;  %v4243_v25 = vrot.slane %v4238_v62, 4 }
 0x310   : > { %9300 = vst [vmem:[#allocation53_spill] sm:$0xff] %v8557_v15  ;;  %v5518_v9 = vpack.c.b16 %v5498_v26, %v5497_v46  ;;  %v5380_v29 = vrot.slane %v5379_v53, 4  ;;  %v5384_v27 = vrot.slane %v5382_v12, 5  ;;  %v4111_v46 = vld [vmem:[#allocation2 + $0x98] sm:$0xf] }
 0x311   : > { %v4546_v15 = vpack.c.b16 %v4518_v24, %v4517_v55  ;;  %v4241_v54 = vor.u32 %v4239_v13, %v4238_v62  ;;  %v4250_v32 = vor.u32 %v4248_v39, %v4247_v35  ;;  %v9306_v24 = vld [vmem:[#allocation55_spill] sm:$0xff]  ;;  %v8596_v35 = vpop.f32.mrf.mxu1  ;;  %v4267_v13 = vshrl.u32 %v4111_v46, 16 }
 0x312   : > { %v1503_v26 = vadd.f32 %v8423_v31, %v9306_v24  ;;  %v5385_v55 = vsel %vm7678_vm11, %v5380_v29, %v5384_v27  ;;  %v5396_v31 = vshll.u32 %v5066_v58, 16  ;;  %v6839_v62 = vld [vmem:[%s9083_s7 + $0x8] sm:$0xff] }
 0x313   : > { %v8581_v44 = vpop.f32.mrf.mxu2  ;;  %v4251_v61 = vsel %vm7284_vm6, %v4243_v25, %v4250_v32  ;;  %5826 = vmatpush.bf16.msra.mxu2 %v6839_v62  ;;  %v5500_v12 = vunpack.c.l.b16 %v5385_v55 }
 0x314   : > { %v5398_v32 = vrot.slane %v5396_v31, 5 }
 0x315   : > { %v2419_v48 = vpop.f32.mrf.mxu3 }
 0x316   : > { %v8572_v18 = vadd.f32 %v2419_v48, %v1783_v47  ;;  %v6461_v47 = vrot.slane %v4231_v43, 11  ;;  %v5370_v48 = vrot.slane %v5369_v23, 4  ;;  %v5390_v43 = vshll.u32 %v5065_v8, 16 }
 0x318   : > { %9303 = vst [vmem:[#allocation48_spill] sm:$0xff] %v8572_v18  ;;  %v9305_v18 = vld [vmem:[#allocation62_spill] sm:$0xff]  ;;  %v5375_v59 = vsel %vm7678_vm11, %v5370_v48, %v5374_v37  ;;  %v4110_v37 = vld [vmem:[#allocation2 + $0x94] sm:$0xf]  ;;  %v5392_v25 = vrot.slane %v5390_v43, 5 }
 0x319   : > { %v1784_v52 = vadd.f32 %v9305_v18, %v1502_v60  ;;  %v5387_v18 = vshrl.u32 %v5065_v8, 16  ;;  %v5400_v60 = vshrl.u32 %v5066_v58, 16  ;;  %v5499_v53 = vunpack.c.l.b16 %v5375_v59  ;;  %v8603_v31 = vpop.f32.mrf.mxu1 }
 0x31a   : > { %4646 = vmatmul.bf16.gmra.mxu3 %v4546_v15  ;;  %v4242_v15 = vsel %vm7284_vm6, %v6461_v47, %v4241_v54  ;;  %v9308_v47 = vld [vmem:[#allocation66_spill] sm:$0xff]  ;;  %v4258_v27 = vshrl.u32 %v4110_v37, 16 }
 0x31b   : > { %5650 = vmatmul.bf16.gmra.mxu1 %v5518_v9  ;;  %v4519_v23 = vunpack.c.l.b16 %v4242_v15  ;;  %v4520_v9 = vunpack.c.l.b16 %v4251_v61  ;;  %v5389_v39 = vrot.slane %v5387_v18, 4  ;;  %v1785_v54 = vadd.f32 %v9308_v47, %v1503_v26  ;;  %v8601_v24 = vpop.f32.mrf.mxu2  ;;  %v4109_v61 = vld [vmem:[#allocation2 + $0x90] sm:$0x8] }
 0x31c   : > { %v5402_v48 = vrot.slane %v5400_v60, 4  ;;  %9310 = vst [vmem:[#allocation59_spill] sm:$0xff] %v8601_v24  ;;  %v5519_v15 = vpack.c.b16 %v5500_v12, %v5499_v53  ;;  %v4260_v26 = vrot.slane %v4258_v27, 7  ;;  %v4270_v18 = vshll.u32 %v4111_v46, 16  ;;  %v5068_v12 = vld [vmem:[#allocation2 + $0x148] sm:$0xf] }
 0x31d   : > { %v2422_v33 = vpop.f32.mrf.mxu3  ;;  %v4547_v8 = vpack.c.b16 %v4520_v9, %v4519_v23  ;;  %v5393_v59 = vor.u32 %v5392_v25, %v5389_v39  ;;  %v4253_v43 = vshrl.u32 %v4109_v61, 16  ;;  %v4261_v9 = vshll.u32 %v4110_v37, 16  ;;  %v5069_v39 = vld [vmem:[#allocation2 + $0x14c] sm:$0xf] }
 0x31e   : > { %v8583_v36 = vadd.f32 %v2422_v33, %v1784_v52  ;;  %v5067_v52 = vld [vmem:[#allocation2 + $0x13c] sm:$0x1]  ;;  %v4269_v33 = vrot.slane %v4267_v13, 7  ;;  %v5403_v55 = vor.u32 %v5402_v48, %v5398_v32  ;;  %v4265_v53 = vrot.slane %v4260_v26, 4 }
 0x31f   : > { %v5406_v62 = vshll.u32 %v5067_v52, 16  ;;  %v5394_v47 = vrot.slane %v5393_v59, 4  ;;  %v6462_v25 = vrot.slane %v4253_v43, 11  ;;  %v4263_v48 = vor.u32 %v4261_v9, %v4260_v26 }
 0x320   : > { %9307 = vst [vmem:[#allocation56_spill] sm:$0xff] %v8583_v36  ;;  %v4272_v60 = vor.u32 %v4270_v18, %v4269_v33  ;;  %v4114_v33 = vld [vmem:[#allocation2 + $0xac] sm:$0xf]  ;;  %v5411_v37 = vshrl.u32 %v5068_v12, 16  ;;  %v5424_v61 = vshrl.u32 %v5069_v39, 16 }
 0x321   : > { %v5399_v52 = vsel %vm7678_vm11, %v5394_v47, %v5398_v32  ;;  %v4112_v47 = vld [vmem:[#allocation2 + $0xa4] sm:$0x8] }
 0x322   : > { %v4273_v46 = vsel %vm7284_vm6, %v4265_v53, %v4272_v60  ;;  %v5501_v18 = vunpack.c.l.b16 %v5399_v52  ;;  %v4289_v60 = vshrl.u32 %v4114_v33, 16  ;;  %v5426_v9 = vrot.slane %v5424_v61, 4  ;;  %v8618_v53 = vpop.f32.mrf.mxu1 }
 0x323   : > { %v8614_v59 = vpop.f32.mrf.mxu2  ;;  %v4522_v26 = vunpack.c.l.b16 %v4273_v46 }
 0x324   : > { %9312 = vst [vmem:[#allocation62_spill] sm:$0xff] %v8614_v59  ;;  %v4291_v52 = vrot.slane %v4289_v60, 7 }
 0x325   : > { %v2424_v58 = vpop.f32.mrf.mxu3 }
 0x326   : > { %v8599_v29 = vadd.f32 %v2424_v58, %v1785_v54  ;;  %v5404_v54 = vrot.slane %v5403_v55, 4  ;;  %v5408_v58 = vrot.slane %v5406_v62, 5  ;;  %v4264_v55 = vsel %vm7284_vm6, %v6462_v25, %v4263_v48 }
 0x327   : > { %v4275_v48 = vshrl.u32 %v4112_v47, 16 }
 0x328   : > { %9309 = vst [vmem:[#allocation50_spill] sm:$0xff] %v8599_v29  ;;  %v5409_v27 = vsel %vm7678_vm11, %v5404_v54, %v5408_v58 }
 0x329   : > { %v5502_v43 = vunpack.c.l.b16 %v5409_v27  ;;  %v6463_v61 = vrot.slane %v4275_v48, 11 }
 0x32a   : > { %4651 = vmatmul.bf16.gmra.mxu3 %v4547_v8  ;;  %v4113_v8 = vld [vmem:[#allocation2 + $0xa8] sm:$0xf] }
 0x32b   : > { %5655 = vmatmul.bf16.gmra.mxu1 %v5519_v15  ;;  %v5414_v15 = vshll.u32 %v5068_v12, 16  ;;  %v4280_v62 = vshrl.u32 %v4113_v8, 16  ;;  %v5520_v25 = vpack.c.b16 %v5502_v43, %v5501_v18  ;;  %v8628_v43 = vpop.f32.mrf.mxu1 }
 0x32d   : > { %v2427_v23 = vpop.f32.mrf.mxu3  ;;  %v5416_v54 = vrot.slane %v5414_v15, 5  ;;  %v4282_v46 = vrot.slane %v4280_v62, 7  ;;  %v4292_v15 = vshll.u32 %v4114_v33, 16 }
 0x32e   : > { %v8606_v13 = vadd.f32 %v2427_v23, %v8146_v41  ;;  %v5420_v41 = vshll.u32 %v5069_v39, 16  ;;  %v5413_v23 = vrot.slane %v5411_v37, 4  ;;  %v4521_v39 = vunpack.c.l.b16 %v4264_v55 }
 0x32f   : > { %v4283_v37 = vshll.u32 %v4113_v8, 16  ;;  %v4294_v55 = vor.u32 %v4292_v15, %v4291_v52 }
 0x330   : > { %9311 = vst [vmem:[#allocation52_spill] sm:$0xff] %v8606_v13  ;;  %v5422_v58 = vrot.slane %v5420_v41, 5  ;;  %v5070_v13 = vld [vmem:[#allocation2 + $0x150] sm:$0x1]  ;;  %v4548_v29 = vpack.c.b16 %v4522_v26, %v4521_v39  ;;  %v5417_v27 = vor.u32 %v5416_v54, %v5413_v23  ;;  %v8623_v41 = vpop.f32.mrf.mxu2  ;;  %v4116_v54 = vld [vmem:[#allocation2 + $0xbc] sm:$0xf] }
 0x331   : > { %v5430_v59 = vshll.u32 %v5070_v13, 16  ;;  %v4285_v24 = vor.u32 %v4283_v37, %v4282_v46  ;;  %v4302_v48 = vshrl.u32 %v4116_v54, 16 }
 0x332   : > { %v5427_v36 = vor.u32 %v5426_v9, %v5422_v58 }
 0x333   : > { %v5432_v18 = vrot.slane %v5430_v59, 5  ;;  %v4286_v13 = vsel %vm7284_vm6, %v6463_v61, %v4285_v24  ;;  %v4304_v15 = vrot.slane %v4302_v48, 7 }
 0x334   : > { %v5428_v26 = vrot.slane %v5427_v36, 4  ;;  %v4523_v59 = vunpack.c.l.b16 %v4286_v13 }
 0x335   : > { %v2429_v32 = vpop.f32.mrf.mxu3 }
 0x336   : > { %v8621_v12 = vadd.f32 %v2429_v32, %v8167_v49  ;;  %v4287_v49 = vrot.slane %v4282_v46, 4  ;;  %v5433_v36 = vsel %vm7678_vm11, %v5428_v26, %v5432_v18 }
 0x337   : > { %v5504_v23 = vunpack.c.l.b16 %v5433_v36  ;;  %v4120_v36 = vld [vmem:[#allocation2 + $0xd4] sm:$0xf] }
 0x338   : > { %9313 = vst [vmem:[#allocation55_spill] sm:$0xff] %v8621_v12  ;;  %v5418_v12 = vrot.slane %v5417_v27, 4  ;;  %v4295_v8 = vsel %vm7284_vm6, %v4287_v49, %v4294_v55  ;;  %v8646_v27 = vpop.f32.mrf.mxu1 }
 0x339   : > { %v4524_v60 = vunpack.c.l.b16 %v4295_v8 }
 0x33a   : > { %4656 = vmatmul.bf16.gmra.mxu3 %v4548_v29  ;;  %v6838_v29 = vld [vmem:[%s9083_s7] sm:$0xff]  ;;  %v5423_v33 = vsel %vm7678_vm11, %v5418_v12, %v5422_v58  ;;  %v4115_v12 = vld [vmem:[#allocation2 + $0xb8] sm:$0x8] }
 0x33b   : > { %5660 = vmatmul.bf16.gmra.mxu1 %v5520_v25  ;;  %5827 = vmatpush.bf16.msra.mxu2 %v6838_v29  ;;  %v5503_v47 = vunpack.c.l.b16 %v5423_v33  ;;  %v8641_v25 = vpop.f32.mrf.mxu2  ;;  %v4549_v46 = vpack.c.b16 %v4524_v60, %v4523_v59  ;;  %v4297_v37 = vshrl.u32 %v4115_v12, 16  ;;  %v4309_v29 = vrot.slane %v4304_v15, 4  ;;  %v4119_v33 = vld [vmem:[#allocation2 + $0xd0] sm:$0xf] }
 0x33d   : > { %v2432_v32 = vpop.f32.mrf.mxu3  ;;  %v5521_v58 = vpack.c.b16 %v5504_v23, %v5503_v47  ;;  %v4324_v47 = vshrl.u32 %v4119_v33, 16  ;;  %v4333_v23 = vshrl.u32 %v4120_v36, 16 }
 0x33e   : > { %v8626_v62 = vadd.f32 %v2432_v32, %v8183_v19  ;;  %v4117_v19 = vld [vmem:[#allocation2 + $0xc0] sm:$0xf]  ;;  %v4305_v32 = vshll.u32 %v4116_v54, 16 }
 0x33f   : > { %v4311_v39 = vshrl.u32 %v4117_v19, 16  ;;  %v4314_v61 = vshll.u32 %v4117_v19, 16 }
 0x340   : > { %v4307_v18 = vor.u32 %v4305_v32, %v4304_v15 }
 0x341   : > { %v4313_v52 = vrot.slane %v4311_v39, 7 }
 0x343   : > { %v4316_v55 = vor.u32 %v4314_v61, %v4313_v52  ;;  %v8651_v13 = vpop.f32.mrf.mxu2  ;;  %v4327_v52 = vshll.u32 %v4119_v33, 16 }
 0x345   : > { %v2434_v9 = vpop.f32.mrf.mxu3  ;;  %v4317_v8 = vsel %vm7284_vm6, %v4309_v29, %v4316_v55  ;;  %v7008_v29 = vld [vmem:[%s9082_s6] ss:$0 sm:$0xff] }
 0x346   : > { %v8644_v24 = vadd.f32 %v2434_v9, %v8205_v20  ;;  %v6464_v20 = vrot.slane %v4297_v37, 11  ;;  %v4526_v19 = vunpack.c.l.b16 %v4317_v8  ;;  %v4118_v9 = vld [vmem:[#allocation2 + $0xcc] sm:$0x8]  ;;  %v4336_v37 = vshll.u32 %v4120_v36, 16  ;;  %v4123_v36 = vld [vmem:[#allocation2 + $0xe8] sm:$0xf] }
 0x347   : > { %v4319_v48 = vshrl.u32 %v4118_v9, 16  ;;  %v9314_v8 = vld [vmem:[#allocation23_spill] sm:$0xff] }
 0x348   : > { %v4308_v59 = vsel %vm7284_vm6, %v6464_v20, %v4307_v18  ;;  %v1481_v33 = vadd.f32 %v7008_v29, %v9314_v8  ;;  %v9319_v29 = vld [vmem:[#allocation25_spill] sm:$0xff] }
 0x349   : > { %v4525_v54 = vunpack.c.l.b16 %v4308_v59  ;;  %v6465_v61 = vrot.slane %v4319_v48, 11 }
 0x34a   : > { %4661 = vmatmul.bf16.gmra.mxu3 %v4549_v46  ;;  %v4326_v46 = vrot.slane %v4324_v47, 7  ;;  %v4122_v47 = vld [vmem:[#allocation2 + $0xe4] sm:$0xf] }
 0x34b   : > { %5665 = vmatmul.bf16.gmra.mxu1 %v5521_v58  ;;  %v4550_v39 = vpack.c.b16 %v4526_v19, %v4525_v54  ;;  %v4335_v58 = vrot.slane %v4333_v23, 7  ;;  %v8660_v12 = vpop.f32.mrf.mxu2  ;;  %v4355_v23 = vshrl.u32 %v4123_v36, 16  ;;  %v9315_v54 = vld [vmem:[#allocation24_spill] sm:$0xff] }
 0x34c   : > { %v4331_v32 = vrot.slane %v4326_v46, 4  ;;  %v3097_v9 = vadd.f32 %v9315_v54, %v8280_v10  ;;  %v4349_v54 = vshll.u32 %v4122_v47, 16 }
 0x34d   : > { %v2437_v49 = vpop.f32.mrf.mxu3  ;;  %v4338_v55 = vor.u32 %v4336_v37, %v4335_v58  ;;  %v4346_v58 = vshrl.u32 %v4122_v47, 16  ;;  %v4126_v47 = vld [vmem:[#allocation2 + $0xfc] sm:$0xf] }
 0x34e   : > { %v8649_v26 = vadd.f32 %v2437_v49, %v8222_v34  ;;  %v4329_v49 = vor.u32 %v4327_v52, %v4326_v46 }
 0x34f   : > { %v4339_v18 = vsel %vm7284_vm6, %v4331_v32, %v4338_v55 }
 0x353   : > { %v8673_v59 = vpop.f32.mrf.mxu2 }
 0x355   : > { %v2439_v60 = vpop.f32.mrf.mxu3 }
 0x356   : > { %v8658_v34 = vadd.f32 %v2439_v60, %v8237_v28  ;;  %v4330_v28 = vsel %vm7284_vm6, %v6465_v61, %v4329_v49  ;;  %v4528_v60 = vunpack.c.l.b16 %v4339_v18  ;;  %v4357_v61 = vrot.slane %v4355_v23, 7  ;;  %v9318_v49 = vld [vmem:[#allocation58_spill] sm:$0xff] }
 0x357   : > { %v4527_v19 = vunpack.c.l.b16 %v4330_v28  ;;  %v3379_v32 = vadd.f32 %v9318_v49, %v3097_v9  ;;  %v4348_v28 = vrot.slane %v4346_v58, 7  ;;  %v4358_v18 = vshll.u32 %v4123_v36, 16  ;;  %v4125_v58 = vld [vmem:[#allocation2 + $0xf8] sm:$0xf] }
 0x359   : > { %v4551_v37 = vpack.c.b16 %v4528_v60, %v4527_v19  ;;  %v4351_v19 = vor.u32 %v4349_v54, %v4348_v28  ;;  %v4353_v60 = vrot.slane %v4348_v28, 4  ;;  %v4368_v28 = vshrl.u32 %v4125_v58, 16 }
 0x35a   : > { %4666 = vmatmul.bf16.gmra.mxu3 %v4550_v39  ;;  %v9316_v39 = vld [vmem:[#allocation22_spill] sm:$0xff] }
 0x35b   : > { %v1763_v48 = vadd.f32 %v9316_v39, %v1481_v33  ;;  %v4360_v33 = vor.u32 %v4358_v18, %v4357_v61  ;;  %v8684_v39 = vpop.f32.mrf.mxu2  ;;  %v9322_v61 = vld [vmem:[#allocation72_spill] sm:$0xff]  ;;  %v4377_v18 = vshrl.u32 %v4126_v47, 16 }
 0x35d   : > { %v2442_v15 = vpop.f32.mrf.mxu3  ;;  %v2448_v52 = vadd.f32 %v8294_v45, %v1763_v48  ;;  %v9321_v48 = vld [vmem:[#allocation61_spill] sm:$0xff]  ;;  %v4361_v36 = vsel %vm7284_vm6, %v4353_v60, %v4360_v33 }
 0x35e   : > { %v8663_v20 = vadd.f32 %v2442_v15, %v8245_v1  ;;  %v4121_v15 = vld [vmem:[#allocation2 + $0xe0] sm:$0x8] }
 0x35f   : > { %v4341_v55 = vshrl.u32 %v4121_v15, 16  ;;  %v3098_v8 = vadd.f32 %v9319_v29, %v2448_v52  ;;  %v9323_v29 = vld [vmem:[#allocation26_spill] sm:$0xff] }
 0x361   : > { %v6466_v45 = vrot.slane %v4341_v55, 11  ;;  %v3380_v9 = vadd.f32 %v9321_v48, %v3098_v8  ;;  %v3099_v8 = vadd.f32 %v9323_v29, %v8303_v7  ;;  %v4379_v48 = vrot.slane %v4377_v18, 7 }
 0x363   : > { %v4352_v52 = vsel %vm7284_vm6, %v6466_v45, %v4351_v19  ;;  %v4062_v49 = vadd.f32 %v9322_v61, %v3380_v9  ;;  %v8700_v33 = vpop.f32.mrf.mxu2 }
 0x364   : > { %v4529_v54 = vunpack.c.l.b16 %v4352_v52  ;;  %v4371_v52 = vshll.u32 %v4125_v58, 16 }
 0x365   : > { %v2444_v1 = vpop.f32.mrf.mxu3 }
 0x366   : > { %v8679_v46 = vadd.f32 %v2444_v1, %v8268_v40  ;;  %v9320_v40 = vld [vmem:[#allocation69_spill] sm:$0xff] }
 0x367   : > { %v4061_v1 = vadd.f32 %v9320_v40, %v3379_v32  ;;  %v4530_v32 = vunpack.c.l.b16 %v4361_v36  ;;  %v4124_v40 = vld [vmem:[#allocation2 + $0xf4] sm:$0x8]  ;;  %v9324_v36 = vld [vmem:[#allocation63_spill] sm:$0xff] }
 0x368   : > { %9317 = vst [vmem:[#allocation66_spill] sm:$0xff] %v8679_v46  ;;  %v8687_v46 = vpop.f32.mrf.mxu0  ;;  %v4363_v60 = vshrl.u32 %v4124_v40, 16  ;;  %v3381_v7 = vadd.f32 %v9324_v36, %v3099_v8  ;;  %v9326_v40 = vld [vmem:[#allocation75_spill] sm:$0xff]  ;;  %v9327_v8 = vld [vmem:[#allocation65_spill] sm:$0xff] }
 0x369   : > { %v4552_v19 = vpack.c.b16 %v4530_v32, %v4529_v54 }
 0x36a   : > { %4671 = vmatmul.bf16.gmra.mxu3 %v4551_v37  ;;  %v8690_v37 = vpop.f32.mrf.mxu1  ;;  %v6467_v29 = vrot.slane %v4363_v60, 11 }
 0x36d   : > { %v4632_v10 = vpop.f32.mrf.mxu3 }
 0x36e   : > { %v4712_v23 = vadd.f32 %v4632_v10, %v4061_v1 }
 0x370   : > { %v4994_v15 = vadd.f32 %v8362_v56, %v4712_v23  ;;  %v8704_v56 = vpop.f32.mrf.mxu0  ;;  %v4370_v23 = vrot.slane %v4368_v28, 7 }
 0x372   : > { %v5676_v1 = vadd.f32 %v8576_v3, %v4994_v15  ;;  %v8708_v61 = vpop.f32.mrf.mxu1  ;;  %v4375_v54 = vrot.slane %v4370_v23, 4 }
 0x374   : > { %v5708_v15 = vmax.f32 %v5676_v1, 0.0  ;;  %v4129_v1 = vld [vmem:[#allocation2 + $0x110] sm:$0xf] }
 0x375   : > { %v4634_v55 = vpop.f32.mrf.mxu3 }
 0x376   : > { %v4713_v10 = vadd.f32 %v4634_v55, %v4062_v49  ;;  %v4380_v49 = vshll.u32 %v4126_v47, 16  ;;  %v9325_v55 = vld [vmem:[#allocation27_spill] sm:$0xff]  ;;  %v8718_v47 = vpop.f32.mrf.mxu2 }
 0x377   : > { %v3100_v3 = vadd.f32 %v9325_v55, %v8329_v63 }
 0x378   : > { %v4995_v45 = vadd.f32 %v8382_v50, %v4713_v10  ;;  %v4373_v10 = vor.u32 %v4371_v52, %v4370_v23  ;;  %v4382_v28 = vor.u32 %v4380_v49, %v4379_v48  ;;  %v8720_v60 = vpop.f32.mrf.mxu0  ;;  %v9328_v48 = vld [vmem:[#allocation78_spill] sm:$0xff]  ;;  %v4128_v52 = vld [vmem:[#allocation2 + $0x10c] sm:$0xf] }
 0x37a   : > { %v5677_v9 = vadd.f32 %v8596_v35, %v4995_v45  ;;  %4676 = vmatmul.bf16.gmra.mxu3 %v4552_v19  ;;  %v4063_v35 = vadd.f32 %v9326_v40, %v3381_v7  ;;  %v3382_v19 = vadd.f32 %v9327_v8, %v3100_v3  ;;  %v4374_v58 = vsel %vm7284_vm6, %v6467_v29, %v4373_v10  ;;  %v8724_v49 = vpop.f32.mrf.mxu1 }
 0x37b   : > { %v4383_v63 = vsel %vm7284_vm6, %v4375_v54, %v4382_v28  ;;  %v4531_v36 = vunpack.c.l.b16 %v4374_v58  ;;  %v4399_v3 = vshrl.u32 %v4129_v1, 16  ;;  %v4390_v29 = vshrl.u32 %v4128_v52, 16 }
 0x37c   : > { %v5709_v50 = vmax.f32 %v5677_v9, 0.0  ;;  %v4064_v9 = vadd.f32 %v9328_v48, %v3382_v19  ;;  %v4532_v7 = vunpack.c.l.b16 %v4383_v63  ;;  %v4402_v58 = vshll.u32 %v4129_v1, 16 }
 0x37d   : > { %v4637_v32 = vpop.f32.mrf.mxu3  ;;  %v4392_v19 = vrot.slane %v4390_v29, 7  ;;  %v9332_v29 = vld [vmem:[#allocation71_spill] sm:$0xff] }
 0x37e   : > { %v5740_v18 = vpack.c.bf16 %v5709_v50, %v5708_v15  ;;  %v4714_v45 = vadd.f32 %v4637_v32, %v4063_v35  ;;  %v9329_v15 = vld [vmem:[#allocation28_spill] sm:$0xff]  ;;  %v4553_v28 = vpack.c.b16 %v4532_v7, %v4531_v36  ;;  %v8732_v63 = vpop.f32.mrf.mxu2  ;;  %v4393_v36 = vshll.u32 %v4128_v52, 16 }
 0x37f   : > { %v3101_v50 = vadd.f32 %v9329_v15, %v8341_v6  ;;  %v9330_v35 = vld [vmem:[#allocation68_spill] sm:$0xff]  ;;  %v9331_v6 = vld [vmem:[#allocation30_spill] sm:$0xff]  ;;  %v4397_v1 = vrot.slane %v4392_v19, 4 }
 0x380   : > { %5828 = vmatmul.bf16.vlgmr.msra.gmra.mxu2 %v5740_v18  ;;  %v4996_v23 = vadd.f32 %v8403_v51, %v4714_v45  ;;  %v4127_v51 = vld [vmem:[#allocation2 + $0x108] sm:$0x8]  ;;  %v4401_v18 = vrot.slane %v4399_v3, 7  ;;  %v3102_v48 = vadd.f32 %v9331_v6, %v8358_v38  ;;  %v9334_v6 = vld [vmem:[#allocation32_spill] sm:$0xff] }
 0x381   : > { %v3383_v45 = vadd.f32 %v9330_v35, %v3101_v50  ;;  %v4385_v8 = vshrl.u32 %v4127_v51, 16  ;;  %v4395_v50 = vor.u32 %v4393_v36, %v4392_v19  ;;  %v9333_v51 = vld [vmem:[#allocation83_spill] sm:$0xff] }
 0x382   : > { %v5678_v10 = vadd.f32 %v8603_v31, %v4996_v23  ;;  %v8736_v23 = vpop.f32.mrf.mxu0  ;;  %v4404_v7 = vor.u32 %v4402_v58, %v4401_v18  ;;  %v8739_v3 = vpop.f32.mrf.mxu1 }
 0x383   : > { %v6468_v15 = vrot.slane %v4385_v8, 11 }
 0x384   : > { %v4405_v38 = vsel %vm7284_vm6, %v4397_v1, %v4404_v7 }
 0x385   : > { %v4639_v55 = vpop.f32.mrf.mxu3  ;;  %v4396_v52 = vsel %vm7284_vm6, %v6468_v15, %v4395_v50 }
 0x386   : > { %v4715_v32 = vadd.f32 %v4639_v55, %v4064_v9  ;;  %v5710_v9 = vmax.f32 %v5678_v10, 0.0  ;;  %v4131_v10 = vld [vmem:[#allocation2 + $0x120] sm:$0xf]  ;;  %v8748_v58 = vpop.f32.mrf.mxu2 }
 0x387   : > { %v4412_v8 = vshrl.u32 %v4131_v10, 16  ;;  %v4415_v50 = vshll.u32 %v4131_v10, 16 }
 0x388   : > { %v4997_v54 = vadd.f32 %v8429_v16, %v4715_v32 }
 0x389   : > { %v4414_v15 = vrot.slane %v4412_v8, 7 }
 0x38a   : > { %v5679_v40 = vadd.f32 %v8618_v53, %v4997_v54  ;;  %4681 = vmatmul.bf16.gmra.mxu3 %v4553_v28  ;;  %v4065_v53 = vadd.f32 %v8153_v17, %v3383_v45  ;;  %v3384_v54 = vadd.f32 %v9332_v29, %v3102_v48  ;;  %v4132_v28 = vld [vmem:[#allocation2 + $0x124] sm:$0xf]  ;;  %v4130_v45 = vld [vmem:[#allocation2 + $0x11c] sm:$0x8]  ;;  %v3103_v48 = vadd.f32 %v9334_v6, %v8365_v22 }
 0x38b   : > { %v4421_v19 = vshrl.u32 %v4132_v28, 16  ;;  %v9335_v22 = vld [vmem:[#allocation74_spill] sm:$0xff] }
 0x38c   : > { %v5711_v31 = vmax.f32 %v5679_v40, 0.0  ;;  %v4066_v18 = vadd.f32 %v9333_v51, %v3384_v54  ;;  %v4534_v40 = vunpack.c.l.b16 %v4405_v38  ;;  %v3385_v54 = vadd.f32 %v9335_v22, %v3103_v48  ;;  %v9336_v38 = vld [vmem:[#allocation35_spill] sm:$0xff] }
 0x38d   : > { %v4642_v16 = vpop.f32.mrf.mxu3  ;;  %v4423_v1 = vrot.slane %v4421_v19, 7 }
 0x38e   : > { %v5741_v55 = vpack.c.bf16 %v5711_v31, %v5710_v9  ;;  %v4716_v32 = vadd.f32 %v4642_v16, %v4065_v53  ;;  %v4533_v31 = vunpack.c.l.b16 %v4396_v52  ;;  %v8752_v16 = vpop.f32.mrf.mxu0  ;;  %v4407_v53 = vshrl.u32 %v4130_v45, 16  ;;  %v9337_v45 = vld [vmem:[#allocation86_spill] sm:$0xff]  ;;  %v8763_v19 = vpop.f32.mrf.mxu2 }
 0x38f   : > { %v3104_v52 = vadd.f32 %v9336_v38, %v8389_v4  ;;  %v4067_v8 = vadd.f32 %v9337_v45, %v3385_v54  ;;  %v9340_v38 = vld [vmem:[#allocation38_spill] sm:$0xff] }
 0x390   : > { %5833 = vmatmul.bf16.gmra.mxu2 %v5741_v55  ;;  %v4998_v17 = vadd.f32 %v8449_v21, %v4716_v32  ;;  %v4554_v7 = vpack.c.b16 %v4534_v40, %v4533_v31  ;;  %v8756_v55 = vpop.f32.mrf.mxu1  ;;  %v4424_v32 = vshll.u32 %v4132_v28, 16  ;;  %v4419_v40 = vrot.slane %v4414_v15, 4  ;;  %v4134_v31 = vld [vmem:[#allocation2 + $0x134] sm:$0xf] }
 0x391   : > { %v4434_v22 = vshrl.u32 %v4134_v31, 16 }
 0x392   : > { %v5680_v36 = vadd.f32 %v8628_v43, %v4998_v17 }
 0x394   : > { %v5712_v51 = vmax.f32 %v5680_v36, 0.0  ;;  %v4135_v36 = vld [vmem:[#allocation2 + $0x138] sm:$0xf] }
 0x395   : > { %v4644_v35 = vpop.f32.mrf.mxu3  ;;  %v4443_v54 = vshrl.u32 %v4135_v36, 16  ;;  %v4446_v45 = vshll.u32 %v4135_v36, 16 }
 0x396   : > { %v4717_v9 = vadd.f32 %v4644_v35, %v4066_v18  ;;  %v4417_v18 = vor.u32 %v4415_v50, %v4414_v15  ;;  %v4426_v35 = vor.u32 %v4424_v32, %v4423_v1  ;;  %v8766_v48 = vpop.f32.mrf.mxu0 }
 0x398   : > { %v4999_v21 = vadd.f32 %v8461_v57, %v4717_v9  ;;  %v6469_v57 = vrot.slane %v4407_v53, 11  ;;  %v4427_v9 = vsel %vm7284_vm6, %v4419_v40, %v4426_v35  ;;  %v9339_v53 = vld [vmem:[#allocation89_spill] sm:$0xff]  ;;  %v4436_v40 = vrot.slane %v4434_v22, 7 }
 0x399   : > { %v4536_v1 = vunpack.c.l.b16 %v4427_v9  ;;  %v4445_v35 = vrot.slane %v4443_v54, 7  ;;  %v9343_v22 = vld [vmem:[#allocation81_spill] sm:$0xff] }
 0x39a   : > { %v5681_v29 = vadd.f32 %v8646_v27, %v4999_v21  ;;  %4686 = vmatmul.bf16.gmra.mxu3 %v4554_v7  ;;  %v9338_v27 = vld [vmem:[#allocation76_spill] sm:$0xff]  ;;  %v4418_v4 = vsel %vm7284_vm6, %v6469_v57, %v4417_v18  ;;  %v8772_v21 = vpop.f32.mrf.mxu1  ;;  %v4441_v36 = vrot.slane %v4436_v40, 4 }
 0x39b   : > { %v3386_v6 = vadd.f32 %v9338_v27, %v3104_v52  ;;  %v4535_v50 = vunpack.c.l.b16 %v4418_v4  ;;  %v3105_v52 = vadd.f32 %v9340_v38, %v8405_v42  ;;  %v9342_v42 = vld [vmem:[#allocation41_spill] sm:$0xff] }
 0x39c   : > { %v5713_v43 = vmax.f32 %v5681_v29, 0.0  ;;  %v4133_v29 = vld [vmem:[#allocation2 + $0x130] sm:$0x8] }
 0x39d   : > { %v4647_v17 = vpop.f32.mrf.mxu3  ;;  %v4068_v15 = vadd.f32 %v9339_v53, %v3386_v6  ;;  %v4555_v57 = vpack.c.b16 %v4536_v1, %v4535_v50  ;;  %v4429_v18 = vshrl.u32 %v4133_v29, 16  ;;  %v4137_v1 = vld [vmem:[#allocation2 + $0x148] sm:$0xf] }
 0x39e   : > { %v5742_v10 = vpack.c.bf16 %v5713_v43, %v5712_v51  ;;  %v4718_v28 = vadd.f32 %v4647_v17, %v4067_v8  ;;  %v8780_v8 = vpop.f32.mrf.mxu2  ;;  %v8784_v6 = vpop.f32.mrf.mxu0 }
 0x3a0   : > { %5838 = vmatmul.bf16.gmra.mxu2 %v5742_v10  ;;  %v5000_v7 = vadd.f32 %v8687_v46, %v4718_v28  ;;  %v4437_v46 = vshll.u32 %v4134_v31, 16  ;;  %v9341_v28 = vld [vmem:[#allocation79_spill] sm:$0xff]  ;;  %v6470_v31 = vrot.slane %v4429_v18, 11 }
 0x3a1   : > { %v3387_v27 = vadd.f32 %v9341_v28, %v3105_v52  ;;  %v4456_v52 = vshrl.u32 %v4137_v1, 16 }
 0x3a2   : > { %v5682_v43 = vadd.f32 %v8690_v37, %v5000_v7  ;;  %v3106_v37 = vadd.f32 %v9342_v42, %v8427_v2  ;;  %v8788_v9 = vpop.f32.mrf.mxu1  ;;  %v4439_v53 = vor.u32 %v4437_v46, %v4436_v40  ;;  %v9344_v46 = vld [vmem:[#allocation44_spill] sm:$0xff] }
 0x3a3   : > { %v4069_v50 = vadd.f32 %v8569_v30, %v3387_v27  ;;  %v4458_v27 = vrot.slane %v4456_v52, 7 }
 0x3a4   : > { %v5714_v4 = vmax.f32 %v5682_v43, 0.0  ;;  %v3388_v54 = vadd.f32 %v9343_v22, %v3106_v37  ;;  %v4440_v2 = vsel %vm7284_vm6, %v6470_v31, %v4439_v53  ;;  %v4459_v37 = vshll.u32 %v4137_v1, 16  ;;  %v9345_v53 = vld [vmem:[#allocation84_spill] sm:$0xff]  ;;  %v9346_v1 = vld [vmem:[#allocation47_spill] sm:$0xff] }
 0x3a5   : > { %v4649_v32 = vpop.f32.mrf.mxu3  ;;  %v4537_v18 = vunpack.c.l.b16 %v4440_v2  ;;  %v3108_v22 = vadd.f32 %v9346_v1, %v8454_v11  ;;  %v720_v2 = vld [vmem:[#allocation2 + $0x158] sm:$0x8]  ;;  %v4140_v11 = vld [vmem:[#allocation2 + $0x15c] sm:$0xf] }
 0x3a6   : > { %v4719_v51 = vadd.f32 %v4649_v32, %v4068_v15  ;;  %v4448_v15 = vor.u32 %v4446_v45, %v4445_v35  ;;  %v4138_v32 = vld [vmem:[#allocation2 + $0x14c] sm:$0xf]  ;;  %v3107_v35 = vadd.f32 %v9344_v46, %v8434_v5  ;;  %v8802_v45 = vpop.f32.mrf.mxu0 }
 0x3a7   : > { %v4465_v43 = vshrl.u32 %v4138_v32, 16 }
 0x3a8   : > { %v5001_v17 = vadd.f32 %v8704_v56, %v4719_v51  ;;  %v4449_v38 = vsel %vm7284_vm6, %v4441_v36, %v4448_v15  ;;  %v4136_v51 = vld [vmem:[#allocation2 + $0x144] sm:$0x8]  ;;  %v3389_v36 = vadd.f32 %v9345_v53, %v3107_v35 }
 0x3a9   : > { %v4538_v40 = vunpack.c.l.b16 %v4449_v38  ;;  %v4451_v28 = vshrl.u32 %v4136_v51, 16  ;;  %v6813_v38 = vld [vmem:[#allocation2 + $0x15c] sm:$0xff] }
 0x3aa   : > { %v5683_v10 = vadd.f32 %v8708_v61, %v5001_v17  ;;  %4691 = vmatmul.bf16.gmra.mxu3 %v4555_v57  ;;  %v8796_v17 = vpop.f32.mrf.mxu2  ;;  %v4070_v57 = vadd.f32 %v8581_v44, %v3388_v54  ;;  %4988 = vmatmul.bf16.gmra.mxu0 %v6813_v38  ;;  %v9351_v38 = vld [vmem:[#allocation62_spill] sm:$0xff] }
 0x3ab   : > { %v4556_v31 = vpack.c.b16 %v4538_v40, %v4537_v18  ;;  %v6471_v15 = vrot.slane %v4451_v28, 11  ;;  %v725_v40 = vld [vmem:[#allocation2 + $0x164] sm:$0x1] }
 0x3ac   : > { %v5715_v56 = vmax.f32 %v5683_v10, 0.0  ;;  %v726_v28 = vsel %vm7307_vm8, 0, %v725_v40 }
 0x3ad   : > { %v4652_v7 = vpop.f32.mrf.mxu3  ;;  %727 = vst [vmem:[#allocation2 + $0x164] sm:$0x1] %v726_v28  ;;  %v4481_v28 = vshll.u32 %v4140_v11, 16 }
 0x3ae   : > { %v5743_v61 = vpack.c.bf16 %v5715_v56, %v5714_v4  ;;  %v4720_v29 = vadd.f32 %v4652_v7, %v4069_v50  ;;  %v4467_v4 = vrot.slane %v4465_v43, 7  ;;  %v4468_v56 = vshll.u32 %v4138_v32, 16  ;;  %v8804_v7 = vpop.f32.mrf.mxu1  ;;  %v8821_v46 = vpop.f32.mrf.mxu0 }
 0x3af   : > { %v4461_v50 = vor.u32 %v4459_v37, %v4458_v27  ;;  %v721_v43 = vsel %vm7247_vm3, 0, %v720_v2  ;;  %v9350_v37 = vld [vmem:[#allocation87_spill] sm:$0xff] }
 0x3b0   : > { %5843 = vmatmul.bf16.gmra.mxu2 %v5743_v61  ;;  %v5002_v30 = vadd.f32 %v8720_v60, %v4720_v29  ;;  %v4463_v61 = vrot.slane %v4458_v27, 4  ;;  %v4470_v29 = vor.u32 %v4468_v56, %v4467_v4  ;;  %722 = vst [vmem:[#allocation2 + $0x158] sm:$0x8] %v721_v43  ;;  %v5071_v27 = vld [vmem:[#allocation2 + $0x15c] sm:$0xf]  ;;  %v3390_v4 = vadd.f32 %v9350_v37, %v3108_v22 }
 0x3b1   : > { %v4141_v56 = vld [vmem:[#allocation2 + $0x160] sm:$0xf] }
 0x3b2   : > { %v5684_v60 = vadd.f32 %v8724_v49, %v5002_v30  ;;  %v9347_v49 = vld [vmem:[#allocation59_spill] sm:$0xff]  ;;  %v8815_v30 = vpop.f32.mrf.mxu2  ;;  %v4471_v18 = vsel %vm7284_vm6, %v4463_v61, %v4470_v29  ;;  %v4072_v22 = vadd.f32 %v9351_v38, %v3390_v4  ;;  %v4490_v37 = vshll.u32 %v4141_v56, 16 }
 0x3b3   : > { %v4071_v52 = vadd.f32 %v9347_v49, %v3389_v36  ;;  %v4540_v36 = vunpack.c.l.b16 %v4471_v18 }
 0x3b4   : > { %v5716_v32 = vmax.f32 %v5684_v60, 0.0  ;;  %v5435_v60 = vshrl.u32 %v5071_v27, 16 }
 0x3b5   : > { %v4654_v10 = vpop.f32.mrf.mxu3 }
 0x3b6   : > { %v4721_v42 = vadd.f32 %v4654_v10, %v4070_v57  ;;  %v4462_v57 = vsel %vm7284_vm6, %v6471_v15, %v4461_v50  ;;  %v4478_v50 = vshrl.u32 %v4140_v11, 16  ;;  %v5437_v61 = vrot.slane %v5435_v60, 4  ;;  %v5073_v60 = vld [vmem:[#allocation2 + $0x164] sm:$0x1] }
 0x3b7   : > { %v4539_v53 = vunpack.c.l.b16 %v4462_v57  ;;  %v4139_v57 = vld [vmem:[#allocation2 + $0x158] sm:$0x8]  ;;  %v9354_v11 = vld [vmem:[#allocation90_spill] sm:$0xff] }
 0x3b8   : > { %v5003_v44 = vadd.f32 %v8736_v23, %v4721_v42  ;;  %v5072_v42 = vld [vmem:[#allocation2 + $0x160] sm:$0xf]  ;;  %v4480_v10 = vrot.slane %v4478_v50, 7 }
 0x3b9   : > { %v5444_v15 = vshll.u32 %v5072_v42, 16 }
 0x3ba   : > { %v5685_v5 = vadd.f32 %v8739_v3, %v5003_v44  ;;  %4696 = vmatmul.bf16.gmra.mxu3 %v4556_v31  ;;  %v5438_v44 = vshll.u32 %v5071_v27, 16  ;;  %v8826_v31 = vpop.f32.mrf.mxu1 }
 0x3bc   : > { %v5717_v54 = vmax.f32 %v5685_v5, 0.0  ;;  %v5448_v5 = vshrl.u32 %v5072_v42, 16  ;;  %v5440_v29 = vrot.slane %v5438_v44, 5  ;;  %v8833_v44 = vpop.f32.mrf.mxu2 }
 0x3bd   : > { %v4657_v23 = vpop.f32.mrf.mxu3 }
 0x3be   : > { %v5744_v3 = vpack.c.bf16 %v5717_v54, %v5716_v32  ;;  %v4722_v35 = vadd.f32 %v4657_v23, %v4071_v52  ;;  %v4487_v32 = vshrl.u32 %v4141_v56, 16  ;;  %v5446_v54 = vrot.slane %v5444_v15, 5  ;;  %v9352_v52 = vld [vmem:[#allocation110_spill] sm:$0xff]  ;;  %v9353_v23 = vld [vmem:[#allocation51_spill] sm:$0xff] }
 0x3bf   : > { %v5450_v2 = vrot.slane %v5448_v5, 4  ;;  %v5441_v49 = vor.u32 %v5440_v29, %v5437_v61  ;;  %v3109_v51 = vadd.f32 %v9353_v23, %v9352_v52  ;;  %v4951_v5 = vpop.f32.mrf.mxu0 }
 0x3c0   : > { %5848 = vmatmul.bf16.gmra.mxu2 %v5744_v3  ;;  %v5004_v1 = vadd.f32 %v8752_v16, %v4722_v35  ;;  %v4557_v3 = vpack.c.b16 %v4540_v36, %v4539_v53  ;;  %v4473_v16 = vshrl.u32 %v4139_v57, 16  ;;  %v4489_v35 = vrot.slane %v4487_v32, 7 }
 0x3c1   : > { %v5451_v18 = vor.u32 %v5450_v2, %v5446_v54  ;;  %v5442_v27 = vrot.slane %v5441_v49, 4  ;;  %v5454_v36 = vshll.u32 %v5073_v60, 16  ;;  %v3391_v61 = vadd.f32 %v9354_v11, %v3109_v51 }
 0x3c2   : > { %v5686_v42 = vadd.f32 %v8756_v55, %v5004_v1  ;;  %v4483_v55 = vor.u32 %v4481_v28, %v4480_v10  ;;  %v5633_v1 = vpop.f32.mrf.mxu1  ;;  %v6472_v56 = vrot.slane %v4473_v16, 11  ;;  %v4485_v32 = vrot.slane %v4480_v10, 4  ;;  %v9357_v28 = vld [vmem:[#allocation92_spill] sm:$0xff] }
 0x3c3   : > { %v5447_v15 = vsel %vm7678_vm11, %v5442_v27, %v5446_v54  ;;  %v5452_v53 = vrot.slane %v5451_v18, 4  ;;  %v5456_v29 = vrot.slane %v5454_v36, 5  ;;  %v4492_v2 = vor.u32 %v4490_v37, %v4489_v35 }
 0x3c4   : > { %v5505_v38 = vunpack.c.l.b16 %v5447_v15  ;;  %v5718_v52 = vmax.f32 %v5686_v42, 0.0  ;;  %v4484_v57 = vsel %vm7284_vm6, %v6472_v56, %v4483_v55  ;;  %v8850_v42 = vpop.f32.mrf.mxu2  ;;  %v9358_v15 = vld [vmem:[#allocation36_spill] sm:$0xff] }
 0x3c5   : > { %v4659_v43 = vpop.f32.mrf.mxu3  ;;  %v5457_v23 = vsel %vm7678_vm11, %v5452_v53, %v5456_v29  ;;  %v4493_v18 = vsel %vm7284_vm6, %v4485_v32, %v4492_v2  ;;  %v4541_v14 = vunpack.c.l.b16 %v4484_v57  ;;  %v3111_v53 = vadd.f32 %v9359_v0, %v9358_v15  ;;  %v9360_v29 = vld [vmem:[#allocation94_spill] sm:$0xff]  ;;  %v9365_v57 = vld [vmem:[#allocation64_spill] sm:$0xff]  ;;  %v9368_v15 = vld [vmem:[#allocation67_spill] sm:$0xff] }
 0x3c6   : > { %v4723_v40 = vadd.f32 %v4659_v43, %v4072_v22  ;;  %v9355_v22 = vld [vmem:[#allocation33_spill] sm:$0xff]  ;;  %v4542_v16 = vunpack.c.l.b16 %v4493_v18 }
 0x3c7   : > { %v4954_v35 = vpop.f32.mrf.mxu0  ;;  %v3393_v56 = vadd.f32 %v9360_v29, %v3111_v53 }
 0x3c8   : > { %v5005_v4 = vadd.f32 %v8766_v48, %v4723_v40  ;;  %v9356_v48 = vld [vmem:[#allocation54_spill] sm:$0xff] }
 0x3c9   : > { %v3110_v49 = vadd.f32 %v9356_v48, %v9355_v22 }
 0x3ca   : > { %v5687_v50 = vadd.f32 %v8772_v21, %v5005_v4  ;;  %4701 = vmatmul.bf16.gmra.mxu3 %v4557_v3  ;;  %v5506_v21 = vunpack.c.l.b16 %v5457_v23  ;;  %v4073_v3 = vadd.f32 %v8623_v41, %v3391_v61  ;;  %v5636_v60 = vpop.f32.mrf.mxu1 }
 0x3cb   : > { %v3392_v27 = vadd.f32 %v9357_v28, %v3110_v49 }
 0x3cc   : > { %v5719_v54 = vmax.f32 %v5687_v50, 0.0  ;;  %v5522_v40 = vpack.c.b16 %v5506_v21, %v5505_v38  ;;  %v4558_v50 = vpack.c.b16 %v4542_v16, %v4541_v14  ;;  %v8860_v32 = vpop.f32.mrf.mxu2 }
 0x3cd   : > { %v4662_v43 = vpop.f32.mrf.mxu3  ;;  %v4074_v37 = vadd.f32 %v8641_v25, %v3392_v27  ;;  %v9362_v25 = vld [vmem:[#allocation60_spill] sm:$0xff] }
 0x3ce   : > { %v5745_v51 = vpack.c.bf16 %v5719_v54, %v5718_v52  ;;  %v4724_v10 = vadd.f32 %v4662_v43, %v4073_v3  ;;  %5670 = vmatmul.bf16.gmra.mxu1 %v5522_v40  ;;  %v4075_v52 = vadd.f32 %v8651_v13, %v3393_v56 }
 0x3cf   : > { %v4956_v48 = vpop.f32.mrf.mxu0 }
 0x3d0   : > { %5853 = vmatmul.bf16.gmra.mxu2 %v5745_v51  ;;  %v5006_v41 = vadd.f32 %v8784_v6, %v4724_v10  ;;  %v9361_v6 = vld [vmem:[#allocation13_spill] sm:$0xff]  ;;  %v9364_v51 = vld [vmem:[#allocation40_spill] sm:$0xff] }
 0x3d1   : > { %v3112_v2 = vadd.f32 %v9362_v25, %v9361_v6  ;;  %v3113_v18 = vadd.f32 %v9365_v57, %v9364_v51  ;;  %v9370_v25 = vld [vmem:[#allocation46_spill] sm:$0xff] }
 0x3d2   : > { %v5688_v11 = vadd.f32 %v8788_v9, %v5006_v41  ;;  %v5638_v9 = vpop.f32.mrf.mxu1  ;;  %v9366_v41 = vld [vmem:[#allocation98_spill] sm:$0xff] }
 0x3d4   : > { %v5720_v38 = vmax.f32 %v5688_v11, 0.0  ;;  %v8870_v10 = vpop.f32.mrf.mxu2 }
 0x3d5   : > { %v4664_v4 = vpop.f32.mrf.mxu3 }
 0x3d6   : > { %v4725_v36 = vadd.f32 %v4664_v4, %v4074_v37  ;;  %v3395_v37 = vadd.f32 %v9366_v41, %v3113_v18  ;;  %v9367_v4 = vld [vmem:[#allocation43_spill] sm:$0xff] }
 0x3d7   : > { %v4959_v28 = vpop.f32.mrf.mxu0 }
 0x3d8   : > { %v5007_v61 = vadd.f32 %v8802_v45, %v4725_v36  ;;  %v9363_v45 = vld [vmem:[#allocation96_spill] sm:$0xff]  ;;  %v4077_v36 = vadd.f32 %v8673_v59, %v3395_v37 }
 0x3da   : > { %v5689_v55 = vadd.f32 %v8804_v7, %v5007_v61  ;;  %4706 = vmatmul.bf16.gmra.mxu3 %v4558_v50  ;;  %v3394_v7 = vadd.f32 %v9363_v45, %v3112_v2  ;;  %v5641_v14 = vpop.f32.mrf.mxu1  ;;  %v9369_v61 = vld [vmem:[#allocation100_spill] sm:$0xff]  ;;  %v9371_v2 = vld [vmem:[#allocation70_spill] sm:$0xff] }
 0x3dc   : > { %v5721_v22 = vmax.f32 %v5689_v55, 0.0  ;;  %v4076_v21 = vadd.f32 %v8660_v12, %v3394_v7  ;;  %v8878_v29 = vpop.f32.mrf.mxu2 }
 0x3dd   : > { %v4667_v49 = vpop.f32.mrf.mxu3 }
 0x3de   : > { %v5746_v54 = vpack.c.bf16 %v5721_v22, %v5720_v38  ;;  %v4726_v23 = vadd.f32 %v4667_v49, %v4075_v52  ;;  %v3115_v38 = vadd.f32 %v9371_v2, %v9370_v25 }
 0x3e0   : > { %5858 = vmatmul.bf16.gmra.mxu2 %v5746_v54  ;;  %v5008_v43 = vadd.f32 %v8821_v46, %v4726_v23  ;;  %v3114_v46 = vadd.f32 %v9368_v15, %v9367_v4  ;;  %v9372_v54 = vld [vmem:[#allocation102_spill] sm:$0xff] }
 0x3e1   : > { %v3397_v23 = vadd.f32 %v9372_v54, %v3115_v38 }
 0x3e2   : > { %v5690_v13 = vadd.f32 %v8826_v31, %v5008_v43  ;;  %v3396_v55 = vadd.f32 %v9369_v61, %v3114_v46  ;;  %v4961_v31 = vpop.f32.mrf.mxu0  ;;  %v9373_v43 = vld [vmem:[#allocation49_spill] sm:$0xff] }
 0x3e3   : > { %v4079_v18 = vadd.f32 %v8700_v33, %v3397_v23  ;;  %v9378_v46 = vld [vmem:[#allocation53_spill] sm:$0xff] }
 0x3e4   : > { %v5722_v0 = vmax.f32 %v5690_v13, 0.0  ;;  %v4078_v56 = vadd.f32 %v8684_v39, %v3396_v55  ;;  %v8884_v45 = vpop.f32.mrf.mxu2  ;;  %v9380_v55 = vld [vmem:[#allocation105_spill] sm:$0xff] }
 0x3e5   : > { %v4669_v3 = vpop.f32.mrf.mxu3 }
 0x3e6   : > { %v4727_v40 = vadd.f32 %v4669_v3, %v4076_v21  ;;  %v9374_v21 = vld [vmem:[#allocation73_spill] sm:$0xff] }
 0x3e7   : > { %v3116_v3 = vadd.f32 %v9374_v21, %v9373_v43 }
 0x3e8   : > { %v5009_v27 = vadd.f32 %v4951_v5, %v4727_v40  ;;  %v5643_v5 = vpop.f32.mrf.mxu1 }
 0x3ea   : > { %v5691_v16 = vadd.f32 %v5633_v1, %v5009_v27  ;;  %v4964_v7 = vpop.f32.mrf.mxu0 }
 0x3ec   : > { %v5723_v12 = vmax.f32 %v5691_v16, 0.0  ;;  %v9376_v16 = vld [vmem:[#allocation3_spill] sm:$0xff] }
 0x3ed   : > { %v4672_v53 = vpop.f32.mrf.mxu3  ;;  %v9377_v41 = vunpack.c.l.bf16 %v9376_v16  ;;  %v9383_v38 = vunpack.c.h.bf16 %v9376_v16 }
 0x3ee   : > { %v5747_v50 = vpack.c.bf16 %v5723_v12, %v5722_v0  ;;  %v4728_v11 = vadd.f32 %v4672_v53, %v4077_v36  ;;  %v9379_v0 = vld [vmem:[#allocation77_spill] sm:$0xff] }
 0x3ef   : > { %v3117_v12 = vadd.f32 %v9379_v0, %v9378_v46  ;;  %v9391_v46 = vld [vmem:[#allocation85_spill] sm:$0xff] }
 0x3f0   : > { %5863 = vmatmul.bf16.gmra.mxu2 %v5747_v50  ;;  %v5010_v1 = vadd.f32 %v4954_v35, %v4728_v11  ;;  %v5646_v39 = vpop.f32.mrf.mxu1 }
 0x3f2   : > { %v5692_v49 = vadd.f32 %v5636_v60, %v5010_v1  ;;  %v9375_v60 = vld [vmem:[#allocation104_spill] sm:$0xff]  ;;  %v4966_v33 = vpop.f32.mrf.mxu0 }
 0x3f4   : > { %v5724_v35 = vmax.f32 %v5692_v49, 0.0 }
 0x3f5   : > { %v4674_v6 = vpop.f32.mrf.mxu3 }
 0x3f6   : > { %v4729_v22 = vadd.f32 %v4674_v6, %v4078_v56  ;;  %v9381_v56 = vld [vmem:[#allocation48_spill] sm:$0xff] }
 0x3f7   : > { %v9382_v6 = vld [vmem:[#allocation80_spill] sm:$0xff] }
 0x3f8   : > { %v5011_v59 = vadd.f32 %v4956_v48, %v4729_v22  ;;  %v3398_v48 = vadd.f32 %v9375_v60, %v3116_v3  ;;  %v5648_v36 = vpop.f32.mrf.mxu1  ;;  %v3118_v25 = vadd.f32 %v9382_v6, %v9381_v56  ;;  %v9385_v3 = vld [vmem:[#allocation4_spill] sm:$0xff]  ;;  %v9394_v6 = vld [vmem:[#allocation5_spill] sm:$0xff] }
 0x3fa   : > { %v5693_v52 = vadd.f32 %v5638_v9, %v5011_v59  ;;  %v4080_v4 = vadd.f32 %v8718_v47, %v3398_v48 }
 0x3fc   : > { %v5725_v51 = vmax.f32 %v5693_v52, 0.0  ;;  %v9384_v52 = vld [vmem:[#allocation106_spill] sm:$0xff] }
 0x3fd   : > { %v4677_v57 = vpop.f32.mrf.mxu3  ;;  %v3400_v54 = vadd.f32 %v9384_v52, %v3118_v25  ;;  %v9395_v25 = vunpack.c.l.bf16 %v9394_v6 }
 0x3fe   : > { %v5748_v40 = vpack.c.bf16 %v5725_v51, %v5724_v35  ;;  %v4730_v13 = vadd.f32 %v4677_v57, %v4079_v18  ;;  %v9386_v35 = vunpack.c.l.bf16 %v9385_v3 }
 0x3ff   : > { %v4082_v57 = vadd.f32 %v8748_v58, %v3400_v54 }
 0x400   : > { %5868 = vmatmul.bf16.gmra.mxu2 %v5748_v40  ;;  %v5012_v27 = vadd.f32 %v4959_v28, %v4730_v13  ;;  %v3399_v28 = vadd.f32 %v9380_v55, %v3117_v12  ;;  %v5651_v23 = vpop.f32.mrf.mxu1  ;;  %v9387_v40 = vld [vmem:[#allocation56_spill] sm:$0xff]  ;;  %v9388_v13 = vld [vmem:[#allocation82_spill] sm:$0xff] }
 0x401   : > { %v3119_v60 = vadd.f32 %v9388_v13, %v9387_v40 }
 0x402   : > { %v5694_v50 = vadd.f32 %v5641_v14, %v5012_v27  ;;  %v4081_v59 = vadd.f32 %v8732_v63, %v3399_v28 }
 0x403   : > { %v5829_v9 = vpop.f32.mrf.mxu2 }
 0x404   : > { %v5830_v37 = vadd.f32 %v9377_v41, %v5829_v9  ;;  %v5726_v47 = vmax.f32 %v5694_v50, 0.0  ;;  %v9389_v41 = vld [vmem:[#allocation107_spill] sm:$0xff] }
 0x405   : > { %v4679_v15 = vpop.f32.mrf.mxu3 }
 0x406   : > { %5909 = vst.msk [vmem:[%s8894_s18] sm:$0xff] %vm503_vm0, %v5830_v37  ;;  %v4731_v53 = vadd.f32 %v4679_v15, %v4080_v4  ;;  %v3401_v37 = vadd.f32 %v9389_v41, %v3119_v60  ;;  %v9390_v15 = vld [vmem:[#allocation50_spill] sm:$0xff] }
 0x407   : > { %v3120_v0 = vadd.f32 %v9391_v46, %v9390_v15 }
 0x408   : > { %v5013_v11 = vadd.f32 %v4961_v31, %v4731_v53  ;;  %v4969_v31 = vpop.f32.mrf.mxu0  ;;  %v9392_v53 = vunpack.c.h.bf16 %v9385_v3  ;;  %v9399_v3 = vld [vmem:[#allocation55_spill] sm:$0xff] }
 0x40a   : > { %v5695_v61 = vadd.f32 %v5643_v5, %v5013_v11 }
 0x40b   : > { %v5831_v1 = vpop.f32.mrf.mxu2 }
 0x40c   : > { %v5727_v2 = vmax.f32 %v5695_v61, 0.0  ;;  %v5832_v22 = vadd.f32 %v9383_v38, %v5831_v1  ;;  %v9393_v61 = vld [vmem:[#allocation108_spill] sm:$0xff] }
 0x40d   : > { %v4682_v49 = vpop.f32.mrf.mxu3  ;;  %v3402_v55 = vadd.f32 %v9393_v61, %v3120_v0 }
 0x40e   : > { %5910 = vst.msk [vmem:[%s8894_s18 + $0x8] sm:$0xff] %vm503_vm0, %v5832_v22  ;;  %v5749_v14 = vpack.c.bf16 %v5727_v2, %v5726_v47  ;;  %v4732_v5 = vadd.f32 %v4682_v49, %v4081_v59  ;;  %v9396_v49 = vld [vmem:[#allocation52_spill] sm:$0xff] }
 0x40f   : > { %v4084_v2 = vadd.f32 %v8780_v8, %v3402_v55  ;;  %v9397_v59 = vld [vmem:[#allocation88_spill] sm:$0xff] }
 0x410   : > { %5873 = vmatmul.bf16.gmra.mxu2 %v5749_v14  ;;  %v5014_v21 = vadd.f32 %v4964_v7, %v4732_v5  ;;  %v4971_v27 = vpop.f32.mrf.mxu0  ;;  %v5653_v7 = vpop.f32.mrf.mxu1  ;;  %v3121_v14 = vadd.f32 %v9397_v59, %v9396_v49 }
 0x412   : > { %v5696_v48 = vadd.f32 %v5646_v39, %v5014_v21  ;;  %v4083_v39 = vadd.f32 %v8763_v19, %v3401_v37 }
 0x413   : > { %v5834_v43 = vpop.f32.mrf.mxu2 }
 0x414   : > { %v5835_v51 = vadd.f32 %v9386_v35, %v5834_v43  ;;  %v5728_v58 = vmax.f32 %v5696_v48, 0.0  ;;  %v9398_v43 = vld [vmem:[#allocation109_spill] sm:$0xff]  ;;  %v9400_v35 = vld [vmem:[#allocation91_spill] sm:$0xff] }
 0x415   : > { %v4684_v18 = vpop.f32.mrf.mxu3  ;;  %v3403_v21 = vadd.f32 %v9398_v43, %v3121_v14 }
 0x416   : > { %5911 = vst.msk [vmem:[%s8894_s18 + $0x10] sm:$0xff] %vm503_vm0, %v5835_v51  ;;  %v4733_v63 = vadd.f32 %v4684_v18, %v4082_v57  ;;  %v3122_v51 = vadd.f32 %v9400_v35, %v9399_v3  ;;  %v9401_v18 = vunpack.c.h.bf16 %v9394_v6 }
 0x418   : > { %v5015_v9 = vadd.f32 %v4966_v33, %v4733_v63  ;;  %v4974_v28 = vpop.f32.mrf.mxu0  ;;  %v5656_v38 = vpop.f32.mrf.mxu1 }
 0x41a   : > { %v5697_v16 = vadd.f32 %v5648_v36, %v5015_v9 }
 0x41b   : > { %v5836_v4 = vpop.f32.mrf.mxu2 }
 0x41c   : > { %v5729_v12 = vmax.f32 %v5697_v16, 0.0  ;;  %v5837_v50 = vadd.f32 %v9392_v53, %v5836_v4 }
 0x41d   : > { %v4687_v11 = vpop.f32.mrf.mxu3 }
 0x41e   : > { %5912 = vst.msk [vmem:[%s8894_s18 + $0x18] sm:$0xff] %vm503_vm0, %v5837_v50  ;;  %v5750_v33 = vpack.c.bf16 %v5729_v12, %v5728_v58  ;;  %v4734_v36 = vadd.f32 %v4687_v11, %v4083_v39  ;;  %v9405_v58 = vld [vmem:[#allocation93_spill] sm:$0xff] }
 0x41f   : > { %v3123_v12 = vadd.f32 %v9405_v58, %v8626_v62 }
 0x420   : > { %5878 = vmatmul.bf16.gmra.mxu2 %v5750_v33  ;;  %v5016_v56 = vadd.f32 %v4969_v31, %v4734_v36  ;;  %v4976_v13 = vpop.f32.mrf.mxu0  ;;  %v5658_v48 = vpop.f32.mrf.mxu1  ;;  %v9406_v36 = vld [vmem:[#allocation31_spill] sm:$0xff] }
 0x421   : > { %v3405_v61 = vadd.f32 %v9406_v36, %v3123_v12 }
 0x422   : > { %v5698_v5 = vadd.f32 %v5651_v23, %v5016_v56  ;;  %v4085_v23 = vadd.f32 %v8796_v17, %v3403_v21 }
 0x423   : > { %v5839_v1 = vpop.f32.mrf.mxu2 }
 0x424   : > { %v5840_v47 = vadd.f32 %v9395_v25, %v5839_v1  ;;  %v5730_v57 = vmax.f32 %v5698_v5, 0.0  ;;  %v9410_v5 = vld [vmem:[#allocation7_spill] sm:$0xff] }
 0x425   : > { %v4689_v22 = vpop.f32.mrf.mxu3 }
 0x426   : > { %5913 = vst.msk [vmem:[%s8894_s18 + $0x20] sm:$0xff] %vm503_vm0, %v5840_v47  ;;  %v4735_v19 = vadd.f32 %v4689_v22, %v4084_v2  ;;  %v4087_v47 = vadd.f32 %v8833_v44, %v3405_v61  ;;  %v9409_v22 = vld [vmem:[#allocation34_spill] sm:$0xff] }
 0x428   : > { %v5017_v52 = vadd.f32 %v4971_v27, %v4735_v19  ;;  %v9402_v27 = vld [vmem:[#allocation29_spill] sm:$0xff]  ;;  %v4979_v53 = vpop.f32.mrf.mxu0  ;;  %v5661_v39 = vpop.f32.mrf.mxu1 }
 0x429   : > { %v3404_v16 = vadd.f32 %v9402_v27, %v3122_v51 }
 0x42a   : > { %v5699_v54 = vadd.f32 %v5653_v7, %v5017_v52  ;;  %v9403_v7 = vld [vmem:[#allocation6_spill] sm:$0xff]  ;;  %v9411_v52 = vunpack.c.l.bf16 %v9410_v5 }
 0x42b   : > { %v5841_v31 = vpop.f32.mrf.mxu2  ;;  %v9404_v4 = vunpack.c.l.bf16 %v9403_v7  ;;  %v4086_v46 = vadd.f32 %v8815_v30, %v3404_v16  ;;  %v9408_v6 = vunpack.c.h.bf16 %v9403_v7  ;;  %v9416_v7 = vld [vmem:[#allocation39_spill] sm:$0xff] }
 0x42c   : > { %v5731_v8 = vmax.f32 %v5699_v54, 0.0  ;;  %v5842_v40 = vadd.f32 %v9401_v18, %v5841_v31  ;;  %v9412_v31 = vld [vmem:[#allocation97_spill] sm:$0xff] }
 0x42d   : > { %v4692_v60 = vpop.f32.mrf.mxu3  ;;  %v3125_v3 = vadd.f32 %v9412_v31, %v8649_v26 }
 0x42e   : > { %5914 = vst.msk [vmem:[%s8894_s18 + $0x28] sm:$0xff] %vm503_vm0, %v5842_v40  ;;  %v5751_v63 = vpack.c.bf16 %v5731_v8, %v5730_v57  ;;  %v4736_v9 = vadd.f32 %v4692_v60, %v4085_v23  ;;  %v9413_v8 = vld [vmem:[#allocation37_spill] sm:$0xff]  ;;  %v9414_v60 = vld [vmem:[#allocation99_spill] sm:$0xff] }
 0x42f   : > { %v3407_v18 = vadd.f32 %v9413_v8, %v3125_v3  ;;  %v3126_v23 = vadd.f32 %v9414_v60, %v8658_v34  ;;  %v9417_v34 = vld [vmem:[#allocation8_spill] sm:$0xff] }
 0x430   : > { %5883 = vmatmul.bf16.gmra.mxu2 %v5751_v63  ;;  %v5018_v37 = vadd.f32 %v4974_v28, %v4736_v9  ;;  %v9407_v28 = vld [vmem:[#allocation95_spill] sm:$0xff]  ;;  %v4981_v59 = vpop.f32.mrf.mxu0  ;;  %v5663_v14 = vpop.f32.mrf.mxu1 }
 0x431   : > { %v3124_v1 = vadd.f32 %v9407_v28, %v8644_v24  ;;  %v4089_v16 = vadd.f32 %v8860_v32, %v3407_v18 }
 0x432   : > { %v5700_v50 = vadd.f32 %v5656_v38, %v5018_v37 }
 0x433   : > { %v5844_v41 = vpop.f32.mrf.mxu2  ;;  %v3406_v49 = vadd.f32 %v9409_v22, %v3124_v1 }
 0x434   : > { %v5845_v15 = vadd.f32 %v9404_v4, %v5844_v41  ;;  %v5732_v30 = vmax.f32 %v5700_v50, 0.0  ;;  %v3408_v4 = vadd.f32 %v9416_v7, %v3126_v23  ;;  %v9419_v50 = vld [vmem:[#allocation101_spill] sm:$0xff] }
 0x435   : > { %v4694_v0 = vpop.f32.mrf.mxu3  ;;  %v4088_v43 = vadd.f32 %v8850_v42, %v3406_v49 }
 0x436   : > { %5915 = vst.msk [vmem:[%s8894_s18 + $0x30] sm:$0xff] %vm503_vm0, %v5845_v15  ;;  %v4737_v17 = vadd.f32 %v4694_v0, %v4086_v46  ;;  %v9418_v0 = vunpack.c.l.bf16 %v9417_v34  ;;  %v4090_v12 = vadd.f32 %v8870_v10, %v3408_v4 }
 0x438   : > { %v5019_v11 = vadd.f32 %v4976_v13, %v4737_v17  ;;  %v4984_v40 = vpop.f32.mrf.mxu0  ;;  %v5666_v26 = vpop.f32.mrf.mxu1 }
 0x43a   : > { %v5701_v33 = vadd.f32 %v5658_v48, %v5019_v11  ;;  %v9415_v48 = vunpack.c.h.bf16 %v9410_v5  ;;  %v3127_v11 = vadd.f32 %v9419_v50, %v8663_v20 }
 0x43b   : > { %v5846_v55 = vpop.f32.mrf.mxu2 }
 0x43c   : > { %v5733_v56 = vmax.f32 %v5701_v33, 0.0  ;;  %v5847_v25 = vadd.f32 %v9408_v6, %v5846_v55  ;;  %v9420_v55 = vld [vmem:[#allocation42_spill] sm:$0xff] }
 0x43d   : > { %v4697_v62 = vpop.f32.mrf.mxu3  ;;  %v3409_v28 = vadd.f32 %v9420_v55, %v3127_v11 }
 0x43e   : > { %5916 = vst.msk [vmem:[%s8894_s18 + $0x38] sm:$0xff] %vm503_vm0, %v5847_v25  ;;  %v5752_v2 = vpack.c.bf16 %v5733_v56, %v5732_v30  ;;  %v4738_v38 = vadd.f32 %v4697_v62, %v4087_v47  ;;  %v9421_v30 = vld [vmem:[#allocation66_spill] sm:$0xff]  ;;  %v9422_v56 = vld [vmem:[#allocation103_spill] sm:$0xff]  ;;  %v9423_v62 = vunpack.c.h.bf16 %v9417_v34 }
 0x43f   : > { %v3128_v6 = vadd.f32 %v9422_v56, %v9421_v30 }
 0x440   : > { %5888 = vmatmul.bf16.gmra.mxu2 %v5752_v2  ;;  %v5020_v24 = vadd.f32 %v4979_v53, %v4738_v38  ;;  %v4986_v17 = vpop.f32.mrf.mxu0  ;;  %v4091_v38 = vadd.f32 %v8878_v29, %v3409_v28 }
 0x442   : > { %v5702_v35 = vadd.f32 %v5661_v39, %v5020_v24  ;;  %v5668_v39 = vpop.f32.mrf.mxu1 }
 0x443   : > { %v5849_v19 = vpop.f32.mrf.mxu2 }
 0x444   : > { %v5850_v54 = vadd.f32 %v9411_v52, %v5849_v19  ;;  %v5734_v63 = vmax.f32 %v5702_v35, 0.0  ;;  %v9425_v52 = vld [vmem:[#allocation9_spill] sm:$0xff] }
 0x445   : > { %v4699_v21 = vpop.f32.mrf.mxu3 }
 0x446   : > { %5917 = vst.msk [vmem:[%s8894_s18 + $0x40] sm:$0xff] %vm503_vm0, %v5850_v54  ;;  %v4739_v44 = vadd.f32 %v4699_v21, %v4088_v43  ;;  %v9426_v54 = vunpack.c.l.bf16 %v9425_v52 }
 0x448   : > { %v5021_v51 = vadd.f32 %v4981_v59, %v4739_v44  ;;  %v4989_v20 = vpop.f32.mrf.mxu0 }
 0x44a   : > { %v5703_v57 = vadd.f32 %v5663_v14, %v5021_v51  ;;  %v9424_v14 = vld [vmem:[#allocation45_spill] sm:$0xff] }
 0x44b   : > { %v5851_v13 = vpop.f32.mrf.mxu2  ;;  %v5671_v49 = vpop.f32.mrf.mxu1  ;;  %v3410_v19 = vadd.f32 %v9424_v14, %v3128_v6  ;;  %v9446_v14 = vld [vmem:[#allocation17_spill] sm:$0xff] }
 0x44c   : > { %v5735_v42 = vmax.f32 %v5703_v57, 0.0  ;;  %v5852_v9 = vadd.f32 %v9415_v48, %v5851_v13  ;;  %v9427_v13 = vunpack.c.h.bf16 %v9425_v52  ;;  %v9448_v52 = vunpack.c.h.bf16 %v9446_v14 }
 0x44d   : > { %v4702_v27 = vpop.f32.mrf.mxu3  ;;  %v4092_v21 = vadd.f32 %v8884_v45, %v3410_v19  ;;  %v9447_v19 = vunpack.c.l.bf16 %v9446_v14 }
 0x44e   : > { %5918 = vst.msk [vmem:[%s8894_s18 + $0x48] sm:$0xff] %vm503_vm0, %v5852_v9  ;;  %v5753_v41 = vpack.c.bf16 %v5735_v42, %v5734_v63  ;;  %v4740_v37 = vadd.f32 %v4702_v27, %v4089_v16  ;;  %v9428_v63 = vld [vmem:[#allocation10_spill] sm:$0xff] }
 0x44f   : > { %v9429_v42 = vunpack.c.l.bf16 %v9428_v63 }
 0x450   : > { %5893 = vmatmul.bf16.gmra.mxu2 %v5753_v41  ;;  %v5022_v46 = vadd.f32 %v4984_v40, %v4740_v37  ;;  %v4991_v29 = vpop.f32.mrf.mxu0  ;;  %v9431_v41 = vld [vmem:[#allocation12_spill] sm:$0xff] }
 0x451   : > { %v9432_v37 = vunpack.c.l.bf16 %v9431_v41 }
 0x452   : > { %v5704_v33 = vadd.f32 %v5666_v26, %v5022_v46  ;;  %v9430_v26 = vunpack.c.h.bf16 %v9428_v63 }
 0x453   : > { %v5854_v15 = vpop.f32.mrf.mxu2  ;;  %v5673_v51 = vpop.f32.mrf.mxu1 }
 0x454   : > { %v5855_v58 = vadd.f32 %v9418_v0, %v5854_v15  ;;  %v5736_v10 = vmax.f32 %v5704_v33, 0.0  ;;  %v9433_v15 = vunpack.c.h.bf16 %v9431_v41  ;;  %v9434_v0 = vld [vmem:[#allocation15_spill] sm:$0xff] }
 0x455   : > { %v4704_v53 = vpop.f32.mrf.mxu3 }
 0x456   : > { %5919 = vst.msk [vmem:[%s8894_s18 + $0x50] sm:$0xff] %vm503_vm0, %v5855_v58  ;;  %v4741_v32 = vadd.f32 %v4704_v53, %v4090_v12  ;;  %v9435_v58 = vunpack.c.l.bf16 %v9434_v0  ;;  %v9436_v53 = vunpack.c.h.bf16 %v9434_v0 }
 0x458   : > { %v5023_v36 = vadd.f32 %v4986_v17, %v4741_v32  ;;  %v9437_v32 = vld [vmem:[#allocation16_spill] sm:$0xff] }
 0x45a   : > { %v5705_v61 = vadd.f32 %v5668_v39, %v5023_v36  ;;  %v9438_v39 = vunpack.c.l.bf16 %v9437_v32 }
 0x45b   : > { %v5856_v1 = vpop.f32.mrf.mxu2 }
 0x45c   : > { %v5737_v25 = vmax.f32 %v5705_v61, 0.0  ;;  %v5857_v47 = vadd.f32 %v9423_v62, %v5856_v1  ;;  %v9439_v61 = vunpack.c.h.bf16 %v9437_v32  ;;  %v9440_v1 = vld [vmem:[#allocation18_spill] sm:$0xff] }
 0x45d   : > { %v4707_v2 = vpop.f32.mrf.mxu3  ;;  %v9441_v30 = vunpack.c.l.bf16 %v9440_v1 }
 0x45e   : > { %5920 = vst.msk [vmem:[%s8894_s18 + $0x58] sm:$0xff] %vm503_vm0, %v5857_v47  ;;  %v5754_v22 = vpack.c.bf16 %v5737_v25, %v5736_v10  ;;  %v4742_v59 = vadd.f32 %v4707_v2, %v4091_v38  ;;  %v9442_v10 = vunpack.c.h.bf16 %v9440_v1  ;;  %v9443_v47 = vld [vmem:[#allocation20_spill] sm:$0xff] }
 0x460   : > { %5898 = vmatmul.bf16.gmra.mxu2 %v5754_v22  ;;  %v5024_v5 = vadd.f32 %v4989_v20, %v4742_v59  ;;  %v9444_v20 = vunpack.c.l.bf16 %v9443_v47  ;;  %v9445_v22 = vunpack.c.h.bf16 %v9443_v47 }
 0x462   : > { %v5706_v44 = vadd.f32 %v5671_v49, %v5024_v5 }
 0x463   : > { %v5859_v24 = vpop.f32.mrf.mxu2 }
 0x464   : > { %v5860_v43 = vadd.f32 %v9426_v54, %v5859_v24  ;;  %v5738_v18 = vmax.f32 %v5706_v44, 0.0 }
 0x465   : > { %v4709_v31 = vpop.f32.mrf.mxu3 }
 0x466   : > { %5921 = vst.msk [vmem:[%s8894_s18 + $0x60] sm:$0xff] %vm503_vm0, %v5860_v43  ;;  %v4743_v3 = vadd.f32 %v4709_v31, %v4092_v21  ;;  %v9449_v21 = vld [vmem:[#allocation19_spill] sm:$0xff] }
 0x467   : > { %v9450_v31 = vunpack.c.l.bf16 %v9449_v21  ;;  %v9451_v44 = vunpack.c.h.bf16 %v9449_v21 }
 0x468   : > { %v5025_v35 = vadd.f32 %v4991_v29, %v4743_v3 }
 0x46a   : > { %v5707_v57 = vadd.f32 %v5673_v51, %v5025_v35 }
 0x46b   : > { %v5861_v8 = vpop.f32.mrf.mxu2 }
 0x46c   : > { %v5739_v40 = vmax.f32 %v5707_v57, 0.0  ;;  %v5862_v60 = vadd.f32 %v9427_v13, %v5861_v8  ;;  %v9452_v57 = vld [vmem:[#allocation21_spill] sm:$0xff] }
 0x46d   : > { %v9453_v8 = vunpack.c.l.bf16 %v9452_v57  ;;  %v9454_v13 = vunpack.c.h.bf16 %v9452_v57 }
 0x46e   : > { %5922 = vst.msk [vmem:[%s8894_s18 + $0x68] sm:$0xff] %vm503_vm0, %v5862_v60  ;;  %v5755_v45 = vpack.c.bf16 %v5739_v40, %v5738_v18 }
 0x470   : > { %5903 = vmatmul.bf16.gmra.mxu2 %v5755_v45 }
 0x473   : > { %v5864_v23 = vpop.f32.mrf.mxu2 }
 0x474   : > { %v5865_v48 = vadd.f32 %v9429_v42, %v5864_v23 }
 0x476   : > { %5923 = vst.msk [vmem:[%s8894_s18 + $0x70] sm:$0xff] %vm503_vm0, %v5865_v48 }
 0x47b   : > { %v5866_v9 = vpop.f32.mrf.mxu2 }
 0x47c   : > { %v5867_v27 = vadd.f32 %v9430_v26, %v5866_v9 }
 0x47e   : > { %5924 = vst.msk [vmem:[%s8894_s18 + $0x78] sm:$0xff] %vm503_vm0, %v5867_v27 }
 0x483   : > { %v5869_v16 = vpop.f32.mrf.mxu2 }
 0x484   : > { %v5870_v7 = vadd.f32 %v9432_v37, %v5869_v16 }
 0x486   : > { %5925 = vst.msk [vmem:[%s8894_s18 + $0x80] sm:$0xff] %vm503_vm0, %v5870_v7 }
 0x48b   : > { %v5871_v4 = vpop.f32.mrf.mxu2 }
 0x48c   : > { %v5872_v46 = vadd.f32 %v9433_v15, %v5871_v4 }
 0x48e   : > { %5926 = vst.msk [vmem:[%s8894_s18 + $0x88] sm:$0xff] %vm503_vm0, %v5872_v46 }
 0x493   : > { %v5874_v34 = vpop.f32.mrf.mxu2 }
 0x494   : > { %v5875_v12 = vadd.f32 %v9435_v58, %v5874_v34 }
 0x496   : > { %5927 = vst.msk [vmem:[%s8894_s18 + $0x90] sm:$0xff] %vm503_vm0, %v5875_v12 }
 0x49b   : > { %v5876_v17 = vpop.f32.mrf.mxu2 }
 0x49c   : > { %v5877_v50 = vadd.f32 %v9436_v53, %v5876_v17 }
 0x49e   : > { %5928 = vst.msk [vmem:[%s8894_s18 + $0x98] sm:$0xff] %vm503_vm0, %v5877_v50 }
 0x4a3   : > { %v5879_v11 = vpop.f32.mrf.mxu2 }
 0x4a4   : > { %v5880_v33 = vadd.f32 %v9438_v39, %v5879_v11 }
 0x4a6   : > { %5929 = vst.msk [vmem:[%s8894_s18 + $0xa0] sm:$0xff] %vm503_vm0, %v5880_v33 }
 0x4ab   : > { %v5881_v36 = vpop.f32.mrf.mxu2 }
 0x4ac   : > { %v5882_v55 = vadd.f32 %v9439_v61, %v5881_v36 }
 0x4ae   : > { %5930 = vst.msk [vmem:[%s8894_s18 + $0xa8] sm:$0xff] %vm503_vm0, %v5882_v55 }
 0x4b3   : > { %v5884_v28 = vpop.f32.mrf.mxu2 }
 0x4b4   : > { %v5885_v56 = vadd.f32 %v9441_v30, %v5884_v28 }
 0x4b6   : > { %5931 = vst.msk [vmem:[%s8894_s18 + $0xb0] sm:$0xff] %vm503_vm0, %v5885_v56 }
 0x4bb   : > { %v5886_v6 = vpop.f32.mrf.mxu2 }
 0x4bc   : > { %v5887_v25 = vadd.f32 %v9442_v10, %v5886_v6 }
 0x4be   : > { %5932 = vst.msk [vmem:[%s8894_s18 + $0xb8] sm:$0xff] %vm503_vm0, %v5887_v25 }
 0x4c3   : > { %v5889_v62 = vpop.f32.mrf.mxu2 }
 0x4c4   : > { %v5890_v2 = vadd.f32 %v9444_v20, %v5889_v62 }
 0x4c6   : > { %5933 = vst.msk [vmem:[%s8894_s18 + $0xc0] sm:$0xff] %vm503_vm0, %v5890_v2 }
 0x4cb   : > { %v5891_v38 = vpop.f32.mrf.mxu2 }
 0x4cc   : > { %v5892_v49 = vadd.f32 %v9445_v22, %v5891_v38 }
 0x4ce   : > { %5934 = vst.msk [vmem:[%s8894_s18 + $0xc8] sm:$0xff] %vm503_vm0, %v5892_v49 }
 0x4d3   : > { %v5894_v59 = vpop.f32.mrf.mxu2 }
 0x4d4   : > { %v5895_v24 = vadd.f32 %v9447_v19, %v5894_v59 }
 0x4d6   : > { %5935 = vst.msk [vmem:[%s8894_s18 + $0xd0] sm:$0xff] %vm503_vm0, %v5895_v24 }
 0x4db   : > { %v5896_v5 = vpop.f32.mrf.mxu2 }
 0x4dc   : > { %v5897_v54 = vadd.f32 %v9448_v52, %v5896_v5 }
 0x4de   : > { %5936 = vst.msk [vmem:[%s8894_s18 + $0xd8] sm:$0xff] %vm503_vm0, %v5897_v54 }
 0x4e3   : > { %v5899_v43 = vpop.f32.mrf.mxu2 }
 0x4e4   : > { %v5900_v3 = vadd.f32 %v9450_v31, %v5899_v43 }
 0x4e6   : > { %5937 = vst.msk [vmem:[%s8894_s18 + $0xe0] sm:$0xff] %vm503_vm0, %v5900_v3 }
 0x4eb   : > { %v5901_v29 = vpop.f32.mrf.mxu2 }
 0x4ec   : > { %v5902_v35 = vadd.f32 %v9451_v44, %v5901_v29 }
 0x4ee   : > { %5938 = vst.msk [vmem:[%s8894_s18 + $0xe8] sm:$0xff] %vm503_vm0, %v5902_v35 }
 0x4f3   : > { %v5904_v51 = vpop.f32.mrf.mxu2 }
 0x4f4   : > { %v5905_v18 = vadd.f32 %v9453_v8, %v5904_v51 }
 0x4f6   : > { %5939 = vst.msk [vmem:[%s8894_s18 + $0xf0] sm:$0xff] %vm503_vm0, %v5905_v18 }
 0x4fb   : > { %v5906_v40 = vpop.f32.mrf.mxu2 }
 0x4fc   : > { %v5907_v60 = vadd.f32 %v9454_v13, %v5906_v40 }
 0x4fe   : > { %5940 = vst.msk [vmem:[%s8894_s18 + $0xf8] sm:$0xff] %vm503_vm0, %v5907_v60 }
 0x4ff PF: > { %s18_s27 = sadd.s32 1, %s7015_s27  }
 0x500   : > { %p15_p4 = scmp.ge.s32.totalorder %s18_s27, 4  }
 0x502   :  { %17 = sbr.rel (!%p15_p4) target bundleno = 1 (0x1), region = 93 }

</bundles_post_ra>
